<compile_context>
chip_gen: v5e
topology: v5e:2x2
jax: 0.10.0
libtpu: 0.0.40
codegen_flags: <defaults>
</compile_context>

<pallas_src>
import jax
import jax.numpy as jnp
from jax.experimental import pallas as pl
from jax.experimental.pallas import tpu as pltpu

# ----------------------------- config (small, structure-faithful) ------------
BATCH = 2
IN_CHANS = 3
IMG = 32
PATCH = 16
GRID_HW = IMG // PATCH                    # 2
NUM_PATCHES = GRID_HW * GRID_HW           # 4
NUM_TOKENS = NUM_PATCHES + 1              # 5 (cls token + patches)
EMBED = 48
NUM_HEADS = 3
HEAD_DIM = EMBED // NUM_HEADS             # 16
MLP_HIDDEN = 4 * EMBED                    # 192 (mlp_ratio=4, as in vit_tiny)
DEPTH = 2
NUM_CLASSES = 5
LN_EPS = 1e-6

# padded (lane-dense) sizes
D_PAD = 128                               # embed 48 -> 128 lanes
HID_PAD = 256                             # mlp hidden 192 -> 256 lanes
T_PAD = 8                                 # tokens 5 -> 8 sublanes
ROWS = BATCH * T_PAD                      # 16 token rows total
PATCH_DIM = IN_CHANS * PATCH * PATCH      # 768 (already a multiple of 128)
ATTN_SCALE = float(HEAD_DIM) ** -0.5
INV_SQRT2 = 0.7071067811865476


# ----------------------------- in-kernel math helpers -------------------------
def _erf(z):
    # Abramowitz & Stegun 7.1.26 rational approximation, |error| <= 1.5e-7,
    # i.e. exact erf at float32 precision (uses only VPU ops + one EUP exp).
    # TODO(synk): switch to jax.lax.erf if/when Mosaic exposes an erf lowering.
    a1, a2, a3, a4, a5 = 0.254829592, -0.284496736, 1.421413741, -1.453152027, 1.061405429
    p = 0.3275911
    az = jnp.abs(z)
    t = 1.0 / (1.0 + p * az)
    poly = ((((a5 * t + a4) * t + a3) * t + a2) * t + a1) * t
    e = 1.0 - poly * jnp.exp(-az * az)
    return jnp.where(z < 0.0, -e, e)


def _gelu_exact(x):
    # Matches nn.GELU() default (erf-based, not tanh-approx).
    return 0.5 * x * (1.0 + _erf(x * INV_SQRT2))


def _layernorm(x, g, b):
    # x: (ROWS, D_PAD) with real features in columns [0, EMBED).  Stats are taken
    # over the real features only; padded gamma/beta are zero so padded columns
    # come out exactly zero.
    xr = x[:, :EMBED]
    mean = jnp.mean(xr, axis=-1, keepdims=True)
    var = jnp.mean(jnp.square(xr - mean), axis=-1, keepdims=True)
    inv = jax.lax.rsqrt(var + LN_EPS)
    return (x - mean) * inv * g + b


# ----------------------------- fused ViT forward kernel -----------------------
def _vit_kernel(patches_ref, patch_w_ref, base_ref,
                ln1_g_ref, ln1_b_ref, ln2_g_ref, ln2_b_ref,
                qkv_w_ref, qkv_b_ref, proj_w_ref, proj_b_ref,
                fc1_w_ref, fc1_b_ref, fc2_w_ref, fc2_b_ref,
                norm_g_ref, norm_b_ref, head_w_ref, head_b_ref,
                out_ref, attn_ref):
    f32 = jnp.float32

    # Patch embedding (Conv2d k=16,s=16 == flattened-patch matmul).  `base` already
    # holds cls+pos for row 0, pos+conv-bias for patch rows, zeros for pad rows.
    x = jnp.dot(patches_ref[...], patch_w_ref[...],
                preferred_element_type=f32) + base_ref[...]          # (ROWS, D_PAD)

    for d in range(DEPTH):
        # ----- multi-head self-attention sub-block (pre-norm) -----
        h = _layernorm(x, ln1_g_ref[d], ln1_b_ref[d])

        q_all = jnp.dot(h, qkv_w_ref[d * 3 + 0], preferred_element_type=f32) + qkv_b_ref[d * 3 + 0]
        k_all = jnp.dot(h, qkv_w_ref[d * 3 + 1], preferred_element_type=f32) + qkv_b_ref[d * 3 + 1]
        v_all = jnp.dot(h, qkv_w_ref[d * 3 + 2], preferred_element_type=f32) + qkv_b_ref[d * 3 + 2]

        attn_ref[...] = jnp.zeros_like(attn_ref)
        for b in range(BATCH):
            r0 = b * T_PAD
            for hd in range(NUM_HEADS):
                c0 = hd * HEAD_DIM
                q = q_all[r0:r0 + NUM_TOKENS, c0:c0 + HEAD_DIM]      # (T, Dh)
                k = k_all[r0:r0 + NUM_TOKENS, c0:c0 + HEAD_DIM]
                v = v_all[r0:r0 + NUM_TOKENS, c0:c0 + HEAD_DIM]
                s = jnp.dot(q, k.T, preferred_element_type=f32) * ATTN_SCALE
                s = s - jnp.max(s, axis=-1, keepdims=True)
                p = jnp.exp(s)
                p = p / jnp.sum(p, axis=-1, keepdims=True)
                o = jnp.dot(p, v, preferred_element_type=f32)        # (T, Dh)
                attn_ref[r0:r0 + NUM_TOKENS, c0:c0 + HEAD_DIM] = o.astype(attn_ref.dtype)

        a = jnp.dot(attn_ref[...], proj_w_ref[d],
                    preferred_element_type=f32) + proj_b_ref[d]
        x = x + a                                                     # residual

        # ----- MLP sub-block (pre-norm), GELU fused as epilogue -----
        h2 = _layernorm(x, ln2_g_ref[d], ln2_b_ref[d])
        f1 = jnp.dot(h2, fc1_w_ref[d], preferred_element_type=f32) + fc1_b_ref[d]
        f1 = _gelu_exact(f1)
        f2 = jnp.dot(f1, fc2_w_ref[d], preferred_element_type=f32) + fc2_b_ref[d]
        x = x + f2                                                    # residual

    # Final LayerNorm + classification head on the whole slab (lane-dense store);
    # the cls rows / real classes are sliced out cheaply on the host side.
    xn = _layernorm(x, norm_g_ref[...], norm_b_ref[...])
    logits = jnp.dot(xn, head_w_ref[...], preferred_element_type=f32) + head_b_ref[...]
    out_ref[...] = logits.astype(out_ref.dtype)


# ----------------------------- wrapper -----------------------------------------
def vit_forward(padded, x):
    p = PATCH
    gh = gw = GRID_HW

    # Patch extraction: NCHW -> (B, num_patches, C*p*p) in (c, ph, pw) order, placed
    # into the padded token-row layout [B*T_PAD, PATCH_DIM] (cls/pad rows are zero).
    patches = (x.reshape(BATCH, IN_CHANS, gh, p, gw, p)
               .transpose(0, 2, 4, 1, 3, 5)
               .reshape(BATCH, NUM_PATCHES, PATCH_DIM))
    patches_padded = jnp.zeros((BATCH, T_PAD, PATCH_DIM), jnp.float32)
    patches_padded = patches_padded.at[:, 1:1 + NUM_PATCHES, :].set(patches)
    patches_padded = patches_padded.reshape(ROWS, PATCH_DIM)

    args = (patches_padded,
            padded["patch_w"], padded["base"],
            padded["ln1_g"], padded["ln1_b"], padded["ln2_g"], padded["ln2_b"],
            padded["qkv_w"], padded["qkv_b"], padded["proj_w"], padded["proj_b"],
            padded["fc1_w"], padded["fc1_b"], padded["fc2_w"], padded["fc2_b"],
            padded["norm_g"], padded["norm_b"], padded["head_w"], padded["head_b"])

    vmem = pl.BlockSpec(memory_space=pltpu.MemorySpace.VMEM)
    out = pl.pallas_call(
        _vit_kernel,
        out_shape=jax.ShapeDtypeStruct((ROWS, D_PAD), jnp.float32),
        in_specs=[vmem] * len(args),
        out_specs=vmem,
        scratch_shapes=[pltpu.VMEM((ROWS, D_PAD), jnp.float32)],
    )(*args)

    # cls token of each batch lives at row b*T_PAD; real classes are columns [:5].
    logits = out.reshape(BATCH, T_PAD, D_PAD)[:, 0, :NUM_CLASSES]
    return logits


# ----------------------------- deterministic parameter init -------------------
def init_params(key):
    def nrm(k, shape):
        return (0.02 * jax.random.normal(k, shape)).astype(jnp.float32)

    keys = jax.random.split(key, 4 + DEPTH)
    params = {
        "patch_w": nrm(keys[0], (IN_CHANS * PATCH * PATCH, EMBED)),
        "patch_b": jnp.zeros((EMBED,), jnp.float32),
        "cls_token": nrm(keys[1], (1, 1, EMBED)),
        "pos_embed": nrm(keys[2], (1, NUM_TOKENS, EMBED)),
        "norm_g": jnp.ones((EMBED,), jnp.float32),
        "norm_b": jnp.zeros((EMBED,), jnp.float32),
        "head_w": nrm(keys[3], (EMBED, NUM_CLASSES)),
        "head_b": jnp.zeros((NUM_CLASSES,), jnp.float32),
        "blocks": [],
    }
    for i in range(DEPTH):
        bk = jax.random.split(keys[4 + i], 4)
        params["blocks"].append({
            "ln1_g": jnp.ones((EMBED,), jnp.float32),
            "ln1_b": jnp.zeros((EMBED,), jnp.float32),
            "qkv_w": nrm(bk[0], (EMBED, 3 * EMBED)),
            "qkv_b": jnp.zeros((3 * EMBED,), jnp.float32),
            "proj_w": nrm(bk[1], (EMBED, EMBED)),
            "proj_b": jnp.zeros((EMBED,), jnp.float32),
            "ln2_g": jnp.ones((EMBED,), jnp.float32),
            "ln2_b": jnp.zeros((EMBED,), jnp.float32),
            "fc1_w": nrm(bk[2], (EMBED, MLP_HIDDEN)),
            "fc1_b": jnp.zeros((MLP_HIDDEN,), jnp.float32),
            "fc2_w": nrm(bk[3], (MLP_HIDDEN, EMBED)),
            "fc2_b": jnp.zeros((EMBED,), jnp.float32),
        })
    return params


# ----------------------------- one-time zero-padding of parameters ------------
def pad_params(params):
    def padw(w, rows, cols):
        out = jnp.zeros((rows, cols), jnp.float32)
        return out.at[:w.shape[0], :w.shape[1]].set(w)

    def padv(v, cols):
        out = jnp.zeros((1, cols), jnp.float32)
        return out.at[0, :v.shape[0]].set(v)

    # base token rows (per batch): row0 = cls+pos0, rows 1..NP = pos + conv bias,
    # rows NP+1..T_PAD-1 = 0 (padding).  Tiled over the batch.
    cls = params["cls_token"][0, 0]               # (EMBED,)
    pos = params["pos_embed"][0]                  # (NUM_TOKENS, EMBED)
    base_one = jnp.zeros((T_PAD, D_PAD), jnp.float32)
    base_one = base_one.at[0, :EMBED].set(cls + pos[0])
    base_one = base_one.at[1:NUM_TOKENS, :EMBED].set(pos[1:] + params["patch_b"][None, :])
    base = jnp.tile(base_one[None], (BATCH, 1, 1)).reshape(ROWS, D_PAD)

    padded = {
        "patch_w": padw(params["patch_w"], PATCH_DIM, D_PAD),
        "base": base,
        "norm_g": padv(params["norm_g"], D_PAD),
        "norm_b": padv(params["norm_b"], D_PAD),
        "head_w": padw(params["head_w"], D_PAD, D_PAD),
        "head_b": padv(params["head_b"], D_PAD),
    }

    blocks = params["blocks"]
    padded["ln1_g"] = jnp.stack([padv(b["ln1_g"], D_PAD) for b in blocks], 0)
    padded["ln1_b"] = jnp.stack([padv(b["ln1_b"], D_PAD) for b in blocks], 0)
    padded["ln2_g"] = jnp.stack([padv(b["ln2_g"], D_PAD) for b in blocks], 0)
    padded["ln2_b"] = jnp.stack([padv(b["ln2_b"], D_PAD) for b in blocks], 0)

    # QKV split into three lane-dense (D_PAD, D_PAD) matrices per block, flattened
    # along the leading axis as [block0:(q,k,v), block1:(q,k,v), ...].
    qkv_w_list, qkv_b_list = [], []
    for b in blocks:
        for i in range(3):
            qkv_w_list.append(padw(b["qkv_w"][:, i * EMBED:(i + 1) * EMBED], D_PAD, D_PAD))
            qkv_b_list.append(padv(b["qkv_b"][i * EMBED:(i + 1) * EMBED], D_PAD))
    padded["qkv_w"] = jnp.stack(qkv_w_list, 0)    # (DEPTH*3, D_PAD, D_PAD)
    padded["qkv_b"] = jnp.stack(qkv_b_list, 0)    # (DEPTH*3, 1, D_PAD)

    padded["proj_w"] = jnp.stack([padw(b["proj_w"], D_PAD, D_PAD) for b in blocks], 0)
    padded["proj_b"] = jnp.stack([padv(b["proj_b"], D_PAD) for b in blocks], 0)
    padded["fc1_w"] = jnp.stack([padw(b["fc1_w"], D_PAD, HID_PAD) for b in blocks], 0)
    padded["fc1_b"] = jnp.stack([padv(b["fc1_b"], HID_PAD) for b in blocks], 0)
    padded["fc2_w"] = jnp.stack([padw(b["fc2_w"], HID_PAD, D_PAD) for b in blocks], 0)
    padded["fc2_b"] = jnp.stack([padv(b["fc2_b"], D_PAD) for b in blocks], 0)
    return padded


# ----------------------------- main --------------------------------------------
if __name__ == "__main__":
    root = jax.random.PRNGKey(0)
    k_params, k_x = jax.random.split(root)
    params = init_params(k_params)
    padded = pad_params(params)
    x = jax.random.normal(k_x, (BATCH, IN_CHANS, IMG, IMG), dtype=jnp.float32)  # NCHW

    logits = jax.jit(vit_forward)(padded, x)
    logits = jax.block_until_ready(logits)
    assert logits.shape == (BATCH, NUM_CLASSES)
    assert bool(jnp.all(jnp.isfinite(logits)))
    print("KERNEL_OK")
</pallas_src>

<mosaic_0001>
module attributes {stable_mosaic.version = 11 : i64} {
  func.func @_vit_kernel(%arg0: memref<16x768xf32, #tpu.memory_space<vmem>>, %arg1: memref<768x128xf32, #tpu.memory_space<vmem>>, %arg2: memref<16x128xf32, #tpu.memory_space<vmem>>, %arg3: memref<2x1x128xf32, #tpu.memory_space<vmem>>, %arg4: memref<2x1x128xf32, #tpu.memory_space<vmem>>, %arg5: memref<2x1x128xf32, #tpu.memory_space<vmem>>, %arg6: memref<2x1x128xf32, #tpu.memory_space<vmem>>, %arg7: memref<6x128x128xf32, #tpu.memory_space<vmem>>, %arg8: memref<6x1x128xf32, #tpu.memory_space<vmem>>, %arg9: memref<2x128x128xf32, #tpu.memory_space<vmem>>, %arg10: memref<2x1x128xf32, #tpu.memory_space<vmem>>, %arg11: memref<2x128x256xf32, #tpu.memory_space<vmem>>, %arg12: memref<2x1x256xf32, #tpu.memory_space<vmem>>, %arg13: memref<2x256x128xf32, #tpu.memory_space<vmem>>, %arg14: memref<2x1x128xf32, #tpu.memory_space<vmem>>, %arg15: memref<1x128xf32, #tpu.memory_space<vmem>>, %arg16: memref<1x128xf32, #tpu.memory_space<vmem>>, %arg17: memref<128x128xf32, #tpu.memory_space<vmem>>, %arg18: memref<1x128xf32, #tpu.memory_space<vmem>>, %arg19: memref<16x128xf32, #tpu.memory_space<vmem>>, %arg20: memref<16x128xf32, #tpu.memory_space<vmem>>) attributes {dimension_semantics = [], scalar_prefetch = 0 : i64, scratch_operands = 1 : i64, tpu.core_type = #tpu.core_type<tc>} {
    %c0 = arith.constant 0 : index
    %c0_0 = arith.constant 0 : index
    %0 = vector.load %arg0[%c0, %c0_0] : memref<16x768xf32, #tpu.memory_space<vmem>>, vector<16x768xf32>
    %c0_1 = arith.constant 0 : index
    %c0_2 = arith.constant 0 : index
    %1 = vector.load %arg1[%c0_1, %c0_2] : memref<768x128xf32, #tpu.memory_space<vmem>>, vector<768x128xf32>
    %cst = arith.constant dense<0.000000e+00> : vector<16x128xf32>
    %2 = tpu.matmul %0, %1, %cst {dimension_numbers = #tpu.dot_dimension_numbers<[1], [0], [0], [1], [0, 0, 1, 1], [], []>} : vector<16x768xf32>, vector<768x128xf32>, vector<16x128xf32> -> vector<16x128xf32>
    %c0_3 = arith.constant 0 : index
    %c0_4 = arith.constant 0 : index
    %3 = vector.load %arg2[%c0_3, %c0_4] : memref<16x128xf32, #tpu.memory_space<vmem>>, vector<16x128xf32>
    %4 = arith.addf %2, %3 : vector<16x128xf32>
    %c0_5 = arith.constant 0 : index
    %c0_6 = arith.constant 0 : index
    %c0_7 = arith.constant 0 : index
    %5 = vector.load %arg3[%c0_5, %c0_6, %c0_7] : memref<2x1x128xf32, #tpu.memory_space<vmem>>, vector<1x1x128xf32>
    %6 = vector.shape_cast %5 : vector<1x1x128xf32> to vector<1x128xf32>
    %c0_8 = arith.constant 0 : index
    %c0_9 = arith.constant 0 : index
    %c0_10 = arith.constant 0 : index
    %7 = vector.load %arg4[%c0_8, %c0_9, %c0_10] : memref<2x1x128xf32, #tpu.memory_space<vmem>>, vector<1x1x128xf32>
    %8 = vector.shape_cast %7 : vector<1x1x128xf32> to vector<1x128xf32>
    %9 = vector.extract_strided_slice %4 {offsets = [0, 0], sizes = [16, 48], strides = [1, 1]} : vector<16x128xf32> to vector<16x48xf32>
    %cst_11 = arith.constant dense<0.000000e+00> : vector<16xf32>
    %10 = vector.multi_reduction <add>, %9, %cst_11 [1] : vector<16x48xf32> to vector<16xf32>
    %11 = vector.shape_cast %10 : vector<16xf32> to vector<16x1xf32>
    %cst_12 = arith.constant 4.800000e+01 : f32
    %12 = vector.broadcast %cst_12 : f32 to vector<16x1xf32>
    %13 = arith.divf %11, %12 : vector<16x1xf32>
    %14 = vector.broadcast %13 : vector<16x1xf32> to vector<16x48xf32>
    %15 = arith.subf %9, %14 : vector<16x48xf32>
    %16 = arith.mulf %15, %15 : vector<16x48xf32>
    %cst_13 = arith.constant dense<0.000000e+00> : vector<16xf32>
    %17 = vector.multi_reduction <add>, %16, %cst_13 [1] : vector<16x48xf32> to vector<16xf32>
    %18 = vector.shape_cast %17 : vector<16xf32> to vector<16x1xf32>
    %cst_14 = arith.constant 4.800000e+01 : f32
    %19 = vector.broadcast %cst_14 : f32 to vector<16x1xf32>
    %20 = arith.divf %18, %19 : vector<16x1xf32>
    %cst_15 = arith.constant 9.99999997E-7 : f32
    %21 = vector.broadcast %cst_15 : f32 to vector<16x1xf32>
    %22 = arith.addf %20, %21 : vector<16x1xf32>
    %23 = math.rsqrt %22 : vector<16x1xf32>
    %24 = vector.broadcast %13 : vector<16x1xf32> to vector<16x128xf32>
    %25 = arith.subf %4, %24 : vector<16x128xf32>
    %26 = vector.broadcast %23 : vector<16x1xf32> to vector<16x128xf32>
    %27 = arith.mulf %25, %26 : vector<16x128xf32>
    %28 = vector.broadcast %6 : vector<1x128xf32> to vector<16x128xf32>
    %29 = arith.mulf %27, %28 : vector<16x128xf32>
    %30 = vector.broadcast %8 : vector<1x128xf32> to vector<16x128xf32>
    %31 = arith.addf %29, %30 : vector<16x128xf32>
    %c0_16 = arith.constant 0 : index
    %c0_17 = arith.constant 0 : index
    %c0_18 = arith.constant 0 : index
    %32 = vector.load %arg7[%c0_16, %c0_17, %c0_18] : memref<6x128x128xf32, #tpu.memory_space<vmem>>, vector<1x128x128xf32>
    %33 = vector.shape_cast %32 : vector<1x128x128xf32> to vector<128x128xf32>
    %cst_19 = arith.constant dense<0.000000e+00> : vector<16x128xf32>
    %34 = tpu.matmul %31, %33, %cst_19 {dimension_numbers = #tpu.dot_dimension_numbers<[1], [0], [0], [1], [0, 0, 1, 1], [], []>} : vector<16x128xf32>, vector<128x128xf32>, vector<16x128xf32> -> vector<16x128xf32>
    %c0_20 = arith.constant 0 : index
    %c0_21 = arith.constant 0 : index
    %c0_22 = arith.constant 0 : index
    %35 = vector.load %arg8[%c0_20, %c0_21, %c0_22] : memref<6x1x128xf32, #tpu.memory_space<vmem>>, vector<1x1x128xf32>
    %36 = vector.shape_cast %35 : vector<1x1x128xf32> to vector<1x128xf32>
    %37 = vector.broadcast %36 : vector<1x128xf32> to vector<16x128xf32>
    %38 = arith.addf %34, %37 : vector<16x128xf32>
    %c1 = arith.constant 1 : index
    %c0_23 = arith.constant 0 : index
    %c0_24 = arith.constant 0 : index
    %39 = vector.load %arg7[%c1, %c0_23, %c0_24] : memref<6x128x128xf32, #tpu.memory_space<vmem>>, vector<1x128x128xf32>
    %40 = vector.shape_cast %39 : vector<1x128x128xf32> to vector<128x128xf32>
    %cst_25 = arith.constant dense<0.000000e+00> : vector<16x128xf32>
    %41 = tpu.matmul %31, %40, %cst_25 {dimension_numbers = #tpu.dot_dimension_numbers<[1], [0], [0], [1], [0, 0, 1, 1], [], []>} : vector<16x128xf32>, vector<128x128xf32>, vector<16x128xf32> -> vector<16x128xf32>
    %c1_26 = arith.constant 1 : index
    %c0_27 = arith.constant 0 : index
    %c0_28 = arith.constant 0 : index
    %42 = vector.load %arg8[%c1_26, %c0_27, %c0_28] : memref<6x1x128xf32, #tpu.memory_space<vmem>>, vector<1x1x128xf32>
    %43 = vector.shape_cast %42 : vector<1x1x128xf32> to vector<1x128xf32>
    %44 = vector.broadcast %43 : vector<1x128xf32> to vector<16x128xf32>
    %45 = arith.addf %41, %44 : vector<16x128xf32>
    %c2 = arith.constant 2 : index
    %c0_29 = arith.constant 0 : index
    %c0_30 = arith.constant 0 : index
    %46 = vector.load %arg7[%c2, %c0_29, %c0_30] : memref<6x128x128xf32, #tpu.memory_space<vmem>>, vector<1x128x128xf32>
    %47 = vector.shape_cast %46 : vector<1x128x128xf32> to vector<128x128xf32>
    %cst_31 = arith.constant dense<0.000000e+00> : vector<16x128xf32>
    %48 = tpu.matmul %31, %47, %cst_31 {dimension_numbers = #tpu.dot_dimension_numbers<[1], [0], [0], [1], [0, 0, 1, 1], [], []>} : vector<16x128xf32>, vector<128x128xf32>, vector<16x128xf32> -> vector<16x128xf32>
    %c2_32 = arith.constant 2 : index
    %c0_33 = arith.constant 0 : index
    %c0_34 = arith.constant 0 : index
    %49 = vector.load %arg8[%c2_32, %c0_33, %c0_34] : memref<6x1x128xf32, #tpu.memory_space<vmem>>, vector<1x1x128xf32>
    %50 = vector.shape_cast %49 : vector<1x1x128xf32> to vector<1x128xf32>
    %51 = vector.broadcast %50 : vector<1x128xf32> to vector<16x128xf32>
    %52 = arith.addf %48, %51 : vector<16x128xf32>
    %cst_35 = arith.constant 0.000000e+00 : f32
    %53 = vector.broadcast %cst_35 : f32 to vector<16x128xf32>
    %c0_36 = arith.constant 0 : index
    %c0_37 = arith.constant 0 : index
    %54 = vector.load %arg20[%c0_36, %c0_37] : memref<16x128xf32, #tpu.memory_space<vmem>>, vector<16x128xf32>
    tpu.vector_store %arg20[%c0_36, %c0_37], %53 {strides = array<i32>} : memref<16x128xf32, #tpu.memory_space<vmem>>, vector<16x128xf32>,
    %55 = vector.extract_strided_slice %38 {offsets = [0, 0], sizes = [5, 16], strides = [1, 1]} : vector<16x128xf32> to vector<5x16xf32>
    %56 = vector.extract_strided_slice %45 {offsets = [0, 0], sizes = [5, 16], strides = [1, 1]} : vector<16x128xf32> to vector<5x16xf32>
    %57 = vector.extract_strided_slice %52 {offsets = [0, 0], sizes = [5, 16], strides = [1, 1]} : vector<16x128xf32> to vector<5x16xf32>
    %58 = tpu.transpose %56, [1, 0] : vector<5x16xf32> -> vector<16x5xf32>
    %cst_38 = arith.constant dense<0.000000e+00> : vector<5x5xf32>
    %59 = tpu.matmul %55, %58, %cst_38 {dimension_numbers = #tpu.dot_dimension_numbers<[1], [0], [0], [1], [0, 0, 1, 1], [], []>} : vector<5x16xf32>, vector<16x5xf32>, vector<5x5xf32> -> vector<5x5xf32>
    %cst_39 = arith.constant 2.500000e-01 : f32
    %60 = vector.broadcast %cst_39 : f32 to vector<5x5xf32>
    %61 = arith.mulf %59, %60 : vector<5x5xf32>
    %cst_40 = arith.constant dense<0xFF800000> : vector<5xf32>
    %62 = vector.multi_reduction <maximumf>, %61, %cst_40 [1] : vector<5x5xf32> to vector<5xf32>
    %63 = vector.shape_cast %62 : vector<5xf32> to vector<5x1xf32>
    %64 = vector.broadcast %63 : vector<5x1xf32> to vector<5x5xf32>
    %65 = arith.subf %61, %64 : vector<5x5xf32>
    %66 = math.exp %65 : vector<5x5xf32>
    %cst_41 = arith.constant dense<0.000000e+00> : vector<5xf32>
    %67 = vector.multi_reduction <add>, %66, %cst_41 [1] : vector<5x5xf32> to vector<5xf32>
    %68 = vector.shape_cast %67 : vector<5xf32> to vector<5x1xf32>
    %69 = vector.broadcast %68 : vector<5x1xf32> to vector<5x5xf32>
    %70 = arith.divf %66, %69 : vector<5x5xf32>
    %cst_42 = arith.constant dense<0.000000e+00> : vector<5x16xf32>
    %71 = tpu.matmul %70, %57, %cst_42 {dimension_numbers = #tpu.dot_dimension_numbers<[1], [0], [0], [1], [0, 0, 1, 1], [], []>} : vector<5x5xf32>, vector<5x16xf32>, vector<5x16xf32> -> vector<5x16xf32>
    %c0_43 = arith.constant 0 : index
    %c0_44 = arith.constant 0 : index
    %72 = vector.load %arg20[%c0_43, %c0_44] : memref<16x128xf32, #tpu.memory_space<vmem>>, vector<5x16xf32>
    tpu.vector_store %arg20[%c0_43, %c0_44], %71 {strides = array<i32>} : memref<16x128xf32, #tpu.memory_space<vmem>>, vector<5x16xf32>,
    %73 = vector.extract_strided_slice %38 {offsets = [0, 16], sizes = [5, 16], strides = [1, 1]} : vector<16x128xf32> to vector<5x16xf32>
    %74 = vector.extract_strided_slice %45 {offsets = [0, 16], sizes = [5, 16], strides = [1, 1]} : vector<16x128xf32> to vector<5x16xf32>
    %75 = vector.extract_strided_slice %52 {offsets = [0, 16], sizes = [5, 16], strides = [1, 1]} : vector<16x128xf32> to vector<5x16xf32>
    %76 = tpu.transpose %74, [1, 0] : vector<5x16xf32> -> vector<16x5xf32>
    %cst_45 = arith.constant dense<0.000000e+00> : vector<5x5xf32>
    %77 = tpu.matmul %73, %76, %cst_45 {dimension_numbers = #tpu.dot_dimension_numbers<[1], [0], [0], [1], [0, 0, 1, 1], [], []>} : vector<5x16xf32>, vector<16x5xf32>, vector<5x5xf32> -> vector<5x5xf32>
    %cst_46 = arith.constant 2.500000e-01 : f32
    %78 = vector.broadcast %cst_46 : f32 to vector<5x5xf32>
    %79 = arith.mulf %77, %78 : vector<5x5xf32>
    %cst_47 = arith.constant dense<0xFF800000> : vector<5xf32>
    %80 = vector.multi_reduction <maximumf>, %79, %cst_47 [1] : vector<5x5xf32> to vector<5xf32>
    %81 = vector.shape_cast %80 : vector<5xf32> to vector<5x1xf32>
    %82 = vector.broadcast %81 : vector<5x1xf32> to vector<5x5xf32>
    %83 = arith.subf %79, %82 : vector<5x5xf32>
    %84 = math.exp %83 : vector<5x5xf32>
    %cst_48 = arith.constant dense<0.000000e+00> : vector<5xf32>
    %85 = vector.multi_reduction <add>, %84, %cst_48 [1] : vector<5x5xf32> to vector<5xf32>
    %86 = vector.shape_cast %85 : vector<5xf32> to vector<5x1xf32>
    %87 = vector.broadcast %86 : vector<5x1xf32> to vector<5x5xf32>
    %88 = arith.divf %84, %87 : vector<5x5xf32>
    %cst_49 = arith.constant dense<0.000000e+00> : vector<5x16xf32>
    %89 = tpu.matmul %88, %75, %cst_49 {dimension_numbers = #tpu.dot_dimension_numbers<[1], [0], [0], [1], [0, 0, 1, 1], [], []>} : vector<5x5xf32>, vector<5x16xf32>, vector<5x16xf32> -> vector<5x16xf32>
    %c0_50 = arith.constant 0 : index
    %c16 = arith.constant 16 : index
    %90 = vector.load %arg20[%c0_50, %c16] : memref<16x128xf32, #tpu.memory_space<vmem>>, vector<5x16xf32>
    tpu.vector_store %arg20[%c0_50, %c16], %89 {strides = array<i32>} : memref<16x128xf32, #tpu.memory_space<vmem>>, vector<5x16xf32>,
    %91 = vector.extract_strided_slice %38 {offsets = [0, 32], sizes = [5, 16], strides = [1, 1]} : vector<16x128xf32> to vector<5x16xf32>
    %92 = vector.extract_strided_slice %45 {offsets = [0, 32], sizes = [5, 16], strides = [1, 1]} : vector<16x128xf32> to vector<5x16xf32>
    %93 = vector.extract_strided_slice %52 {offsets = [0, 32], sizes = [5, 16], strides = [1, 1]} : vector<16x128xf32> to vector<5x16xf32>
    %94 = tpu.transpose %92, [1, 0] : vector<5x16xf32> -> vector<16x5xf32>
    %cst_51 = arith.constant dense<0.000000e+00> : vector<5x5xf32>
    %95 = tpu.matmul %91, %94, %cst_51 {dimension_numbers = #tpu.dot_dimension_numbers<[1], [0], [0], [1], [0, 0, 1, 1], [], []>} : vector<5x16xf32>, vector<16x5xf32>, vector<5x5xf32> -> vector<5x5xf32>
    %cst_52 = arith.constant 2.500000e-01 : f32
    %96 = vector.broadcast %cst_52 : f32 to vector<5x5xf32>
    %97 = arith.mulf %95, %96 : vector<5x5xf32>
    %cst_53 = arith.constant dense<0xFF800000> : vector<5xf32>
    %98 = vector.multi_reduction <maximumf>, %97, %cst_53 [1] : vector<5x5xf32> to vector<5xf32>
    %99 = vector.shape_cast %98 : vector<5xf32> to vector<5x1xf32>
    %100 = vector.broadcast %99 : vector<5x1xf32> to vector<5x5xf32>
    %101 = arith.subf %97, %100 : vector<5x5xf32>
    %102 = math.exp %101 : vector<5x5xf32>
    %cst_54 = arith.constant dense<0.000000e+00> : vector<5xf32>
    %103 = vector.multi_reduction <add>, %102, %cst_54 [1] : vector<5x5xf32> to vector<5xf32>
    %104 = vector.shape_cast %103 : vector<5xf32> to vector<5x1xf32>
    %105 = vector.broadcast %104 : vector<5x1xf32> to vector<5x5xf32>
    %106 = arith.divf %102, %105 : vector<5x5xf32>
    %cst_55 = arith.constant dense<0.000000e+00> : vector<5x16xf32>
    %107 = tpu.matmul %106, %93, %cst_55 {dimension_numbers = #tpu.dot_dimension_numbers<[1], [0], [0], [1], [0, 0, 1, 1], [], []>} : vector<5x5xf32>, vector<5x16xf32>, vector<5x16xf32> -> vector<5x16xf32>
    %c0_56 = arith.constant 0 : index
    %c32 = arith.constant 32 : index
    %108 = vector.load %arg20[%c0_56, %c32] : memref<16x128xf32, #tpu.memory_space<vmem>>, vector<5x16xf32>
    tpu.vector_store %arg20[%c0_56, %c32], %107 {strides = array<i32>} : memref<16x128xf32, #tpu.memory_space<vmem>>, vector<5x16xf32>,
    %109 = vector.extract_strided_slice %38 {offsets = [8, 0], sizes = [5, 16], strides = [1, 1]} : vector<16x128xf32> to vector<5x16xf32>
    %110 = vector.extract_strided_slice %45 {offsets = [8, 0], sizes = [5, 16], strides = [1, 1]} : vector<16x128xf32> to vector<5x16xf32>
    %111 = vector.extract_strided_slice %52 {offsets = [8, 0], sizes = [5, 16], strides = [1, 1]} : vector<16x128xf32> to vector<5x16xf32>
    %112 = tpu.transpose %110, [1, 0] : vector<5x16xf32> -> vector<16x5xf32>
    %cst_57 = arith.constant dense<0.000000e+00> : vector<5x5xf32>
    %113 = tpu.matmul %109, %112, %cst_57 {dimension_numbers = #tpu.dot_dimension_numbers<[1], [0], [0], [1], [0, 0, 1, 1], [], []>} : vector<5x16xf32>, vector<16x5xf32>, vector<5x5xf32> -> vector<5x5xf32>
    %cst_58 = arith.constant 2.500000e-01 : f32
    %114 = vector.broadcast %cst_58 : f32 to vector<5x5xf32>
    %115 = arith.mulf %113, %114 : vector<5x5xf32>
    %cst_59 = arith.constant dense<0xFF800000> : vector<5xf32>
    %116 = vector.multi_reduction <maximumf>, %115, %cst_59 [1] : vector<5x5xf32> to vector<5xf32>
    %117 = vector.shape_cast %116 : vector<5xf32> to vector<5x1xf32>
    %118 = vector.broadcast %117 : vector<5x1xf32> to vector<5x5xf32>
    %119 = arith.subf %115, %118 : vector<5x5xf32>
    %120 = math.exp %119 : vector<5x5xf32>
    %cst_60 = arith.constant dense<0.000000e+00> : vector<5xf32>
    %121 = vector.multi_reduction <add>, %120, %cst_60 [1] : vector<5x5xf32> to vector<5xf32>
    %122 = vector.shape_cast %121 : vector<5xf32> to vector<5x1xf32>
    %123 = vector.broadcast %122 : vector<5x1xf32> to vector<5x5xf32>
    %124 = arith.divf %120, %123 : vector<5x5xf32>
    %cst_61 = arith.constant dense<0.000000e+00> : vector<5x16xf32>
    %125 = tpu.matmul %124, %111, %cst_61 {dimension_numbers = #tpu.dot_dimension_numbers<[1], [0], [0], [1], [0, 0, 1, 1], [], []>} : vector<5x5xf32>, vector<5x16xf32>, vector<5x16xf32> -> vector<5x16xf32>
    %c8 = arith.constant 8 : index
    %c0_62 = arith.constant 0 : index
    %126 = vector.load %arg20[%c8, %c0_62] : memref<16x128xf32, #tpu.memory_space<vmem>>, vector<5x16xf32>
    tpu.vector_store %arg20[%c8, %c0_62], %125 {strides = array<i32>} : memref<16x128xf32, #tpu.memory_space<vmem>>, vector<5x16xf32>,
    %127 = vector.extract_strided_slice %38 {offsets = [8, 16], sizes = [5, 16], strides = [1, 1]} : vector<16x128xf32> to vector<5x16xf32>
    %128 = vector.extract_strided_slice %45 {offsets = [8, 16], sizes = [5, 16], strides = [1, 1]} : vector<16x128xf32> to vector<5x16xf32>
    %129 = vector.extract_strided_slice %52 {offsets = [8, 16], sizes = [5, 16], strides = [1, 1]} : vector<16x128xf32> to vector<5x16xf32>
    %130 = tpu.transpose %128, [1, 0] : vector<5x16xf32> -> vector<16x5xf32>
    %cst_63 = arith.constant dense<0.000000e+00> : vector<5x5xf32>
    %131 = tpu.matmul %127, %130, %cst_63 {dimension_numbers = #tpu.dot_dimension_numbers<[1], [0], [0], [1], [0, 0, 1, 1], [], []>} : vector<5x16xf32>, vector<16x5xf32>, vector<5x5xf32> -> vector<5x5xf32>
    %cst_64 = arith.constant 2.500000e-01 : f32
    %132 = vector.broadcast %cst_64 : f32 to vector<5x5xf32>
    %133 = arith.mulf %131, %132 : vector<5x5xf32>
    %cst_65 = arith.constant dense<0xFF800000> : vector<5xf32>
    %134 = vector.multi_reduction <maximumf>, %133, %cst_65 [1] : vector<5x5xf32> to vector<5xf32>
    %135 = vector.shape_cast %134 : vector<5xf32> to vector<5x1xf32>
    %136 = vector.broadcast %135 : vector<5x1xf32> to vector<5x5xf32>
    %137 = arith.subf %133, %136 : vector<5x5xf32>
    %138 = math.exp %137 : vector<5x5xf32>
    %cst_66 = arith.constant dense<0.000000e+00> : vector<5xf32>
    %139 = vector.multi_reduction <add>, %138, %cst_66 [1] : vector<5x5xf32> to vector<5xf32>
    %140 = vector.shape_cast %139 : vector<5xf32> to vector<5x1xf32>
    %141 = vector.broadcast %140 : vector<5x1xf32> to vector<5x5xf32>
    %142 = arith.divf %138, %141 : vector<5x5xf32>
    %cst_67 = arith.constant dense<0.000000e+00> : vector<5x16xf32>
    %143 = tpu.matmul %142, %129, %cst_67 {dimension_numbers = #tpu.dot_dimension_numbers<[1], [0], [0], [1], [0, 0, 1, 1], [], []>} : vector<5x5xf32>, vector<5x16xf32>, vector<5x16xf32> -> vector<5x16xf32>
    %c8_68 = arith.constant 8 : index
    %c16_69 = arith.constant 16 : index
    %144 = vector.load %arg20[%c8_68, %c16_69] : memref<16x128xf32, #tpu.memory_space<vmem>>, vector<5x16xf32>
    tpu.vector_store %arg20[%c8_68, %c16_69], %143 {strides = array<i32>} : memref<16x128xf32, #tpu.memory_space<vmem>>, vector<5x16xf32>,
    %145 = vector.extract_strided_slice %38 {offsets = [8, 32], sizes = [5, 16], strides = [1, 1]} : vector<16x128xf32> to vector<5x16xf32>
    %146 = vector.extract_strided_slice %45 {offsets = [8, 32], sizes = [5, 16], strides = [1, 1]} : vector<16x128xf32> to vector<5x16xf32>
    %147 = vector.extract_strided_slice %52 {offsets = [8, 32], sizes = [5, 16], strides = [1, 1]} : vector<16x128xf32> to vector<5x16xf32>
    %148 = tpu.transpose %146, [1, 0] : vector<5x16xf32> -> vector<16x5xf32>
    %cst_70 = arith.constant dense<0.000000e+00> : vector<5x5xf32>
    %149 = tpu.matmul %145, %148, %cst_70 {dimension_numbers = #tpu.dot_dimension_numbers<[1], [0], [0], [1], [0, 0, 1, 1], [], []>} : vector<5x16xf32>, vector<16x5xf32>, vector<5x5xf32> -> vector<5x5xf32>
    %cst_71 = arith.constant 2.500000e-01 : f32
    %150 = vector.broadcast %cst_71 : f32 to vector<5x5xf32>
    %151 = arith.mulf %149, %150 : vector<5x5xf32>
    %cst_72 = arith.constant dense<0xFF800000> : vector<5xf32>
    %152 = vector.multi_reduction <maximumf>, %151, %cst_72 [1] : vector<5x5xf32> to vector<5xf32>
    %153 = vector.shape_cast %152 : vector<5xf32> to vector<5x1xf32>
    %154 = vector.broadcast %153 : vector<5x1xf32> to vector<5x5xf32>
    %155 = arith.subf %151, %154 : vector<5x5xf32>
    %156 = math.exp %155 : vector<5x5xf32>
    %cst_73 = arith.constant dense<0.000000e+00> : vector<5xf32>
    %157 = vector.multi_reduction <add>, %156, %cst_73 [1] : vector<5x5xf32> to vector<5xf32>
    %158 = vector.shape_cast %157 : vector<5xf32> to vector<5x1xf32>
    %159 = vector.broadcast %158 : vector<5x1xf32> to vector<5x5xf32>
    %160 = arith.divf %156, %159 : vector<5x5xf32>
    %cst_74 = arith.constant dense<0.000000e+00> : vector<5x16xf32>
    %161 = tpu.matmul %160, %147, %cst_74 {dimension_numbers = #tpu.dot_dimension_numbers<[1], [0], [0], [1], [0, 0, 1, 1], [], []>} : vector<5x5xf32>, vector<5x16xf32>, vector<5x16xf32> -> vector<5x16xf32>
    %c8_75 = arith.constant 8 : index
    %c32_76 = arith.constant 32 : index
    %162 = vector.load %arg20[%c8_75, %c32_76] : memref<16x128xf32, #tpu.memory_space<vmem>>, vector<5x16xf32>
    tpu.vector_store %arg20[%c8_75, %c32_76], %161 {strides = array<i32>} : memref<16x128xf32, #tpu.memory_space<vmem>>, vector<5x16xf32>,
    %c0_77 = arith.constant 0 : index
    %c0_78 = arith.constant 0 : index
    %163 = vector.load %arg20[%c0_77, %c0_78] : memref<16x128xf32, #tpu.memory_space<vmem>>, vector<16x128xf32>
    %c0_79 = arith.constant 0 : index
    %c0_80 = arith.constant 0 : index
    %c0_81 = arith.constant 0 : index
    %164 = vector.load %arg9[%c0_79, %c0_80, %c0_81] : memref<2x128x128xf32, #tpu.memory_space<vmem>>, vector<1x128x128xf32>
    %165 = vector.shape_cast %164 : vector<1x128x128xf32> to vector<128x128xf32>
    %cst_82 = arith.constant dense<0.000000e+00> : vector<16x128xf32>
    %166 = tpu.matmul %163, %165, %cst_82 {dimension_numbers = #tpu.dot_dimension_numbers<[1], [0], [0], [1], [0, 0, 1, 1], [], []>} : vector<16x128xf32>, vector<128x128xf32>, vector<16x128xf32> -> vector<16x128xf32>
    %c0_83 = arith.constant 0 : index
    %c0_84 = arith.constant 0 : index
    %c0_85 = arith.constant 0 : index
    %167 = vector.load %arg10[%c0_83, %c0_84, %c0_85] : memref<2x1x128xf32, #tpu.memory_space<vmem>>, vector<1x1x128xf32>
    %168 = vector.shape_cast %167 : vector<1x1x128xf32> to vector<1x128xf32>
    %169 = vector.broadcast %168 : vector<1x128xf32> to vector<16x128xf32>
    %170 = arith.addf %166, %169 : vector<16x128xf32>
    %171 = arith.addf %4, %170 : vector<16x128xf32>
    %c0_86 = arith.constant 0 : index
    %c0_87 = arith.constant 0 : index
    %c0_88 = arith.constant 0 : index
    %172 = vector.load %arg5[%c0_86, %c0_87, %c0_88] : memref<2x1x128xf32, #tpu.memory_space<vmem>>, vector<1x1x128xf32>
    %173 = vector.shape_cast %172 : vector<1x1x128xf32> to vector<1x128xf32>
    %c0_89 = arith.constant 0 : index
    %c0_90 = arith.constant 0 : index
    %c0_91 = arith.constant 0 : index
    %174 = vector.load %arg6[%c0_89, %c0_90, %c0_91] : memref<2x1x128xf32, #tpu.memory_space<vmem>>, vector<1x1x128xf32>
    %175 = vector.shape_cast %174 : vector<1x1x128xf32> to vector<1x128xf32>
    %176 = vector.extract_strided_slice %171 {offsets = [0, 0], sizes = [16, 48], strides = [1, 1]} : vector<16x128xf32> to vector<16x48xf32>
    %cst_92 = arith.constant dense<0.000000e+00> : vector<16xf32>
    %177 = vector.multi_reduction <add>, %176, %cst_92 [1] : vector<16x48xf32> to vector<16xf32>
    %178 = vector.shape_cast %177 : vector<16xf32> to vector<16x1xf32>
    %cst_93 = arith.constant 4.800000e+01 : f32
    %179 = vector.broadcast %cst_93 : f32 to vector<16x1xf32>
    %180 = arith.divf %178, %179 : vector<16x1xf32>
    %181 = vector.broadcast %180 : vector<16x1xf32> to vector<16x48xf32>
    %182 = arith.subf %176, %181 : vector<16x48xf32>
    %183 = arith.mulf %182, %182 : vector<16x48xf32>
    %cst_94 = arith.constant dense<0.000000e+00> : vector<16xf32>
    %184 = vector.multi_reduction <add>, %183, %cst_94 [1] : vector<16x48xf32> to vector<16xf32>
    %185 = vector.shape_cast %184 : vector<16xf32> to vector<16x1xf32>
    %cst_95 = arith.constant 4.800000e+01 : f32
    %186 = vector.broadcast %cst_95 : f32 to vector<16x1xf32>
    %187 = arith.divf %185, %186 : vector<16x1xf32>
    %cst_96 = arith.constant 9.99999997E-7 : f32
    %188 = vector.broadcast %cst_96 : f32 to vector<16x1xf32>
    %189 = arith.addf %187, %188 : vector<16x1xf32>
    %190 = math.rsqrt %189 : vector<16x1xf32>
    %191 = vector.broadcast %180 : vector<16x1xf32> to vector<16x128xf32>
    %192 = arith.subf %171, %191 : vector<16x128xf32>
    %193 = vector.broadcast %190 : vector<16x1xf32> to vector<16x128xf32>
    %194 = arith.mulf %192, %193 : vector<16x128xf32>
    %195 = vector.broadcast %173 : vector<1x128xf32> to vector<16x128xf32>
    %196 = arith.mulf %194, %195 : vector<16x128xf32>
    %197 = vector.broadcast %175 : vector<1x128xf32> to vector<16x128xf32>
    %198 = arith.addf %196, %197 : vector<16x128xf32>
    %c0_97 = arith.constant 0 : index
    %c0_98 = arith.constant 0 : index
    %c0_99 = arith.constant 0 : index
    %199 = vector.load %arg11[%c0_97, %c0_98, %c0_99] : memref<2x128x256xf32, #tpu.memory_space<vmem>>, vector<1x128x256xf32>
    %200 = vector.shape_cast %199 : vector<1x128x256xf32> to vector<128x256xf32>
    %cst_100 = arith.constant dense<0.000000e+00> : vector<16x256xf32>
    %201 = tpu.matmul %198, %200, %cst_100 {dimension_numbers = #tpu.dot_dimension_numbers<[1], [0], [0], [1], [0, 0, 1, 1], [], []>} : vector<16x128xf32>, vector<128x256xf32>, vector<16x256xf32> -> vector<16x256xf32>
    %c0_101 = arith.constant 0 : index
    %c0_102 = arith.constant 0 : index
    %c0_103 = arith.constant 0 : index
    %202 = vector.load %arg12[%c0_101, %c0_102, %c0_103] : memref<2x1x256xf32, #tpu.memory_space<vmem>>, vector<1x1x256xf32>
    %203 = vector.shape_cast %202 : vector<1x1x256xf32> to vector<1x256xf32>
    %204 = vector.broadcast %203 : vector<1x256xf32> to vector<16x256xf32>
    %205 = arith.addf %201, %204 : vector<16x256xf32>
    %cst_104 = arith.constant 5.000000e-01 : f32
    %206 = vector.broadcast %cst_104 : f32 to vector<16x256xf32>
    %207 = arith.mulf %206, %205 : vector<16x256xf32>
    %cst_105 = arith.constant 0.707106769 : f32
    %208 = vector.broadcast %cst_105 : f32 to vector<16x256xf32>
    %209 = arith.mulf %205, %208 : vector<16x256xf32>
    %210 = math.absf %209 : vector<16x256xf32>
    %cst_106 = arith.constant 0.327591091 : f32
    %211 = vector.broadcast %cst_106 : f32 to vector<16x256xf32>
    %212 = arith.mulf %211, %210 : vector<16x256xf32>
    %cst_107 = arith.constant 1.000000e+00 : f32
    %213 = vector.broadcast %cst_107 : f32 to vector<16x256xf32>
    %214 = arith.addf %213, %212 : vector<16x256xf32>
    %cst_108 = arith.constant 1.000000e+00 : f32
    %215 = vector.broadcast %cst_108 : f32 to vector<16x256xf32>
    %216 = arith.divf %215, %214 : vector<16x256xf32>
    %cst_109 = arith.constant 1.06140542 : f32
    %217 = vector.broadcast %cst_109 : f32 to vector<16x256xf32>
    %218 = arith.mulf %217, %216 : vector<16x256xf32>
    %cst_110 = arith.constant -1.45315206 : f32
    %219 = vector.broadcast %cst_110 : f32 to vector<16x256xf32>
    %220 = arith.addf %218, %219 : vector<16x256xf32>
    %221 = arith.mulf %220, %216 : vector<16x256xf32>
    %cst_111 = arith.constant 1.42141378 : f32
    %222 = vector.broadcast %cst_111 : f32 to vector<16x256xf32>
    %223 = arith.addf %221, %222 : vector<16x256xf32>
    %224 = arith.mulf %223, %216 : vector<16x256xf32>
    %cst_112 = arith.constant -0.284496725 : f32
    %225 = vector.broadcast %cst_112 : f32 to vector<16x256xf32>
    %226 = arith.addf %224, %225 : vector<16x256xf32>
    %227 = arith.mulf %226, %216 : vector<16x256xf32>
    %cst_113 = arith.constant 0.254829586 : f32
    %228 = vector.broadcast %cst_113 : f32 to vector<16x256xf32>
    %229 = arith.addf %227, %228 : vector<16x256xf32>
    %230 = arith.mulf %229, %216 : vector<16x256xf32>
    %cst_114 = arith.constant 0.000000e+00 : f32
    %231 = vector.broadcast %cst_114 : f32 to vector<16x256xf32>
    %232 = arith.subf %231, %210 : vector<16x256xf32>
    %233 = arith.mulf %232, %210 : vector<16x256xf32>
    %234 = math.exp %233 : vector<16x256xf32>
    %235 = arith.mulf %230, %234 : vector<16x256xf32>
    %cst_115 = arith.constant 1.000000e+00 : f32
    %236 = vector.broadcast %cst_115 : f32 to vector<16x256xf32>
    %237 = arith.subf %236, %235 : vector<16x256xf32>
    %cst_116 = arith.constant 0.000000e+00 : f32
    %238 = vector.broadcast %cst_116 : f32 to vector<16x256xf32>
    %239 = arith.cmpf olt, %209, %238 : vector<16x256xf32>
    %cst_117 = arith.constant 0.000000e+00 : f32
    %240 = vector.broadcast %cst_117 : f32 to vector<16x256xf32>
    %241 = arith.subf %240, %237 : vector<16x256xf32>
    %242 = arith.select %239, %241, %237 : vector<16x256xi1>, vector<16x256xf32>
    %cst_118 = arith.constant 1.000000e+00 : f32
    %243 = vector.broadcast %cst_118 : f32 to vector<16x256xf32>
    %244 = arith.addf %243, %242 : vector<16x256xf32>
    %245 = arith.mulf %207, %244 : vector<16x256xf32>
    %c0_119 = arith.constant 0 : index
    %c0_120 = arith.constant 0 : index
    %c0_121 = arith.constant 0 : index
    %246 = vector.load %arg13[%c0_119, %c0_120, %c0_121] : memref<2x256x128xf32, #tpu.memory_space<vmem>>, vector<1x256x128xf32>
    %247 = vector.shape_cast %246 : vector<1x256x128xf32> to vector<256x128xf32>
    %cst_122 = arith.constant dense<0.000000e+00> : vector<16x128xf32>
    %248 = tpu.matmul %245, %247, %cst_122 {dimension_numbers = #tpu.dot_dimension_numbers<[1], [0], [0], [1], [0, 0, 1, 1], [], []>} : vector<16x256xf32>, vector<256x128xf32>, vector<16x128xf32> -> vector<16x128xf32>
    %c0_123 = arith.constant 0 : index
    %c0_124 = arith.constant 0 : index
    %c0_125 = arith.constant 0 : index
    %249 = vector.load %arg14[%c0_123, %c0_124, %c0_125] : memref<2x1x128xf32, #tpu.memory_space<vmem>>, vector<1x1x128xf32>
    %250 = vector.shape_cast %249 : vector<1x1x128xf32> to vector<1x128xf32>
    %251 = vector.broadcast %250 : vector<1x128xf32> to vector<16x128xf32>
    %252 = arith.addf %248, %251 : vector<16x128xf32>
    %253 = arith.addf %171, %252 : vector<16x128xf32>
    %c1_126 = arith.constant 1 : index
    %c0_127 = arith.constant 0 : index
    %c0_128 = arith.constant 0 : index
    %254 = vector.load %arg3[%c1_126, %c0_127, %c0_128] : memref<2x1x128xf32, #tpu.memory_space<vmem>>, vector<1x1x128xf32>
    %255 = vector.shape_cast %254 : vector<1x1x128xf32> to vector<1x128xf32>
    %c1_129 = arith.constant 1 : index
    %c0_130 = arith.constant 0 : index
    %c0_131 = arith.constant 0 : index
    %256 = vector.load %arg4[%c1_129, %c0_130, %c0_131] : memref<2x1x128xf32, #tpu.memory_space<vmem>>, vector<1x1x128xf32>
    %257 = vector.shape_cast %256 : vector<1x1x128xf32> to vector<1x128xf32>
    %258 = vector.extract_strided_slice %253 {offsets = [0, 0], sizes = [16, 48], strides = [1, 1]} : vector<16x128xf32> to vector<16x48xf32>
    %cst_132 = arith.constant dense<0.000000e+00> : vector<16xf32>
    %259 = vector.multi_reduction <add>, %258, %cst_132 [1] : vector<16x48xf32> to vector<16xf32>
    %260 = vector.shape_cast %259 : vector<16xf32> to vector<16x1xf32>
    %cst_133 = arith.constant 4.800000e+01 : f32
    %261 = vector.broadcast %cst_133 : f32 to vector<16x1xf32>
    %262 = arith.divf %260, %261 : vector<16x1xf32>
    %263 = vector.broadcast %262 : vector<16x1xf32> to vector<16x48xf32>
    %264 = arith.subf %258, %263 : vector<16x48xf32>
    %265 = arith.mulf %264, %264 : vector<16x48xf32>
    %cst_134 = arith.constant dense<0.000000e+00> : vector<16xf32>
    %266 = vector.multi_reduction <add>, %265, %cst_134 [1] : vector<16x48xf32> to vector<16xf32>
    %267 = vector.shape_cast %266 : vector<16xf32> to vector<16x1xf32>
    %cst_135 = arith.constant 4.800000e+01 : f32
    %268 = vector.broadcast %cst_135 : f32 to vector<16x1xf32>
    %269 = arith.divf %267, %268 : vector<16x1xf32>
    %cst_136 = arith.constant 9.99999997E-7 : f32
    %270 = vector.broadcast %cst_136 : f32 to vector<16x1xf32>
    %271 = arith.addf %269, %270 : vector<16x1xf32>
    %272 = math.rsqrt %271 : vector<16x1xf32>
    %273 = vector.broadcast %262 : vector<16x1xf32> to vector<16x128xf32>
    %274 = arith.subf %253, %273 : vector<16x128xf32>
    %275 = vector.broadcast %272 : vector<16x1xf32> to vector<16x128xf32>
    %276 = arith.mulf %274, %275 : vector<16x128xf32>
    %277 = vector.broadcast %255 : vector<1x128xf32> to vector<16x128xf32>
    %278 = arith.mulf %276, %277 : vector<16x128xf32>
    %279 = vector.broadcast %257 : vector<1x128xf32> to vector<16x128xf32>
    %280 = arith.addf %278, %279 : vector<16x128xf32>
    %c3 = arith.constant 3 : index
    %c0_137 = arith.constant 0 : index
    %c0_138 = arith.constant 0 : index
    %281 = vector.load %arg7[%c3, %c0_137, %c0_138] : memref<6x128x128xf32, #tpu.memory_space<vmem>>, vector<1x128x128xf32>
    %282 = vector.shape_cast %281 : vector<1x128x128xf32> to vector<128x128xf32>
    %cst_139 = arith.constant dense<0.000000e+00> : vector<16x128xf32>
    %283 = tpu.matmul %280, %282, %cst_139 {dimension_numbers = #tpu.dot_dimension_numbers<[1], [0], [0], [1], [0, 0, 1, 1], [], []>} : vector<16x128xf32>, vector<128x128xf32>, vector<16x128xf32> -> vector<16x128xf32>
    %c3_140 = arith.constant 3 : index
    %c0_141 = arith.constant 0 : index
    %c0_142 = arith.constant 0 : index
    %284 = vector.load %arg8[%c3_140, %c0_141, %c0_142] : memref<6x1x128xf32, #tpu.memory_space<vmem>>, vector<1x1x128xf32>
    %285 = vector.shape_cast %284 : vector<1x1x128xf32> to vector<1x128xf32>
    %286 = vector.broadcast %285 : vector<1x128xf32> to vector<16x128xf32>
    %287 = arith.addf %283, %286 : vector<16x128xf32>
    %c4 = arith.constant 4 : index
    %c0_143 = arith.constant 0 : index
    %c0_144 = arith.constant 0 : index
    %288 = vector.load %arg7[%c4, %c0_143, %c0_144] : memref<6x128x128xf32, #tpu.memory_space<vmem>>, vector<1x128x128xf32>
    %289 = vector.shape_cast %288 : vector<1x128x128xf32> to vector<128x128xf32>
    %cst_145 = arith.constant dense<0.000000e+00> : vector<16x128xf32>
    %290 = tpu.matmul %280, %289, %cst_145 {dimension_numbers = #tpu.dot_dimension_numbers<[1], [0], [0], [1], [0, 0, 1, 1], [], []>} : vector<16x128xf32>, vector<128x128xf32>, vector<16x128xf32> -> vector<16x128xf32>
    %c4_146 = arith.constant 4 : index
    %c0_147 = arith.constant 0 : index
    %c0_148 = arith.constant 0 : index
    %291 = vector.load %arg8[%c4_146, %c0_147, %c0_148] : memref<6x1x128xf32, #tpu.memory_space<vmem>>, vector<1x1x128xf32>
    %292 = vector.shape_cast %291 : vector<1x1x128xf32> to vector<1x128xf32>
    %293 = vector.broadcast %292 : vector<1x128xf32> to vector<16x128xf32>
    %294 = arith.addf %290, %293 : vector<16x128xf32>
    %c5 = arith.constant 5 : index
    %c0_149 = arith.constant 0 : index
    %c0_150 = arith.constant 0 : index
    %295 = vector.load %arg7[%c5, %c0_149, %c0_150] : memref<6x128x128xf32, #tpu.memory_space<vmem>>, vector<1x128x128xf32>
    %296 = vector.shape_cast %295 : vector<1x128x128xf32> to vector<128x128xf32>
    %cst_151 = arith.constant dense<0.000000e+00> : vector<16x128xf32>
    %297 = tpu.matmul %280, %296, %cst_151 {dimension_numbers = #tpu.dot_dimension_numbers<[1], [0], [0], [1], [0, 0, 1, 1], [], []>} : vector<16x128xf32>, vector<128x128xf32>, vector<16x128xf32> -> vector<16x128xf32>
    %c5_152 = arith.constant 5 : index
    %c0_153 = arith.constant 0 : index
    %c0_154 = arith.constant 0 : index
    %298 = vector.load %arg8[%c5_152, %c0_153, %c0_154] : memref<6x1x128xf32, #tpu.memory_space<vmem>>, vector<1x1x128xf32>
    %299 = vector.shape_cast %298 : vector<1x1x128xf32> to vector<1x128xf32>
    %300 = vector.broadcast %299 : vector<1x128xf32> to vector<16x128xf32>
    %301 = arith.addf %297, %300 : vector<16x128xf32>
    %cst_155 = arith.constant 0.000000e+00 : f32
    %302 = vector.broadcast %cst_155 : f32 to vector<16x128xf32>
    %c0_156 = arith.constant 0 : index
    %c0_157 = arith.constant 0 : index
    %303 = vector.load %arg20[%c0_156, %c0_157] : memref<16x128xf32, #tpu.memory_space<vmem>>, vector<16x128xf32>
    tpu.vector_store %arg20[%c0_156, %c0_157], %302 {strides = array<i32>} : memref<16x128xf32, #tpu.memory_space<vmem>>, vector<16x128xf32>,
    %304 = vector.extract_strided_slice %287 {offsets = [0, 0], sizes = [5, 16], strides = [1, 1]} : vector<16x128xf32> to vector<5x16xf32>
    %305 = vector.extract_strided_slice %294 {offsets = [0, 0], sizes = [5, 16], strides = [1, 1]} : vector<16x128xf32> to vector<5x16xf32>
    %306 = vector.extract_strided_slice %301 {offsets = [0, 0], sizes = [5, 16], strides = [1, 1]} : vector<16x128xf32> to vector<5x16xf32>
    %307 = tpu.transpose %305, [1, 0] : vector<5x16xf32> -> vector<16x5xf32>
    %cst_158 = arith.constant dense<0.000000e+00> : vector<5x5xf32>
    %308 = tpu.matmul %304, %307, %cst_158 {dimension_numbers = #tpu.dot_dimension_numbers<[1], [0], [0], [1], [0, 0, 1, 1], [], []>} : vector<5x16xf32>, vector<16x5xf32>, vector<5x5xf32> -> vector<5x5xf32>
    %cst_159 = arith.constant 2.500000e-01 : f32
    %309 = vector.broadcast %cst_159 : f32 to vector<5x5xf32>
    %310 = arith.mulf %308, %309 : vector<5x5xf32>
    %cst_160 = arith.constant dense<0xFF800000> : vector<5xf32>
    %311 = vector.multi_reduction <maximumf>, %310, %cst_160 [1] : vector<5x5xf32> to vector<5xf32>
    %312 = vector.shape_cast %311 : vector<5xf32> to vector<5x1xf32>
    %313 = vector.broadcast %312 : vector<5x1xf32> to vector<5x5xf32>
    %314 = arith.subf %310, %313 : vector<5x5xf32>
    %315 = math.exp %314 : vector<5x5xf32>
    %cst_161 = arith.constant dense<0.000000e+00> : vector<5xf32>
    %316 = vector.multi_reduction <add>, %315, %cst_161 [1] : vector<5x5xf32> to vector<5xf32>
    %317 = vector.shape_cast %316 : vector<5xf32> to vector<5x1xf32>
    %318 = vector.broadcast %317 : vector<5x1xf32> to vector<5x5xf32>
    %319 = arith.divf %315, %318 : vector<5x5xf32>
    %cst_162 = arith.constant dense<0.000000e+00> : vector<5x16xf32>
    %320 = tpu.matmul %319, %306, %cst_162 {dimension_numbers = #tpu.dot_dimension_numbers<[1], [0], [0], [1], [0, 0, 1, 1], [], []>} : vector<5x5xf32>, vector<5x16xf32>, vector<5x16xf32> -> vector<5x16xf32>
    %c0_163 = arith.constant 0 : index
    %c0_164 = arith.constant 0 : index
    %321 = vector.load %arg20[%c0_163, %c0_164] : memref<16x128xf32, #tpu.memory_space<vmem>>, vector<5x16xf32>
    tpu.vector_store %arg20[%c0_163, %c0_164], %320 {strides = array<i32>} : memref<16x128xf32, #tpu.memory_space<vmem>>, vector<5x16xf32>,
    %322 = vector.extract_strided_slice %287 {offsets = [0, 16], sizes = [5, 16], strides = [1, 1]} : vector<16x128xf32> to vector<5x16xf32>
    %323 = vector.extract_strided_slice %294 {offsets = [0, 16], sizes = [5, 16], strides = [1, 1]} : vector<16x128xf32> to vector<5x16xf32>
    %324 = vector.extract_strided_slice %301 {offsets = [0, 16], sizes = [5, 16], strides = [1, 1]} : vector<16x128xf32> to vector<5x16xf32>
    %325 = tpu.transpose %323, [1, 0] : vector<5x16xf32> -> vector<16x5xf32>
    %cst_165 = arith.constant dense<0.000000e+00> : vector<5x5xf32>
    %326 = tpu.matmul %322, %325, %cst_165 {dimension_numbers = #tpu.dot_dimension_numbers<[1], [0], [0], [1], [0, 0, 1, 1], [], []>} : vector<5x16xf32>, vector<16x5xf32>, vector<5x5xf32> -> vector<5x5xf32>
    %cst_166 = arith.constant 2.500000e-01 : f32
    %327 = vector.broadcast %cst_166 : f32 to vector<5x5xf32>
    %328 = arith.mulf %326, %327 : vector<5x5xf32>
    %cst_167 = arith.constant dense<0xFF800000> : vector<5xf32>
    %329 = vector.multi_reduction <maximumf>, %328, %cst_167 [1] : vector<5x5xf32> to vector<5xf32>
    %330 = vector.shape_cast %329 : vector<5xf32> to vector<5x1xf32>
    %331 = vector.broadcast %330 : vector<5x1xf32> to vector<5x5xf32>
    %332 = arith.subf %328, %331 : vector<5x5xf32>
    %333 = math.exp %332 : vector<5x5xf32>
    %cst_168 = arith.constant dense<0.000000e+00> : vector<5xf32>
    %334 = vector.multi_reduction <add>, %333, %cst_168 [1] : vector<5x5xf32> to vector<5xf32>
    %335 = vector.shape_cast %334 : vector<5xf32> to vector<5x1xf32>
    %336 = vector.broadcast %335 : vector<5x1xf32> to vector<5x5xf32>
    %337 = arith.divf %333, %336 : vector<5x5xf32>
    %cst_169 = arith.constant dense<0.000000e+00> : vector<5x16xf32>
    %338 = tpu.matmul %337, %324, %cst_169 {dimension_numbers = #tpu.dot_dimension_numbers<[1], [0], [0], [1], [0, 0, 1, 1], [], []>} : vector<5x5xf32>, vector<5x16xf32>, vector<5x16xf32> -> vector<5x16xf32>
    %c0_170 = arith.constant 0 : index
    %c16_171 = arith.constant 16 : index
    %339 = vector.load %arg20[%c0_170, %c16_171] : memref<16x128xf32, #tpu.memory_space<vmem>>, vector<5x16xf32>
    tpu.vector_store %arg20[%c0_170, %c16_171], %338 {strides = array<i32>} : memref<16x128xf32, #tpu.memory_space<vmem>>, vector<5x16xf32>,
    %340 = vector.extract_strided_slice %287 {offsets = [0, 32], sizes = [5, 16], strides = [1, 1]} : vector<16x128xf32> to vector<5x16xf32>
    %341 = vector.extract_strided_slice %294 {offsets = [0, 32], sizes = [5, 16], strides = [1, 1]} : vector<16x128xf32> to vector<5x16xf32>
    %342 = vector.extract_strided_slice %301 {offsets = [0, 32], sizes = [5, 16], strides = [1, 1]} : vector<16x128xf32> to vector<5x16xf32>
    %343 = tpu.transpose %341, [1, 0] : vector<5x16xf32> -> vector<16x5xf32>
    %cst_172 = arith.constant dense<0.000000e+00> : vector<5x5xf32>
    %344 = tpu.matmul %340, %343, %cst_172 {dimension_numbers = #tpu.dot_dimension_numbers<[1], [0], [0], [1], [0, 0, 1, 1], [], []>} : vector<5x16xf32>, vector<16x5xf32>, vector<5x5xf32> -> vector<5x5xf32>
    %cst_173 = arith.constant 2.500000e-01 : f32
    %345 = vector.broadcast %cst_173 : f32 to vector<5x5xf32>
    %346 = arith.mulf %344, %345 : vector<5x5xf32>
    %cst_174 = arith.constant dense<0xFF800000> : vector<5xf32>
    %347 = vector.multi_reduction <maximumf>, %346, %cst_174 [1] : vector<5x5xf32> to vector<5xf32>
    %348 = vector.shape_cast %347 : vector<5xf32> to vector<5x1xf32>
    %349 = vector.broadcast %348 : vector<5x1xf32> to vector<5x5xf32>
    %350 = arith.subf %346, %349 : vector<5x5xf32>
    %351 = math.exp %350 : vector<5x5xf32>
    %cst_175 = arith.constant dense<0.000000e+00> : vector<5xf32>
    %352 = vector.multi_reduction <add>, %351, %cst_175 [1] : vector<5x5xf32> to vector<5xf32>
    %353 = vector.shape_cast %352 : vector<5xf32> to vector<5x1xf32>
    %354 = vector.broadcast %353 : vector<5x1xf32> to vector<5x5xf32>
    %355 = arith.divf %351, %354 : vector<5x5xf32>
    %cst_176 = arith.constant dense<0.000000e+00> : vector<5x16xf32>
    %356 = tpu.matmul %355, %342, %cst_176 {dimension_numbers = #tpu.dot_dimension_numbers<[1], [0], [0], [1], [0, 0, 1, 1], [], []>} : vector<5x5xf32>, vector<5x16xf32>, vector<5x16xf32> -> vector<5x16xf32>
    %c0_177 = arith.constant 0 : index
    %c32_178 = arith.constant 32 : index
    %357 = vector.load %arg20[%c0_177, %c32_178] : memref<16x128xf32, #tpu.memory_space<vmem>>, vector<5x16xf32>
    tpu.vector_store %arg20[%c0_177, %c32_178], %356 {strides = array<i32>} : memref<16x128xf32, #tpu.memory_space<vmem>>, vector<5x16xf32>,
    %358 = vector.extract_strided_slice %287 {offsets = [8, 0], sizes = [5, 16], strides = [1, 1]} : vector<16x128xf32> to vector<5x16xf32>
    %359 = vector.extract_strided_slice %294 {offsets = [8, 0], sizes = [5, 16], strides = [1, 1]} : vector<16x128xf32> to vector<5x16xf32>
    %360 = vector.extract_strided_slice %301 {offsets = [8, 0], sizes = [5, 16], strides = [1, 1]} : vector<16x128xf32> to vector<5x16xf32>
    %361 = tpu.transpose %359, [1, 0] : vector<5x16xf32> -> vector<16x5xf32>
    %cst_179 = arith.constant dense<0.000000e+00> : vector<5x5xf32>
    %362 = tpu.matmul %358, %361, %cst_179 {dimension_numbers = #tpu.dot_dimension_numbers<[1], [0], [0], [1], [0, 0, 1, 1], [], []>} : vector<5x16xf32>, vector<16x5xf32>, vector<5x5xf32> -> vector<5x5xf32>
    %cst_180 = arith.constant 2.500000e-01 : f32
    %363 = vector.broadcast %cst_180 : f32 to vector<5x5xf32>
    %364 = arith.mulf %362, %363 : vector<5x5xf32>
    %cst_181 = arith.constant dense<0xFF800000> : vector<5xf32>
    %365 = vector.multi_reduction <maximumf>, %364, %cst_181 [1] : vector<5x5xf32> to vector<5xf32>
    %366 = vector.shape_cast %365 : vector<5xf32> to vector<5x1xf32>
    %367 = vector.broadcast %366 : vector<5x1xf32> to vector<5x5xf32>
    %368 = arith.subf %364, %367 : vector<5x5xf32>
    %369 = math.exp %368 : vector<5x5xf32>
    %cst_182 = arith.constant dense<0.000000e+00> : vector<5xf32>
    %370 = vector.multi_reduction <add>, %369, %cst_182 [1] : vector<5x5xf32> to vector<5xf32>
    %371 = vector.shape_cast %370 : vector<5xf32> to vector<5x1xf32>
    %372 = vector.broadcast %371 : vector<5x1xf32> to vector<5x5xf32>
    %373 = arith.divf %369, %372 : vector<5x5xf32>
    %cst_183 = arith.constant dense<0.000000e+00> : vector<5x16xf32>
    %374 = tpu.matmul %373, %360, %cst_183 {dimension_numbers = #tpu.dot_dimension_numbers<[1], [0], [0], [1], [0, 0, 1, 1], [], []>} : vector<5x5xf32>, vector<5x16xf32>, vector<5x16xf32> -> vector<5x16xf32>
    %c8_184 = arith.constant 8 : index
    %c0_185 = arith.constant 0 : index
    %375 = vector.load %arg20[%c8_184, %c0_185] : memref<16x128xf32, #tpu.memory_space<vmem>>, vector<5x16xf32>
    tpu.vector_store %arg20[%c8_184, %c0_185], %374 {strides = array<i32>} : memref<16x128xf32, #tpu.memory_space<vmem>>, vector<5x16xf32>,
    %376 = vector.extract_strided_slice %287 {offsets = [8, 16], sizes = [5, 16], strides = [1, 1]} : vector<16x128xf32> to vector<5x16xf32>
    %377 = vector.extract_strided_slice %294 {offsets = [8, 16], sizes = [5, 16], strides = [1, 1]} : vector<16x128xf32> to vector<5x16xf32>
    %378 = vector.extract_strided_slice %301 {offsets = [8, 16], sizes = [5, 16], strides = [1, 1]} : vector<16x128xf32> to vector<5x16xf32>
    %379 = tpu.transpose %377, [1, 0] : vector<5x16xf32> -> vector<16x5xf32>
    %cst_186 = arith.constant dense<0.000000e+00> : vector<5x5xf32>
    %380 = tpu.matmul %376, %379, %cst_186 {dimension_numbers = #tpu.dot_dimension_numbers<[1], [0], [0], [1], [0, 0, 1, 1], [], []>} : vector<5x16xf32>, vector<16x5xf32>, vector<5x5xf32> -> vector<5x5xf32>
    %cst_187 = arith.constant 2.500000e-01 : f32
    %381 = vector.broadcast %cst_187 : f32 to vector<5x5xf32>
    %382 = arith.mulf %380, %381 : vector<5x5xf32>
    %cst_188 = arith.constant dense<0xFF800000> : vector<5xf32>
    %383 = vector.multi_reduction <maximumf>, %382, %cst_188 [1] : vector<5x5xf32> to vector<5xf32>
    %384 = vector.shape_cast %383 : vector<5xf32> to vector<5x1xf32>
    %385 = vector.broadcast %384 : vector<5x1xf32> to vector<5x5xf32>
    %386 = arith.subf %382, %385 : vector<5x5xf32>
    %387 = math.exp %386 : vector<5x5xf32>
    %cst_189 = arith.constant dense<0.000000e+00> : vector<5xf32>
    %388 = vector.multi_reduction <add>, %387, %cst_189 [1] : vector<5x5xf32> to vector<5xf32>
    %389 = vector.shape_cast %388 : vector<5xf32> to vector<5x1xf32>
    %390 = vector.broadcast %389 : vector<5x1xf32> to vector<5x5xf32>
    %391 = arith.divf %387, %390 : vector<5x5xf32>
    %cst_190 = arith.constant dense<0.000000e+00> : vector<5x16xf32>
    %392 = tpu.matmul %391, %378, %cst_190 {dimension_numbers = #tpu.dot_dimension_numbers<[1], [0], [0], [1], [0, 0, 1, 1], [], []>} : vector<5x5xf32>, vector<5x16xf32>, vector<5x16xf32> -> vector<5x16xf32>
    %c8_191 = arith.constant 8 : index
    %c16_192 = arith.constant 16 : index
    %393 = vector.load %arg20[%c8_191, %c16_192] : memref<16x128xf32, #tpu.memory_space<vmem>>, vector<5x16xf32>
    tpu.vector_store %arg20[%c8_191, %c16_192], %392 {strides = array<i32>} : memref<16x128xf32, #tpu.memory_space<vmem>>, vector<5x16xf32>,
    %394 = vector.extract_strided_slice %287 {offsets = [8, 32], sizes = [5, 16], strides = [1, 1]} : vector<16x128xf32> to vector<5x16xf32>
    %395 = vector.extract_strided_slice %294 {offsets = [8, 32], sizes = [5, 16], strides = [1, 1]} : vector<16x128xf32> to vector<5x16xf32>
    %396 = vector.extract_strided_slice %301 {offsets = [8, 32], sizes = [5, 16], strides = [1, 1]} : vector<16x128xf32> to vector<5x16xf32>
    %397 = tpu.transpose %395, [1, 0] : vector<5x16xf32> -> vector<16x5xf32>
    %cst_193 = arith.constant dense<0.000000e+00> : vector<5x5xf32>
    %398 = tpu.matmul %394, %397, %cst_193 {dimension_numbers = #tpu.dot_dimension_numbers<[1], [0], [0], [1], [0, 0, 1, 1], [], []>} : vector<5x16xf32>, vector<16x5xf32>, vector<5x5xf32> -> vector<5x5xf32>
    %cst_194 = arith.constant 2.500000e-01 : f32
    %399 = vector.broadcast %cst_194 : f32 to vector<5x5xf32>
    %400 = arith.mulf %398, %399 : vector<5x5xf32>
    %cst_195 = arith.constant dense<0xFF800000> : vector<5xf32>
    %401 = vector.multi_reduction <maximumf>, %400, %cst_195 [1] : vector<5x5xf32> to vector<5xf32>
    %402 = vector.shape_cast %401 : vector<5xf32> to vector<5x1xf32>
    %403 = vector.broadcast %402 : vector<5x1xf32> to vector<5x5xf32>
    %404 = arith.subf %400, %403 : vector<5x5xf32>
    %405 = math.exp %404 : vector<5x5xf32>
    %cst_196 = arith.constant dense<0.000000e+00> : vector<5xf32>
    %406 = vector.multi_reduction <add>, %405, %cst_196 [1] : vector<5x5xf32> to vector<5xf32>
    %407 = vector.shape_cast %406 : vector<5xf32> to vector<5x1xf32>
    %408 = vector.broadcast %407 : vector<5x1xf32> to vector<5x5xf32>
    %409 = arith.divf %405, %408 : vector<5x5xf32>
    %cst_197 = arith.constant dense<0.000000e+00> : vector<5x16xf32>
    %410 = tpu.matmul %409, %396, %cst_197 {dimension_numbers = #tpu.dot_dimension_numbers<[1], [0], [0], [1], [0, 0, 1, 1], [], []>} : vector<5x5xf32>, vector<5x16xf32>, vector<5x16xf32> -> vector<5x16xf32>
    %c8_198 = arith.constant 8 : index
    %c32_199 = arith.constant 32 : index
    %411 = vector.load %arg20[%c8_198, %c32_199] : memref<16x128xf32, #tpu.memory_space<vmem>>, vector<5x16xf32>
    tpu.vector_store %arg20[%c8_198, %c32_199], %410 {strides = array<i32>} : memref<16x128xf32, #tpu.memory_space<vmem>>, vector<5x16xf32>,
    %c0_200 = arith.constant 0 : index
    %c0_201 = arith.constant 0 : index
    %412 = vector.load %arg20[%c0_200, %c0_201] : memref<16x128xf32, #tpu.memory_space<vmem>>, vector<16x128xf32>
    %c1_202 = arith.constant 1 : index
    %c0_203 = arith.constant 0 : index
    %c0_204 = arith.constant 0 : index
    %413 = vector.load %arg9[%c1_202, %c0_203, %c0_204] : memref<2x128x128xf32, #tpu.memory_space<vmem>>, vector<1x128x128xf32>
    %414 = vector.shape_cast %413 : vector<1x128x128xf32> to vector<128x128xf32>
    %cst_205 = arith.constant dense<0.000000e+00> : vector<16x128xf32>
    %415 = tpu.matmul %412, %414, %cst_205 {dimension_numbers = #tpu.dot_dimension_numbers<[1], [0], [0], [1], [0, 0, 1, 1], [], []>} : vector<16x128xf32>, vector<128x128xf32>, vector<16x128xf32> -> vector<16x128xf32>
    %c1_206 = arith.constant 1 : index
    %c0_207 = arith.constant 0 : index
    %c0_208 = arith.constant 0 : index
    %416 = vector.load %arg10[%c1_206, %c0_207, %c0_208] : memref<2x1x128xf32, #tpu.memory_space<vmem>>, vector<1x1x128xf32>
    %417 = vector.shape_cast %416 : vector<1x1x128xf32> to vector<1x128xf32>
    %418 = vector.broadcast %417 : vector<1x128xf32> to vector<16x128xf32>
    %419 = arith.addf %415, %418 : vector<16x128xf32>
    %420 = arith.addf %253, %419 : vector<16x128xf32>
    %c1_209 = arith.constant 1 : index
    %c0_210 = arith.constant 0 : index
    %c0_211 = arith.constant 0 : index
    %421 = vector.load %arg5[%c1_209, %c0_210, %c0_211] : memref<2x1x128xf32, #tpu.memory_space<vmem>>, vector<1x1x128xf32>
    %422 = vector.shape_cast %421 : vector<1x1x128xf32> to vector<1x128xf32>
    %c1_212 = arith.constant 1 : index
    %c0_213 = arith.constant 0 : index
    %c0_214 = arith.constant 0 : index
    %423 = vector.load %arg6[%c1_212, %c0_213, %c0_214] : memref<2x1x128xf32, #tpu.memory_space<vmem>>, vector<1x1x128xf32>
    %424 = vector.shape_cast %423 : vector<1x1x128xf32> to vector<1x128xf32>
    %425 = vector.extract_strided_slice %420 {offsets = [0, 0], sizes = [16, 48], strides = [1, 1]} : vector<16x128xf32> to vector<16x48xf32>
    %cst_215 = arith.constant dense<0.000000e+00> : vector<16xf32>
    %426 = vector.multi_reduction <add>, %425, %cst_215 [1] : vector<16x48xf32> to vector<16xf32>
    %427 = vector.shape_cast %426 : vector<16xf32> to vector<16x1xf32>
    %cst_216 = arith.constant 4.800000e+01 : f32
    %428 = vector.broadcast %cst_216 : f32 to vector<16x1xf32>
    %429 = arith.divf %427, %428 : vector<16x1xf32>
    %430 = vector.broadcast %429 : vector<16x1xf32> to vector<16x48xf32>
    %431 = arith.subf %425, %430 : vector<16x48xf32>
    %432 = arith.mulf %431, %431 : vector<16x48xf32>
    %cst_217 = arith.constant dense<0.000000e+00> : vector<16xf32>
    %433 = vector.multi_reduction <add>, %432, %cst_217 [1] : vector<16x48xf32> to vector<16xf32>
    %434 = vector.shape_cast %433 : vector<16xf32> to vector<16x1xf32>
    %cst_218 = arith.constant 4.800000e+01 : f32
    %435 = vector.broadcast %cst_218 : f32 to vector<16x1xf32>
    %436 = arith.divf %434, %435 : vector<16x1xf32>
    %cst_219 = arith.constant 9.99999997E-7 : f32
    %437 = vector.broadcast %cst_219 : f32 to vector<16x1xf32>
    %438 = arith.addf %436, %437 : vector<16x1xf32>
    %439 = math.rsqrt %438 : vector<16x1xf32>
    %440 = vector.broadcast %429 : vector<16x1xf32> to vector<16x128xf32>
    %441 = arith.subf %420, %440 : vector<16x128xf32>
    %442 = vector.broadcast %439 : vector<16x1xf32> to vector<16x128xf32>
    %443 = arith.mulf %441, %442 : vector<16x128xf32>
    %444 = vector.broadcast %422 : vector<1x128xf32> to vector<16x128xf32>
    %445 = arith.mulf %443, %444 : vector<16x128xf32>
    %446 = vector.broadcast %424 : vector<1x128xf32> to vector<16x128xf32>
    %447 = arith.addf %445, %446 : vector<16x128xf32>
    %c1_220 = arith.constant 1 : index
    %c0_221 = arith.constant 0 : index
    %c0_222 = arith.constant 0 : index
    %448 = vector.load %arg11[%c1_220, %c0_221, %c0_222] : memref<2x128x256xf32, #tpu.memory_space<vmem>>, vector<1x128x256xf32>
    %449 = vector.shape_cast %448 : vector<1x128x256xf32> to vector<128x256xf32>
    %cst_223 = arith.constant dense<0.000000e+00> : vector<16x256xf32>
    %450 = tpu.matmul %447, %449, %cst_223 {dimension_numbers = #tpu.dot_dimension_numbers<[1], [0], [0], [1], [0, 0, 1, 1], [], []>} : vector<16x128xf32>, vector<128x256xf32>, vector<16x256xf32> -> vector<16x256xf32>
    %c1_224 = arith.constant 1 : index
    %c0_225 = arith.constant 0 : index
    %c0_226 = arith.constant 0 : index
    %451 = vector.load %arg12[%c1_224, %c0_225, %c0_226] : memref<2x1x256xf32, #tpu.memory_space<vmem>>, vector<1x1x256xf32>
    %452 = vector.shape_cast %451 : vector<1x1x256xf32> to vector<1x256xf32>
    %453 = vector.broadcast %452 : vector<1x256xf32> to vector<16x256xf32>
    %454 = arith.addf %450, %453 : vector<16x256xf32>
    %cst_227 = arith.constant 5.000000e-01 : f32
    %455 = vector.broadcast %cst_227 : f32 to vector<16x256xf32>
    %456 = arith.mulf %455, %454 : vector<16x256xf32>
    %cst_228 = arith.constant 0.707106769 : f32
    %457 = vector.broadcast %cst_228 : f32 to vector<16x256xf32>
    %458 = arith.mulf %454, %457 : vector<16x256xf32>
    %459 = math.absf %458 : vector<16x256xf32>
    %cst_229 = arith.constant 0.327591091 : f32
    %460 = vector.broadcast %cst_229 : f32 to vector<16x256xf32>
    %461 = arith.mulf %460, %459 : vector<16x256xf32>
    %cst_230 = arith.constant 1.000000e+00 : f32
    %462 = vector.broadcast %cst_230 : f32 to vector<16x256xf32>
    %463 = arith.addf %462, %461 : vector<16x256xf32>
    %cst_231 = arith.constant 1.000000e+00 : f32
    %464 = vector.broadcast %cst_231 : f32 to vector<16x256xf32>
    %465 = arith.divf %464, %463 : vector<16x256xf32>
    %cst_232 = arith.constant 1.06140542 : f32
    %466 = vector.broadcast %cst_232 : f32 to vector<16x256xf32>
    %467 = arith.mulf %466, %465 : vector<16x256xf32>
    %cst_233 = arith.constant -1.45315206 : f32
    %468 = vector.broadcast %cst_233 : f32 to vector<16x256xf32>
    %469 = arith.addf %467, %468 : vector<16x256xf32>
    %470 = arith.mulf %469, %465 : vector<16x256xf32>
    %cst_234 = arith.constant 1.42141378 : f32
    %471 = vector.broadcast %cst_234 : f32 to vector<16x256xf32>
    %472 = arith.addf %470, %471 : vector<16x256xf32>
    %473 = arith.mulf %472, %465 : vector<16x256xf32>
    %cst_235 = arith.constant -0.284496725 : f32
    %474 = vector.broadcast %cst_235 : f32 to vector<16x256xf32>
    %475 = arith.addf %473, %474 : vector<16x256xf32>
    %476 = arith.mulf %475, %465 : vector<16x256xf32>
    %cst_236 = arith.constant 0.254829586 : f32
    %477 = vector.broadcast %cst_236 : f32 to vector<16x256xf32>
    %478 = arith.addf %476, %477 : vector<16x256xf32>
    %479 = arith.mulf %478, %465 : vector<16x256xf32>
    %cst_237 = arith.constant 0.000000e+00 : f32
    %480 = vector.broadcast %cst_237 : f32 to vector<16x256xf32>
    %481 = arith.subf %480, %459 : vector<16x256xf32>
    %482 = arith.mulf %481, %459 : vector<16x256xf32>
    %483 = math.exp %482 : vector<16x256xf32>
    %484 = arith.mulf %479, %483 : vector<16x256xf32>
    %cst_238 = arith.constant 1.000000e+00 : f32
    %485 = vector.broadcast %cst_238 : f32 to vector<16x256xf32>
    %486 = arith.subf %485, %484 : vector<16x256xf32>
    %cst_239 = arith.constant 0.000000e+00 : f32
    %487 = vector.broadcast %cst_239 : f32 to vector<16x256xf32>
    %488 = arith.cmpf olt, %458, %487 : vector<16x256xf32>
    %cst_240 = arith.constant 0.000000e+00 : f32
    %489 = vector.broadcast %cst_240 : f32 to vector<16x256xf32>
    %490 = arith.subf %489, %486 : vector<16x256xf32>
    %491 = arith.select %488, %490, %486 : vector<16x256xi1>, vector<16x256xf32>
    %cst_241 = arith.constant 1.000000e+00 : f32
    %492 = vector.broadcast %cst_241 : f32 to vector<16x256xf32>
    %493 = arith.addf %492, %491 : vector<16x256xf32>
    %494 = arith.mulf %456, %493 : vector<16x256xf32>
    %c1_242 = arith.constant 1 : index
    %c0_243 = arith.constant 0 : index
    %c0_244 = arith.constant 0 : index
    %495 = vector.load %arg13[%c1_242, %c0_243, %c0_244] : memref<2x256x128xf32, #tpu.memory_space<vmem>>, vector<1x256x128xf32>
    %496 = vector.shape_cast %495 : vector<1x256x128xf32> to vector<256x128xf32>
    %cst_245 = arith.constant dense<0.000000e+00> : vector<16x128xf32>
    %497 = tpu.matmul %494, %496, %cst_245 {dimension_numbers = #tpu.dot_dimension_numbers<[1], [0], [0], [1], [0, 0, 1, 1], [], []>} : vector<16x256xf32>, vector<256x128xf32>, vector<16x128xf32> -> vector<16x128xf32>
    %c1_246 = arith.constant 1 : index
    %c0_247 = arith.constant 0 : index
    %c0_248 = arith.constant 0 : index
    %498 = vector.load %arg14[%c1_246, %c0_247, %c0_248] : memref<2x1x128xf32, #tpu.memory_space<vmem>>, vector<1x1x128xf32>
    %499 = vector.shape_cast %498 : vector<1x1x128xf32> to vector<1x128xf32>
    %500 = vector.broadcast %499 : vector<1x128xf32> to vector<16x128xf32>
    %501 = arith.addf %497, %500 : vector<16x128xf32>
    %502 = arith.addf %420, %501 : vector<16x128xf32>
    %c0_249 = arith.constant 0 : index
    %c0_250 = arith.constant 0 : index
    %503 = vector.load %arg15[%c0_249, %c0_250] : memref<1x128xf32, #tpu.memory_space<vmem>>, vector<1x128xf32>
    %c0_251 = arith.constant 0 : index
    %c0_252 = arith.constant 0 : index
    %504 = vector.load %arg16[%c0_251, %c0_252] : memref<1x128xf32, #tpu.memory_space<vmem>>, vector<1x128xf32>
    %505 = vector.extract_strided_slice %502 {offsets = [0, 0], sizes = [16, 48], strides = [1, 1]} : vector<16x128xf32> to vector<16x48xf32>
    %cst_253 = arith.constant dense<0.000000e+00> : vector<16xf32>
    %506 = vector.multi_reduction <add>, %505, %cst_253 [1] : vector<16x48xf32> to vector<16xf32>
    %507 = vector.shape_cast %506 : vector<16xf32> to vector<16x1xf32>
    %cst_254 = arith.constant 4.800000e+01 : f32
    %508 = vector.broadcast %cst_254 : f32 to vector<16x1xf32>
    %509 = arith.divf %507, %508 : vector<16x1xf32>
    %510 = vector.broadcast %509 : vector<16x1xf32> to vector<16x48xf32>
    %511 = arith.subf %505, %510 : vector<16x48xf32>
    %512 = arith.mulf %511, %511 : vector<16x48xf32>
    %cst_255 = arith.constant dense<0.000000e+00> : vector<16xf32>
    %513 = vector.multi_reduction <add>, %512, %cst_255 [1] : vector<16x48xf32> to vector<16xf32>
    %514 = vector.shape_cast %513 : vector<16xf32> to vector<16x1xf32>
    %cst_256 = arith.constant 4.800000e+01 : f32
    %515 = vector.broadcast %cst_256 : f32 to vector<16x1xf32>
    %516 = arith.divf %514, %515 : vector<16x1xf32>
    %cst_257 = arith.constant 9.99999997E-7 : f32
    %517 = vector.broadcast %cst_257 : f32 to vector<16x1xf32>
    %518 = arith.addf %516, %517 : vector<16x1xf32>
    %519 = math.rsqrt %518 : vector<16x1xf32>
    %520 = vector.broadcast %509 : vector<16x1xf32> to vector<16x128xf32>
    %521 = arith.subf %502, %520 : vector<16x128xf32>
    %522 = vector.broadcast %519 : vector<16x1xf32> to vector<16x128xf32>
    %523 = arith.mulf %521, %522 : vector<16x128xf32>
    %524 = vector.broadcast %503 : vector<1x128xf32> to vector<16x128xf32>
    %525 = arith.mulf %523, %524 : vector<16x128xf32>
    %526 = vector.broadcast %504 : vector<1x128xf32> to vector<16x128xf32>
    %527 = arith.addf %525, %526 : vector<16x128xf32>
    %c0_258 = arith.constant 0 : index
    %c0_259 = arith.constant 0 : index
    %528 = vector.load %arg17[%c0_258, %c0_259] : memref<128x128xf32, #tpu.memory_space<vmem>>, vector<128x128xf32>
    %cst_260 = arith.constant dense<0.000000e+00> : vector<16x128xf32>
    %529 = tpu.matmul %527, %528, %cst_260 {dimension_numbers = #tpu.dot_dimension_numbers<[1], [0], [0], [1], [0, 0, 1, 1], [], []>} : vector<16x128xf32>, vector<128x128xf32>, vector<16x128xf32> -> vector<16x128xf32>
    %c0_261 = arith.constant 0 : index
    %c0_262 = arith.constant 0 : index
    %530 = vector.load %arg18[%c0_261, %c0_262] : memref<1x128xf32, #tpu.memory_space<vmem>>, vector<1x128xf32>
    %531 = vector.broadcast %530 : vector<1x128xf32> to vector<16x128xf32>
    %532 = arith.addf %529, %531 : vector<16x128xf32>
    %c0_263 = arith.constant 0 : index
    %c0_264 = arith.constant 0 : index
    %533 = vector.load %arg19[%c0_263, %c0_264] : memref<16x128xf32, #tpu.memory_space<vmem>>, vector<16x128xf32>
    tpu.vector_store %arg19[%c0_263, %c0_264], %532 {strides = array<i32>} : memref<16x128xf32, #tpu.memory_space<vmem>>, vector<16x128xf32>,
    return
  }
}

</mosaic_0001>

<bundles_post_ra>
// kernel: vit_forward.1
= control target key start
LH: loop header
LB: loop body
LE: loop exit
PB: predicated region body
PF: predicated region fallthrough
CT: control target
= control target key end

     0   :  { %s4931_s0 = inlined_call_operand.vmem [shape: f32[16,768], index: 0, kind: input, shape index: {}]   ;;  %s4932_s1 = inlined_call_operand.vmem [shape: f32[768,128], index: 1, kind: input, shape index: {}]   ;;  %s4933_s2 = inlined_call_operand.hbm [shape: f32[16,128], index: 2, kind: input, shape index: {}]   ;;  %s4934_s3 = inlined_call_operand.hbm [shape: f32[2,1,128], index: 3, kind: input, shape index: {}]   ;;  %s4935_s4 = inlined_call_operand.hbm [shape: f32[2,1,128], index: 4, kind: input, shape index: {}]   ;;  %s4936_s5 = inlined_call_operand.hbm [shape: f32[2,1,128], index: 5, kind: input, shape index: {}]   ;;  %s4937_s6 = inlined_call_operand.hbm [shape: f32[2,1,128], index: 6, kind: input, shape index: {}]   ;;  %s4938_s7 = inlined_call_operand.vmem [shape: f32[6,128,128], index: 7, kind: input, shape index: {}]   ;;  %s4939_s8 = inlined_call_operand.hbm [shape: f32[6,1,128], index: 8, kind: input, shape index: {}]   ;;  %s4940_s9 = inlined_call_operand.vmem [shape: f32[2,128,128], index: 9, kind: input, shape index: {}]   ;;  %s4941_s10 = inlined_call_operand.hbm [shape: f32[2,1,128], index: 10, kind: input, shape index: {}]   ;;  %s4942_s11 = inlined_call_operand.hbm [shape: f32[2,128,256], index: 11, kind: input, shape index: {}]   ;;  %s4943_s12 = inlined_call_operand.hbm [shape: f32[2,1,256], index: 12, kind: input, shape index: {}]   ;;  %s4944_s13 = inlined_call_operand.hbm [shape: f32[2,256,128], index: 13, kind: input, shape index: {}]   ;;  %s4945_s14 = inlined_call_operand.hbm [shape: f32[2,1,128], index: 14, kind: input, shape index: {}]   ;;  %s4946_s15 = inlined_call_operand.hbm [shape: f32[1,128], index: 15, kind: input, shape index: {}]   ;;  %s4947_s16 = inlined_call_operand.hbm [shape: f32[1,128], index: 16, kind: input, shape index: {}]   ;;  %s4948_s17 = inlined_call_operand.vmem [shape: f32[128,128], index: 17, kind: input, shape index: {}]   ;;  %s4949_s18 = inlined_call_operand.hbm [shape: f32[1,128], index: 18, kind: input, shape index: {}]   ;;  %s4950_s19 = inlined_call_operand.vmem [shape: f32[16,128], index: 19, kind: output, shape index: {}]  }
   0x1   :  { %4953 = sst [smem:[#allocation33_spill]] %s4931_s0 }
   0x2   :  { %4954 = sst [smem:[#allocation34_spill]] %s4932_s1 }
   0x3   :  { %4955 = sst [smem:[#allocation35_spill]] %s4933_s2 }
   0x4   :  { %4956 = sst [smem:[#allocation36_spill]] %s4934_s3 }
   0x5   :  { %24 = vsyncpa [#allocation4], 0 }
   0x6   :  { %25 = vsyncpa [#allocation6], 0 }
   0x7   :  { %26 = vsyncpa [#allocation9], 0 }
   0x8   :  { %27 = vsyncpa [#allocation12], 0 }
   0x9   :  { %28 = vsyncpa [#allocation15], 0 }
   0xa   :  { %29 = vsyncpa [#allocation18], 0 }
   0xb   :  { %30 = vsyncpa [#allocation21], 0  ;;  %s4957_s20 = sld [smem:[#allocation36_spill]] }
  0x11   :  { %s53_s21 = sshll.u32 %s4957_s20, 4  ;;  %s54_s21 = int_to_ptr.hbm [resolvable:$true] %s53_s21 }
  0x12   :  { %31 = vsyncpa [#allocation24], 0  ;;  %s3542_s1 = smov [#allocation5]   ;;  %s79_s24 = sshll.u32 %s4936_s5, 4  ;;  %s80_s24 = int_to_ptr.hbm [resolvable:$true] %s79_s24 }
  0x13   :  { %s55_s22 = sshll.u32 %s3542_s1, 4  ;;  %s3543_s25 = smov 16   ;;  %s56_s22 = int_to_ptr.vmem [resolvable:$true] %s55_s22 }
  0x14   :  { %s3544_s3 = smov 1   ;;  %s3545_s26 = smov [#allocation8]  }
  0x15   :  { %61 = dma.hbm_to_vmem [thread:$0]  %s54_s21, 32, %s56_s22, [#allocation6], %s3543_s25, %s3543_s25, %s3544_s3  }
  0x16   :  { %s81_s27 = sshll.u32 %s3545_s26, 4  ;;  %s107_s0 = sshll.u32 %s4939_s8, 4  ;;  %s82_s27 = int_to_ptr.vmem [resolvable:$true] %s81_s27  ;;  %s108_s0 = int_to_ptr.hbm [resolvable:$true] %s107_s0 }
  0x17   :  { %87 = dma.hbm_to_vmem [thread:$0]  %s80_s24, 32, %s82_s27, [#allocation9], %s3543_s25, %s3543_s25, %s3544_s3  }
  0x18   :  { %s135_s20 = sshll.u32 %s4942_s11, 4  ;;  %s3546_s1 = smov [#allocation11]   ;;  %s136_s20 = int_to_ptr.hbm [resolvable:$true] %s135_s20 }
  0x19   :  { %s109_s2 = sshll.u32 %s3546_s1, 4  ;;  %s3547_s21 = smov [#allocation14]   ;;  %s110_s2 = int_to_ptr.vmem [resolvable:$true] %s109_s2 }
  0x1a   :  { %115 = dma.hbm_to_vmem [thread:$0]  %s108_s0, 96, %s110_s2, [#allocation12], %s3543_s25, %s3543_s25, %s3544_s3  }
  0x1b   :  { %s137_s8 = sshll.u32 %s3547_s21, 4  ;;  %s3548_s22 = smov 256   ;;  %s138_s8 = int_to_ptr.vmem [resolvable:$true] %s137_s8 }
  0x1c   :  { %143 = dma.hbm_to_vmem [thread:$0]  %s136_s20, 8192, %s138_s8, [#allocation15], %s3548_s22, %s3548_s22, %s3543_s25  }
  0x1d   :  { %s161_s26 = sshll.u32 %s4944_s13, 4  ;;  %s3549_s11 = smov [#allocation17]   ;;  %s162_s26 = int_to_ptr.hbm [resolvable:$true] %s161_s26 }
  0x1e   :  { %s163_s27 = sshll.u32 %s3549_s11, 4  ;;  %s188_s5 = sshll.u32 %s4946_s15, 4  ;;  %s164_s27 = int_to_ptr.vmem [resolvable:$true] %s163_s27  ;;  %s189_s5 = int_to_ptr.hbm [resolvable:$true] %s188_s5 }
  0x1f   :  { %s3550_s0 = smov 128   ;;  %s3551_s30 = smov 8  }
  0x20   :  { %169 = dma.hbm_to_vmem [thread:$0]  %s162_s26, 8192, %s164_s27, [#allocation18], %s3550_s0, %s3550_s0, %s3551_s30  }
  0x21   :  { %s4958_s21 = sld [smem:[#allocation35_spill]]  ;;  %s3552_s8 = smov [#allocation20]  }
  0x22   :  { %s190_s22 = sshll.u32 %s3552_s8, 4  ;;  %s3553_s13 = smov [#allocation3]   ;;  %s191_s22 = int_to_ptr.vmem [resolvable:$true] %s190_s22 }
  0x23   :  { %193 = dma.hbm_to_vmem [thread:$0]  %s189_s5, 16, %s191_s22, [#allocation21]  }
  0x24   :  { %s42_s23 = sshll.u32 %s3553_s13, 4  ;;  %s66_s15 = sshll.u32 %s4935_s4, 4  ;;  %s43_s23 = int_to_ptr.vmem [resolvable:$true] %s42_s23  ;;  %s67_s15 = int_to_ptr.hbm [resolvable:$true] %s66_s15 }
  0x25   :  { %s92_s27 = sshll.u32 %s4937_s6, 4  ;;  %s3554_s29 = smov [#allocation7]   ;;  %s93_s27 = int_to_ptr.hbm [resolvable:$true] %s92_s27 }
  0x26   :  { %s68_s1 = sshll.u32 %s3554_s29, 4  ;;  %s3555_s5 = smov [#allocation10]   ;;  %s69_s1 = int_to_ptr.vmem [resolvable:$true] %s68_s1 }
  0x27   :  { %s40_s20 = sshll.u32 %s4958_s21, 4  ;;  %s94_s2 = sshll.u32 %s3555_s5, 4  ;;  %s41_s20 = int_to_ptr.hbm [resolvable:$true] %s40_s20  ;;  %s95_s2 = int_to_ptr.vmem [resolvable:$true] %s94_s2 }
  0x28   :  { %48 = dma.hbm_to_vmem [thread:$0]  %s41_s20, 256, %s43_s23, [#allocation4], %s3550_s0, %s3550_s0, %s3551_s30  }
  0x29   :  { %74 = dma.hbm_to_vmem [thread:$0]  %s67_s15, 32, %s69_s1, [#allocation6], %s3543_s25, %s3543_s25, %s3544_s3  }
  0x2a   :  { %s122_s4 = sshll.u32 %s4941_s10, 4  ;;  %s148_s30 = sshll.u32 %s4943_s12, 4  ;;  %s123_s4 = int_to_ptr.hbm [resolvable:$true] %s122_s4  ;;  %s149_s30 = int_to_ptr.hbm [resolvable:$true] %s148_s30 }
  0x2b   :  { %100 = dma.hbm_to_vmem [thread:$0]  %s93_s27, 32, %s95_s2, [#allocation9], %s3543_s25, %s3543_s25, %s3544_s3  }
  0x2c   :  { %s3556_s20 = smov [#allocation13]   ;;  %s3557_s13 = smov [#allocation16]  }
  0x2d   :  { %s124_s22 = sshll.u32 %s3556_s20, 4  ;;  %s150_s10 = sshll.u32 %s3557_s13, 4  ;;  %s125_s22 = int_to_ptr.vmem [resolvable:$true] %s124_s22  ;;  %s151_s10 = int_to_ptr.vmem [resolvable:$true] %s150_s10 }
  0x2e   :  { %130 = dma.hbm_to_vmem [thread:$0]  %s123_s4, 32, %s125_s22, [#allocation12], %s3543_s25, %s3543_s25, %s3544_s3  }
  0x2f   :  { %s3558_s23 = smov 32   ;;  %s3559_s24 = smov 2  }
  0x30   :  { %156 = dma.hbm_to_vmem [thread:$0]  %s149_s30, 64, %s151_s10, [#allocation15], %s3558_s23, %s3558_s23, %s3559_s24  }
  0x31   :  { %s174_s12 = sshll.u32 %s4945_s14, 4  ;;  %s3560_s28 = smov [#allocation19]   ;;  %s175_s12 = int_to_ptr.hbm [resolvable:$true] %s174_s12 }
  0x32   :  { %s176_s26 = sshll.u32 %s3560_s28, 4  ;;  %s199_s1 = sshll.u32 %s4947_s16, 4  ;;  %s177_s26 = int_to_ptr.vmem [resolvable:$true] %s176_s26  ;;  %s200_s1 = int_to_ptr.hbm [resolvable:$true] %s199_s1 }
  0x33   :  { %182 = dma.hbm_to_vmem [thread:$0]  %s175_s12, 32, %s177_s26, [#allocation18], %s3543_s25, %s3543_s25, %s3544_s3  }
  0x34   :  { %s3561_s5 = smov [#allocation22]   ;;  %s212_s4 = sshll.u32 %s4949_s18, 4  ;;  %s213_s4 = int_to_ptr.hbm [resolvable:$true] %s212_s4 }
  0x35   :  { %s201_s2 = sshll.u32 %s3561_s5, 4  ;;  %s3562_s14 = smov [#allocation23]   ;;  %s202_s2 = int_to_ptr.vmem [resolvable:$true] %s201_s2 }
  0x36   :  { %204 = dma.hbm_to_vmem [thread:$0]  %s200_s1, 16, %s202_s2, [#allocation21]  }
  0x37   :  { %s214_s6 = sshll.u32 %s3562_s14, 4  ;;  %s215_s6 = int_to_ptr.vmem [resolvable:$true] %s214_s6 }
  0x38   :  { %217 = dma.hbm_to_vmem [thread:$0]  %s213_s4, 16, %s215_s6, [#allocation24]  }
  0x39   :  { %3526 = dma.done.wait [#allocation4], 256  }
  0x3a   :  { %3527 = vsyncadd [#allocation4], 4294967040 }
  0x3b   :  { %3528 = dma.done.wait [#allocation6], 64  }
  0x3c   :  { %3529 = vsyncadd [#allocation6], 4294967232 }
  0x3d   :  { %3530 = dma.done.wait [#allocation9], 64  }
  0x3e   :  { %3531 = vsyncadd [#allocation9], 4294967232 }
  0x3f   :  { %3532 = dma.done.wait [#allocation12], 128  }
  0x40   :  { %3533 = vsyncadd [#allocation12], 4294967168 }
  0x41   :  { %3534 = dma.done.wait [#allocation15], 8256  }
  0x42   :  { %3535 = vsyncadd [#allocation15], 4294959040 }
  0x43   :  { %3536 = dma.done.wait [#allocation18], 8224  }
  0x44   :  { %3537 = vsyncadd [#allocation18], 4294959072 }
  0x45   :  { %3538 = dma.done.wait [#allocation21], 32  }
  0x46   :  { %3539 = vsyncadd [#allocation21], 4294967264 }
  0x47   :  { %3540 = dma.done.wait [#allocation24], 16  }
  0x48   :  { %3541 = vsyncadd [#allocation24], 4294967280  ;;  %s4959_s3 = sld [smem:[#allocation34_spill]]  ;;  %vm524_vm0 = vcmask 392192   ;;  %vm778_vm8 = vcmask 1044480   ;;  %s3564_s6 = smov 112  }
  0x49   :  { %s4960_s13 = sld [smem:[#allocation33_spill]]  ;;  %vm721_vm9 = vcmask 130048   ;;  %vm749_vm10 = vcmask 36864   ;;  %s3565_s16 = smov 96   ;;  %vm774_vm15 = vcmask 39936  }
  0x4e   :  { %v301_v0 = vld [vmem:[%s4959_s3 + $0x78] sm:$0xff]  ;;  %v300_v1 = vld [vmem:[%s4959_s3 + $0x70] sm:$0xff]  ;;  %v299_v4 = vld [vmem:[%s4959_s3 + $0x68] sm:$0xff] }
  0x4f   :  { %v317_v2 = vld [vmem:[%s4959_s3 + $0xf8] sm:$0xff]  ;;  %384 = vmatpush.msra.mxu0 %v301_v0  ;;  %v316_v3 = vld [vmem:[%s4959_s3 + $0xf0] sm:$0xff]  ;;  %v315_v5 = vld [vmem:[%s4959_s3 + $0xe8] sm:$0xff] }
  0x50   :  { %407 = vmatpush.msra.mxu1 %v317_v2  ;;  %v298_v6 = vld [vmem:[%s4959_s3 + $0x60] sm:$0xff]  ;;  %v333_v8 = vld [vmem:[%s4959_s3 + $0x178] sm:$0xff]  ;;  %v332_v9 = vld [vmem:[%s4959_s3 + $0x170] sm:$0xff] }
  0x51   :  { %385 = vmatpush.msra.mxu0 %v300_v1  ;;  %v314_v7 = vld [vmem:[%s4959_s3 + $0xe0] sm:$0xff]  ;;  %v349_v10 = vld [vmem:[%s4959_s3 + $0x1f8] sm:$0xff]  ;;  %430 = vmatpush.msra.mxu2 %v333_v8  ;;  %v331_v13 = vld [vmem:[%s4959_s3 + $0x168] sm:$0xff] }
  0x52   :  { %408 = vmatpush.msra.mxu1 %v316_v3  ;;  %v297_v11 = vld [vmem:[%s4959_s3 + $0x58] sm:$0xff]  ;;  %453 = vmatpush.msra.mxu3 %v349_v10  ;;  %v348_v14 = vld [vmem:[%s4959_s3 + $0x1f0] sm:$0xff]  ;;  %v347_v17 = vld [vmem:[%s4959_s3 + $0x1e8] sm:$0xff] }
  0x53   :  { %386 = vmatpush.msra.mxu0 %v299_v4  ;;  %v313_v12 = vld [vmem:[%s4959_s3 + $0xd8] sm:$0xff]  ;;  %v296_v15 = vld [vmem:[%s4959_s3 + $0x50] sm:$0xff]  ;;  %431 = vmatpush.msra.mxu2 %v332_v9  ;;  %v330_v18 = vld [vmem:[%s4959_s3 + $0x160] sm:$0xff] }
  0x54   :  { %409 = vmatpush.msra.mxu1 %v315_v5  ;;  %v312_v16 = vld [vmem:[%s4959_s3 + $0xd0] sm:$0xff]  ;;  %454 = vmatpush.msra.mxu3 %v348_v14  ;;  %v346_v19 = vld [vmem:[%s4959_s3 + $0x1e0] sm:$0xff]  ;;  %v295_v20 = vld [vmem:[%s4959_s3 + $0x48] sm:$0xff] }
  0x55   :  { %387 = vmatpush.msra.mxu0 %v298_v6  ;;  %v311_v21 = vld [vmem:[%s4959_s3 + $0xc8] sm:$0xff]  ;;  %432 = vmatpush.msra.mxu2 %v331_v13  ;;  %v329_v22 = vld [vmem:[%s4959_s3 + $0x158] sm:$0xff]  ;;  %v294_v24 = vld [vmem:[%s4959_s3 + $0x40] sm:$0xff] }
  0x56   :  { %410 = vmatpush.msra.mxu1 %v314_v7  ;;  %455 = vmatpush.msra.mxu3 %v347_v17  ;;  %v345_v23 = vld [vmem:[%s4959_s3 + $0x1d8] sm:$0xff]  ;;  %v310_v25 = vld [vmem:[%s4959_s3 + $0xc0] sm:$0xff]  ;;  %v328_v26 = vld [vmem:[%s4959_s3 + $0x150] sm:$0xff] }
  0x57   :  { %388 = vmatpush.msra.mxu0 %v297_v11  ;;  %433 = vmatpush.msra.mxu2 %v330_v18  ;;  %v344_v27 = vld [vmem:[%s4959_s3 + $0x1d0] sm:$0xff]  ;;  %v293_v28 = vld [vmem:[%s4959_s3 + $0x38] sm:$0xff]  ;;  %v327_v30 = vld [vmem:[%s4959_s3 + $0x148] sm:$0xff] }
  0x58   :  { %411 = vmatpush.msra.mxu1 %v313_v12  ;;  %456 = vmatpush.msra.mxu3 %v346_v19  ;;  %v309_v29 = vld [vmem:[%s4959_s3 + $0xb8] sm:$0xff]  ;;  %v343_v31 = vld [vmem:[%s4959_s3 + $0x1c8] sm:$0xff]  ;;  %v292_v32 = vld [vmem:[%s4959_s3 + $0x30] sm:$0xff] }
  0x59   :  { %389 = vmatpush.msra.mxu0 %v296_v15  ;;  %434 = vmatpush.msra.mxu2 %v329_v22  ;;  %v308_v33 = vld [vmem:[%s4959_s3 + $0xb0] sm:$0xff]  ;;  %v326_v34 = vld [vmem:[%s4959_s3 + $0x140] sm:$0xff]  ;;  %v291_v36 = vld [vmem:[%s4959_s3 + $0x28] sm:$0xff] }
  0x5a   :  { %412 = vmatpush.msra.mxu1 %v312_v16  ;;  %457 = vmatpush.msra.mxu3 %v345_v23  ;;  %v342_v35 = vld [vmem:[%s4959_s3 + $0x1c0] sm:$0xff]  ;;  %v307_v37 = vld [vmem:[%s4959_s3 + $0xa8] sm:$0xff]  ;;  %v325_v38 = vld [vmem:[%s4959_s3 + $0x138] sm:$0xff] }
  0x5b   :  { %390 = vmatpush.msra.mxu0 %v295_v20  ;;  %435 = vmatpush.msra.mxu2 %v328_v26  ;;  %v341_v39 = vld [vmem:[%s4959_s3 + $0x1b8] sm:$0xff]  ;;  %v290_v40 = vld [vmem:[%s4959_s3 + $0x20] sm:$0xff]  ;;  %v324_v42 = vld [vmem:[%s4959_s3 + $0x130] sm:$0xff] }
  0x5c   :  { %413 = vmatpush.msra.mxu1 %v311_v21  ;;  %458 = vmatpush.msra.mxu3 %v344_v27  ;;  %v306_v41 = vld [vmem:[%s4959_s3 + $0xa0] sm:$0xff]  ;;  %v340_v43 = vld [vmem:[%s4959_s3 + $0x1b0] sm:$0xff]  ;;  %v289_v44 = vld [vmem:[%s4959_s3 + $0x18] sm:$0xff] }
  0x5d   :  { %391 = vmatpush.msra.mxu0 %v294_v24  ;;  %436 = vmatpush.msra.mxu2 %v327_v30  ;;  %v305_v45 = vld [vmem:[%s4959_s3 + $0x98] sm:$0xff]  ;;  %v323_v46 = vld [vmem:[%s4959_s3 + $0x128] sm:$0xff]  ;;  %v288_v48 = vld [vmem:[%s4959_s3 + $0x10] sm:$0xff] }
  0x5e   :  { %414 = vmatpush.msra.mxu1 %v310_v25  ;;  %459 = vmatpush.msra.mxu3 %v343_v31  ;;  %v339_v47 = vld [vmem:[%s4959_s3 + $0x1a8] sm:$0xff]  ;;  %v304_v49 = vld [vmem:[%s4959_s3 + $0x90] sm:$0xff]  ;;  %v322_v50 = vld [vmem:[%s4959_s3 + $0x120] sm:$0xff] }
  0x5f   :  { %392 = vmatpush.msra.mxu0 %v293_v28  ;;  %437 = vmatpush.msra.mxu2 %v326_v34  ;;  %v338_v51 = vld [vmem:[%s4959_s3 + $0x1a0] sm:$0xff]  ;;  %v287_v52 = vld [vmem:[%s4959_s3 + $0x8] sm:$0xff]  ;;  %v321_v54 = vld [vmem:[%s4959_s3 + $0x118] sm:$0xff] }
  0x60   :  { %415 = vmatpush.msra.mxu1 %v309_v29  ;;  %460 = vmatpush.msra.mxu3 %v342_v35  ;;  %v303_v53 = vld [vmem:[%s4959_s3 + $0x88] sm:$0xff]  ;;  %v337_v55 = vld [vmem:[%s4959_s3 + $0x198] sm:$0xff]  ;;  %v286_v56 = vld [vmem:[%s4959_s3] sm:$0xff] }
  0x61   :  { %393 = vmatpush.msra.mxu0 %v292_v32  ;;  %438 = vmatpush.msra.mxu2 %v325_v38  ;;  %v302_v57 = vld [vmem:[%s4959_s3 + $0x80] sm:$0xff]  ;;  %v365_v58 = vld [vmem:[%s4959_s3 + $0x278] sm:$0xff]  ;;  %v320_v60 = vld [vmem:[%s4959_s3 + $0x110] sm:$0xff] }
  0x62   :  { %416 = vmatpush.msra.mxu1 %v308_v33  ;;  %461 = vmatpush.msra.mxu3 %v341_v39  ;;  %v381_v59 = vld [vmem:[%s4959_s3 + $0x2f8] sm:$0xff]  ;;  %v336_v61 = vld [vmem:[%s4959_s3 + $0x190] sm:$0xff]  ;;  %v319_v0 = vld [vmem:[%s4959_s3 + $0x108] sm:$0xff] }
  0x63   :  { %394 = vmatpush.msra.mxu0 %v291_v36  ;;  %439 = vmatpush.msra.mxu2 %v324_v42  ;;  %v364_v62 = vld [vmem:[%s4959_s3 + $0x270] sm:$0xff]  ;;  %v335_v1 = vld [vmem:[%s4959_s3 + $0x188] sm:$0xff]  ;;  %v362_v3 = vld [vmem:[%s4959_s3 + $0x260] sm:$0xff] }
  0x64   :  { %417 = vmatpush.msra.mxu1 %v307_v37  ;;  %462 = vmatpush.msra.mxu3 %v340_v43  ;;  %v380_v63 = vld [vmem:[%s4959_s3 + $0x2f0] sm:$0xff]  ;;  %v363_v2 = vld [vmem:[%s4959_s3 + $0x268] sm:$0xff]  ;;  %v378_v5 = vld [vmem:[%s4959_s3 + $0x2e0] sm:$0xff] }
  0x65   :  { %395 = vmatpush.msra.mxu0 %v290_v40  ;;  %440 = vmatpush.msra.mxu2 %v323_v46  ;;  %v379_v4 = vld [vmem:[%s4959_s3 + $0x2e8] sm:$0xff]  ;;  %v318_v6 = vld [vmem:[%s4959_s3 + $0x100] sm:$0xff]  ;;  %v361_v8 = vld [vmem:[%s4959_s3 + $0x258] sm:$0xff] }
  0x66   :  { %418 = vmatpush.msra.mxu1 %v306_v41  ;;  %463 = vmatpush.msra.mxu3 %v339_v47  ;;  %v334_v7 = vld [vmem:[%s4959_s3 + $0x180] sm:$0xff]  ;;  %v377_v9 = vld [vmem:[%s4959_s3 + $0x2d8] sm:$0xff]  ;;  %v276_v10 = vld [vmem:[%s4960_s13 + $0x10] sm:$0xff] }
  0x67   :  { %396 = vmatpush.msra.mxu0 %v289_v44  ;;  %441 = vmatpush.msra.mxu2 %v322_v50  ;;  %v274_v11 = vld [vmem:[%s4960_s13] sm:$0xff]  ;;  %v277_v12 = vld [vmem:[%s4960_s13 + $0x18] sm:$0xff]  ;;  %v275_v13 = vld [vmem:[%s4960_s13 + $0x8] sm:$0xff] }
  0x68   :  { %419 = vmatpush.msra.mxu1 %v305_v45  ;;  %464 = vmatpush.msra.mxu3 %v338_v51  ;;  %v360_v14 = vld [vmem:[%s4959_s3 + $0x250] sm:$0xff]  ;;  %v359_v15 = vld [vmem:[%s4959_s3 + $0x248] sm:$0xff]  ;;  %v358_v18 = vld [vmem:[%s4959_s3 + $0x240] sm:$0xff] }
  0x69   :  { %397 = vmatpush.msra.mxu0 %v288_v48  ;;  %442 = vmatpush.msra.mxu2 %v321_v54  ;;  %v376_v16 = vld [vmem:[%s4959_s3 + $0x2d0] sm:$0xff]  ;;  %v375_v17 = vld [vmem:[%s4959_s3 + $0x2c8] sm:$0xff]  ;;  %v374_v19 = vld [vmem:[%s4959_s3 + $0x2c0] sm:$0xff] }
  0x6a   :  { %420 = vmatpush.msra.mxu1 %v304_v49  ;;  %465 = vmatpush.msra.mxu3 %v337_v55  ;;  %v282_v20 = vld [vmem:[%s4960_s13 + $0x40] sm:$0xff]  ;;  %v280_v21 = vld [vmem:[%s4960_s13 + $0x30] sm:$0xff]  ;;  %v357_v22 = vld [vmem:[%s4959_s3 + $0x238] sm:$0xff] }
  0x6b   :  { %398 = vmatpush.msra.mxu0 %v287_v52  ;;  %443 = vmatpush.msra.mxu2 %v320_v60  ;;  %v373_v23 = vld [vmem:[%s4959_s3 + $0x2b8] sm:$0xff]  ;;  %v283_v24 = vld [vmem:[%s4960_s13 + $0x48] sm:$0xff]  ;;  %v356_v26 = vld [vmem:[%s4959_s3 + $0x230] sm:$0xff] }
  0x6c   :  { %421 = vmatpush.msra.mxu1 %v303_v53  ;;  %466 = vmatpush.msra.mxu3 %v336_v61  ;;  %v281_v25 = vld [vmem:[%s4960_s13 + $0x38] sm:$0xff]  ;;  %v372_v27 = vld [vmem:[%s4959_s3 + $0x2b0] sm:$0xff]  ;;  %v355_v28 = vld [vmem:[%s4959_s3 + $0x228] sm:$0xff] }
  0x6d   :  { %399 = vmatpush.msra.mxu0 %v286_v56  ;;  %444 = vmatpush.msra.mxu2 %v319_v0  ;;  %v371_v29 = vld [vmem:[%s4959_s3 + $0x2a8] sm:$0xff]  ;;  %v354_v30 = vld [vmem:[%s4959_s3 + $0x220] sm:$0xff]  ;;  %v353_v32 = vld [vmem:[%s4959_s3 + $0x218] sm:$0xff] }
  0x6e   :  { %422 = vmatpush.msra.mxu1 %v302_v57  ;;  %467 = vmatpush.msra.mxu3 %v335_v1  ;;  %v370_v31 = vld [vmem:[%s4959_s3 + $0x2a0] sm:$0xff]  ;;  %v369_v33 = vld [vmem:[%s4959_s3 + $0x298] sm:$0xff]  ;;  %v352_v34 = vld [vmem:[%s4959_s3 + $0x210] sm:$0xff] }
  0x6f   :  { %476 = vmatpush.msrb.mxu0 %v365_v58  ;;  %445 = vmatpush.msra.mxu2 %v318_v6  ;;  %v368_v35 = vld [vmem:[%s4959_s3 + $0x290] sm:$0xff]  ;;  %v351_v36 = vld [vmem:[%s4959_s3 + $0x208] sm:$0xff]  ;;  %v350_v38 = vld [vmem:[%s4959_s3 + $0x200] sm:$0xff] }
  0x70   :  { %499 = vmatpush.msrb.mxu1 %v381_v59  ;;  %468 = vmatpush.msra.mxu3 %v334_v7  ;;  %v367_v37 = vld [vmem:[%s4959_s3 + $0x288] sm:$0xff]  ;;  %v366_v39 = vld [vmem:[%s4959_s3 + $0x280] sm:$0xff]  ;;  %v284_v42 = vld [vmem:[%s4960_s13 + $0x50] sm:$0xff] }
  0x71   :  { %477 = vmatpush.msrb.mxu0 %v364_v62  ;;  %446 = vmatmul.f32.vlgmr.msra.gmra.mxu2 %v276_v10  ;;  %v278_v40 = vld [vmem:[%s4960_s13 + $0x20] sm:$0xff]  ;;  %v279_v41 = vld [vmem:[%s4960_s13 + $0x28] sm:$0xff]  ;;  %v285_v43 = vld [vmem:[%s4960_s13 + $0x58] sm:$0xff] }
  0x72   :  { %500 = vmatpush.msrb.mxu1 %v380_v63  ;;  %400 = vmatmul.f32.vlgmr.msra.gmra.mxu0 %v274_v11  ;;  %v382_v46 = vld [vmem:[#allocation3] sm:$0xff]  ;;  %v383_v52 = vld [vmem:[#allocation3 + $0x8] sm:$0xff] }
  0x73   :  { %478 = vmatpush.msrb.mxu0 %v363_v2  ;;  %469 = vmatmul.f32.vlgmr.msra.gmra.mxu3 %v277_v12  ;;  %v601_v11 = vld [vmem:[%s4938_s7 + $0x78] sm:$0xff] }
  0x74   :  { %501 = vmatpush.msrb.mxu1 %v379_v4  ;;  %v2913_v12 = vld [vmem:[%s4938_s7 + $0xf8] sm:$0xff]  ;;  %606 = vmatpush.msrb.mxu2 %v601_v11 }
  0x75   :  { %479 = vmatpush.msrb.mxu0 %v362_v3  ;;  %423 = vmatmul.f32.vlgmr.msra.gmra.mxu1 %v275_v13  ;;  %v2929_v13 = vld [vmem:[%s4938_s7 + $0x178] sm:$0xff] }
  0x76   :  { %502 = vmatpush.msrb.mxu1 %v378_v5  ;;  %651 = vmatpush.msrb.mxu3 %v2913_v12 }
  0x77   :  { %480 = vmatpush.msrb.mxu0 %v361_v8  ;;  %v3563_v8 = vmov 48.0  }
  0x78   :  { %503 = vmatpush.msrb.mxu1 %v377_v9  ;;  %3088 = vrcp.f32 %v3563_v8  ;;  %v586_v8 = vld [vmem:[%s4938_s7] sm:$0xff] }
  0x79   :  { %481 = vmatpush.msrb.mxu0 %v360_v14  ;;  %449 = vmatmul.f32.gmra.mxu2 %v282_v20  ;;  %v600_v14 = vld [vmem:[%s4938_s7 + $0x70] sm:$0xff] }
  0x7a   :  { %504 = vmatpush.msrb.mxu1 %v376_v16  ;;  %403 = vmatmul.f32.gmra.mxu0 %v280_v21  ;;  %v2928_v16 = vld [vmem:[%s4938_s7 + $0x170] sm:$0xff] }
  0x7b   :  { %482 = vmatpush.msrb.mxu0 %v359_v15  ;;  %472 = vmatmul.f32.gmra.mxu3 %v283_v24  ;;  %v2912_v15 = vld [vmem:[%s4938_s7 + $0xf0] sm:$0xff] }
  0x7c   :  { %505 = vmatpush.msrb.mxu1 %v375_v17  ;;  %607 = vmatpush.msrb.mxu2 %v600_v14 }
  0x7d   :  { %483 = vmatpush.msrb.mxu0 %v358_v18  ;;  %426 = vmatmul.f32.gmra.mxu1 %v281_v25 }
  0x7e   :  { %506 = vmatpush.msrb.mxu1 %v374_v19  ;;  %v3089_v9 = vpop.eup %3088  ;;  %652 = vmatpush.msrb.mxu3 %v2912_v15 }
  0x7f   :  { %484 = vmatpush.msrb.mxu0 %v357_v22  ;;  %v532_v10 = vmul.f32 48.0, %v3089_v9  ;;  %vm536_vm1 = vweird.f32 %v3089_v9 }
  0x80   :  { %507 = vmatpush.msrb.mxu1 %v373_v23 }
  0x81   :  { %485 = vmatpush.msrb.mxu0 %v356_v26  ;;  %v533_v17 = vsub.f32 1.0, %v532_v10  ;;  %v2914_v10 = vld [vmem:[%s4938_s7 + $0x100] sm:$0xff] }
  0x82   :  { %508 = vmatpush.msrb.mxu1 %v372_v27 }
  0x83   :  { %486 = vmatpush.msrb.mxu0 %v355_v28  ;;  %v534_v18 = vmul.f32 %v3089_v9, %v533_v17 }
  0x84   :  { %509 = vmatpush.msrb.mxu1 %v371_v29 }
  0x85   :  { %487 = vmatpush.msrb.mxu0 %v354_v30  ;;  %v535_v19 = vadd.f32 %v3089_v9, %v534_v18 }
  0x86   :  { %510 = vmatpush.msrb.mxu1 %v370_v31  ;;  %v599_v31 = vld [vmem:[%s4938_s7 + $0x68] sm:$0xff] }
  0x87   :  { %488 = vmatpush.msrb.mxu0 %v353_v32  ;;  %v4083_v20 = vsel %vm536_vm1, %v3089_v9, %v535_v19  ;;  %v2911_v32 = vld [vmem:[%s4938_s7 + $0xe8] sm:$0xff]  ;;  %608 = vmatpush.msrb.mxu2 %v599_v31  ;;  %v2898_v9 = vld [vmem:[%s4938_s7 + $0x80] sm:$0xff] }
  0x88   :  { %511 = vmatpush.msrb.mxu1 %v369_v33  ;;  %v2927_v33 = vld [vmem:[%s4938_s7 + $0x168] sm:$0xff]  ;;  %653 = vmatpush.msrb.mxu3 %v2911_v32  ;;  %v3068_v32 = vld [vmem:[#allocation7] ss:$0 sm:$0xff] }
  0x89   :  { %489 = vmatpush.msrb.mxu0 %v352_v34  ;;  %v598_v34 = vld [vmem:[%s4938_s7 + $0x60] sm:$0xff] }
  0x8a   :  { %512 = vmatpush.msrb.mxu1 %v368_v35  ;;  %v2910_v35 = vld [vmem:[%s4938_s7 + $0xe0] sm:$0xff]  ;;  %609 = vmatpush.msrb.mxu2 %v598_v34 }
  0x8b   :  { %490 = vmatpush.msrb.mxu0 %v351_v36  ;;  %v2926_v36 = vld [vmem:[%s4938_s7 + $0x160] sm:$0xff]  ;;  %654 = vmatpush.msrb.mxu3 %v2910_v35 }
  0x8c   :  { %513 = vmatpush.msrb.mxu1 %v367_v37  ;;  %v597_v37 = vld [vmem:[%s4938_s7 + $0x58] sm:$0xff] }
  0x8d   :  { %491 = vmatpush.msrb.mxu0 %v350_v38  ;;  %v2909_v38 = vld [vmem:[%s4938_s7 + $0xd8] sm:$0xff]  ;;  %610 = vmatpush.msrb.mxu2 %v597_v37 }
  0x8e   :  { %514 = vmatpush.msrb.mxu1 %v366_v39  ;;  %492 = vmatmul.f32.vlgmr.msrb.gmra.mxu0 %v278_v40  ;;  %v2925_v39 = vld [vmem:[%s4938_s7 + $0x158] sm:$0xff]  ;;  %v596_v40 = vld [vmem:[%s4938_s7 + $0x50] sm:$0xff] }
  0x8f   :  { %515 = vmatmul.f32.vlgmr.msrb.gmra.mxu1 %v279_v41  ;;  %696 = vmatpush.msra.mxu0 %v2929_v13  ;;  %v2908_v41 = vld [vmem:[%s4938_s7 + $0xd0] sm:$0xff] }
  0x90   :  { %655 = vmatpush.msrb.mxu3 %v2909_v38  ;;  %611 = vmatpush.msrb.mxu2 %v596_v40 }
  0x91   :  { %697 = vmatpush.msra.mxu0 %v2928_v16 }
  0x92   :  { %656 = vmatpush.msrb.mxu3 %v2908_v41 }
  0x93   :  { %698 = vmatpush.msra.mxu0 %v2927_v33 }
  0x95   :  { %699 = vmatpush.msra.mxu0 %v2926_v36 }
  0x96   :  { %495 = vmatmul.f32.gmra.mxu0 %v284_v42  ;;  %v2924_v42 = vld [vmem:[%s4938_s7 + $0x150] sm:$0xff] }
  0x97   :  { %518 = vmatmul.f32.gmra.mxu1 %v285_v43  ;;  %700 = vmatpush.msra.mxu0 %v2925_v39  ;;  %v595_v43 = vld [vmem:[%s4938_s7 + $0x48] sm:$0xff] }
  0x98   :  { %612 = vmatpush.msrb.mxu2 %v595_v43 }
  0x99   :  { %701 = vmatpush.msra.mxu0 %v2924_v42 }
  0xef   :  { %v401_v44 = vpop.f32.mrf.mxu0 }
  0xf0   :  { %v402_v47 = vadd.f32 %v401_v44, %v382_v46  ;;  %v2907_v44 = vld [vmem:[%s4938_s7 + $0xc8] sm:$0xff]  ;;  %v594_v46 = vld [vmem:[%s4938_s7 + $0x40] sm:$0xff] }
  0xf1   :  { %657 = vmatpush.msrb.mxu3 %v2907_v44  ;;  %613 = vmatpush.msrb.mxu2 %v594_v46  ;;  %v3071_v44 = vld [vmem:[#allocation11 + $0x1] ss:$0 sm:$0xff] }
  0xf2   :  { %v424_v45 = vpop.f32.mrf.mxu1 }
  0xf3   :  { %v425_v51 = vadd.f32 %v424_v45, %v402_v47  ;;  %v2923_v45 = vld [vmem:[%s4938_s7 + $0x148] sm:$0xff]  ;;  %v2906_v47 = vld [vmem:[%s4938_s7 + $0xc0] sm:$0xff] }
  0xf4   :  { %v447_v48 = vpop.f32.mrf.mxu2  ;;  %702 = vmatpush.msra.mxu0 %v2923_v45  ;;  %658 = vmatpush.msrb.mxu3 %v2906_v47  ;;  %v4234_v45 = vld [vmem:[#allocation11] ss:$0 sm:$0xff] }
  0xf5   :  { %v448_v54 = vadd.f32 %v447_v48, %v425_v51  ;;  %v2922_v48 = vld [vmem:[%s4938_s7 + $0x140] sm:$0xff]  ;;  %v2921_v51 = vld [vmem:[%s4938_s7 + $0x138] sm:$0xff] }
  0xf6   :  { %v470_v53 = vpop.f32.mrf.mxu3  ;;  %703 = vmatpush.msra.mxu0 %v2922_v48 }
  0xf7   :  { %v404_v49 = vpop.f32.mrf.mxu0  ;;  %v471_v56 = vadd.f32 %v470_v53, %v448_v54  ;;  %v2904_v53 = vld [vmem:[%s4938_s7 + $0xb0] sm:$0xff] }
  0xf8   :  { %v405_v55 = vadd.f32 %v404_v49, %v383_v52  ;;  %v593_v49 = vld [vmem:[%s4938_s7 + $0x38] sm:$0xff]  ;;  %704 = vmatpush.msra.mxu0 %v2921_v51  ;;  %v592_v52 = vld [vmem:[%s4938_s7 + $0x30] sm:$0xff] }
  0xf9   :  { %614 = vmatpush.msrb.mxu2 %v593_v49  ;;  %v2920_v54 = vld [vmem:[%s4938_s7 + $0x130] sm:$0xff] }
  0xfa   :  { %v427_v50 = vpop.f32.mrf.mxu1  ;;  %705 = vmatpush.msra.mxu0 %v2920_v54 }
  0xfb   :  { %v428_v57 = vadd.f32 %v427_v50, %v405_v55  ;;  %v2905_v50 = vld [vmem:[%s4938_s7 + $0xb8] sm:$0xff]  ;;  %615 = vmatpush.msrb.mxu2 %v592_v52  ;;  %v591_v55 = vld [vmem:[%s4938_s7 + $0x28] sm:$0xff] }
  0xfc   :  { %v450_v58 = vpop.f32.mrf.mxu2  ;;  %659 = vmatpush.msrb.mxu3 %v2905_v50 }
  0xfd   :  { %v451_v62 = vadd.f32 %v450_v58, %v428_v57  ;;  %v2919_v57 = vld [vmem:[%s4938_s7 + $0x128] sm:$0xff]  ;;  %616 = vmatpush.msrb.mxu2 %v591_v55  ;;  %v590_v58 = vld [vmem:[%s4938_s7 + $0x20] sm:$0xff] }
  0xfe   :  { %v473_v0 = vpop.f32.mrf.mxu3  ;;  %660 = vmatpush.msrb.mxu3 %v2904_v53  ;;  %706 = vmatpush.msra.mxu0 %v2919_v57 }
  0xff   :  { %v474_v2 = vadd.f32 %v473_v0, %v451_v62  ;;  %617 = vmatpush.msrb.mxu2 %v590_v58  ;;  %v2901_v62 = vld [vmem:[%s4938_s7 + $0x98] sm:$0xff] }
 0x100   :  { %v2917_v0 = vld [vmem:[%s4938_s7 + $0x118] sm:$0xff] }
 0x10b   :  { %v493_v59 = vpop.f32.mrf.mxu0 }
 0x10c   :  { %v516_v60 = vpop.f32.mrf.mxu1  ;;  %v494_v61 = vadd.f32 %v493_v59, %v471_v56  ;;  %v2903_v56 = vld [vmem:[%s4938_s7 + $0xa8] sm:$0xff]  ;;  %v2902_v59 = vld [vmem:[%s4938_s7 + $0xa0] sm:$0xff] }
 0x10d   :  { %661 = vmatpush.msrb.mxu3 %v2903_v56 }
 0x10e   :  { %v4057_v63 = vadd.f32 %v516_v60, %v494_v61  ;;  %v2918_v60 = vld [vmem:[%s4938_s7 + $0x120] sm:$0xff]  ;;  %v589_v61 = vld [vmem:[%s4938_s7 + $0x18] sm:$0xff] }
 0x10f   :  { %662 = vmatpush.msrb.mxu3 %v2902_v59  ;;  %707 = vmatpush.msra.mxu0 %v2918_v60 }
 0x110   :  { %v525_v1 = vsel %vm524_vm0, %v4057_v63, 0.0  ;;  %618 = vmatpush.msrb.mxu2 %v589_v61 }
 0x111   :  { %526 = vadd.xlane.f32.xlu0 %v525_v1  ;;  %663 = vmatpush.msrb.mxu3 %v2901_v62  ;;  %v588_v1 = vld [vmem:[%s4938_s7 + $0x10] sm:$0xff] }
 0x112   :  { %708 = vmatpush.msra.mxu0 %v2917_v0  ;;  %619 = vmatpush.msrb.mxu2 %v588_v1 }
 0x113   :  { %v496_v3 = vpop.f32.mrf.mxu0 }
 0x114   :  { %v519_v4 = vpop.f32.mrf.mxu1  ;;  %v497_v5 = vadd.f32 %v496_v3, %v474_v2  ;;  %v2900_v2 = vld [vmem:[%s4938_s7 + $0x90] sm:$0xff] }
 0x115   :  { %v2916_v3 = vld [vmem:[%s4938_s7 + $0x110] sm:$0xff]  ;;  %664 = vmatpush.msrb.mxu3 %v2900_v2 }
 0x116   :  { %v4061_v6 = vadd.f32 %v519_v4, %v497_v5  ;;  %709 = vmatpush.msra.mxu0 %v2916_v3  ;;  %v587_v4 = vld [vmem:[%s4938_s7 + $0x8] sm:$0xff] }
 0x117   :  { %v2899_v5 = vld [vmem:[%s4938_s7 + $0x88] sm:$0xff]  ;;  %620 = vmatpush.msrb.mxu2 %v587_v4 }
 0x118   :  { %v528_v7 = vsel %vm524_vm0, %v4061_v6, 0.0  ;;  %665 = vmatpush.msrb.mxu3 %v2899_v5 }
 0x119   :  { %529 = vadd.xlane.f32.xlu2 %v528_v7  ;;  %v2915_v7 = vld [vmem:[%s4938_s7 + $0x108] sm:$0xff]  ;;  %621 = vmatpush.msrb.mxu2 %v586_v8 }
 0x11a   :  { %710 = vmatpush.msra.mxu0 %v2915_v7  ;;  %666 = vmatpush.msrb.mxu3 %v2898_v9 }
 0x11c   :  { %711 = vmatpush.msra.mxu0 %v2914_v10 }
 0x184   :  { %v527_v21 = vpop.xlane.xlu0 %526 }
 0x185   :  { %v538_v22 = vmul.f32 %v4083_v20, %v527_v21 }
 0x187   :  { %v4087_v23 = vsub.f32 %v4057_v63, %v538_v22 }
 0x189   :  { %v542_v24 = vmul.f32 %v4087_v23, %v4087_v23 }
 0x18b   :  { %v544_v25 = vsel %vm524_vm0, %v542_v24, 0.0 }
 0x18c   :  { %v530_v26 = vpop.xlane.xlu2 %529  ;;  %545 = vadd.xlane.f32.xlu0 %v544_v25 }
 0x18d   :  { %v539_v27 = vmul.f32 %v4083_v20, %v530_v26 }
 0x18f   :  { %v4094_v28 = vsub.f32 %v4061_v6, %v539_v27  ;;  %v3067_v27 = vld [vmem:[#allocation5] ss:$0 sm:$0xff] }
 0x191   :  { %v543_v29 = vmul.f32 %v4094_v28, %v4094_v28 }
 0x193   :  { %v547_v30 = vsel %vm524_vm0, %v543_v29, 0.0 }
 0x194   :  { %548 = vadd.xlane.f32.xlu2 %v547_v30 }
 0x1ff   :  { %v546_v11 = vpop.xlane.xlu0 %545 }
 0x200   :  { %v550_v12 = vmul.f32 %v546_v11, %v4083_v20 }
 0x202   :  { %v552_v13 = vadd.f32 1e-06, %v550_v12 }
 0x204   :  { %3090 = vrsqrt.f32 %v552_v13  ;;  %vm560_vm3 = vweird.f32 %v552_v13 }
 0x207   :  { %v549_v14 = vpop.xlane.xlu2 %548 }
 0x208   :  { %v551_v15 = vmul.f32 %v549_v14, %v4083_v20 }
 0x20a   :  { %v3091_v16 = vpop.eup %3090  ;;  %v553_v17 = vadd.f32 1e-06, %v551_v15 }
 0x20b   :  { %v555_v18 = vmul.f32 %v3091_v16, %v552_v13  ;;  %vm561_vm2 = vweird.f32 %v3091_v16 }
 0x20c   :  { %3092 = vrsqrt.f32 %v553_v17  ;;  %vm562_vm4 = vmor %vm560_vm3, %vm561_vm2  ;;  %vm570_vm6 = vweird.f32 %v553_v17 }
 0x20d   :  { %v556_v19 = vmul.f32 %v3091_v16, %v555_v18 }
 0x20f   :  { %v557_v21 = vmul.f32 0.5, %v556_v19 }
 0x211   :  { %v558_v22 = vsub.f32 1.5, %v557_v21 }
 0x212   :  { %v3093_v24 = vpop.eup %3092 }
 0x213   :  { %v559_v25 = vmul.f32 %v3091_v16, %v558_v22  ;;  %v565_v26 = vmul.f32 %v3093_v24, %v553_v17  ;;  %vm571_vm5 = vweird.f32 %v3093_v24 }
 0x214   :  { %vm572_vm7 = vmor %vm570_vm6, %vm571_vm5  ;;  %vm802_vm5 = vcmask 126976  }
 0x215   :  { %v563_v29 = vsel %vm562_vm4, %v3091_v16, %v559_v25  ;;  %v566_v30 = vmul.f32 %v3093_v24, %v565_v26 }
 0x216   :  { %v574_v31 = vmul.f32 %v563_v29, %v4087_v23  ;;  %v4229_v23 = vld [vmem:[#allocation11 + $0x2] ss:$0 sm:$0xff] }
 0x217   :  { %v567_v33 = vmul.f32 0.5, %v566_v30 }
 0x218   :  { %v579_v34 = vmul.f32 %v3067_v27, %v574_v31 }
 0x219   :  { %v568_v35 = vsub.f32 1.5, %v567_v33 }
 0x21a   :  { %v584_v36 = vadd.f32 %v3068_v32, %v579_v34 }
 0x21b   :  { %v569_v37 = vmul.f32 %v3093_v24, %v568_v35 }
 0x21c   :  { %622 = vmatmul.f32.vlgmr.msrb.gmra.mxu2 %v584_v36  ;;  %667 = vmatmul.f32.vlgmr.msrb.gmra.mxu3 %v584_v36 }
 0x21d   :  { %v573_v38 = vsel %vm572_vm7, %v3093_v24, %v569_v37  ;;  %712 = vmatmul.f32.vlgmr.msra.gmra.mxu0 %v584_v36  ;;  %v3566_v24 = vmov 0.0  }
 0x21e   :  { %v575_v39 = vmul.f32 %v573_v38, %v4094_v28  ;;  %719 = vst [vmem:[#allocation2] sm:$0xff] %v3566_v24 }
 0x21f   :  { %720 = vst [vmem:[#allocation2 + $0x8] sm:$0xff] %v3566_v24 }
 0x220   :  { %v580_v40 = vmul.f32 %v3067_v27, %v575_v39 }
 0x222   :  { %v585_v41 = vadd.f32 %v3068_v32, %v580_v40 }
 0x224   :  { %625 = vmatmul.f32.gmra.mxu2 %v585_v41  ;;  %670 = vmatmul.f32.gmra.mxu3 %v585_v41 }
 0x225   :  { %715 = vmatmul.f32.gmra.mxu0 %v585_v41 }
 0x29a   :  { %v713_v42 = vpop.f32.mrf.mxu0 }
 0x29b   :  { %v714_v43 = vadd.f32 %v4229_v23, %v713_v42 }
 0x29d   :  { %857 = vrot.lane.b32.xlu2 %v714_v43, %s3564_s6  ;;  %2932 = vmatpush.msk.msra.mxu2 %vm778_vm8, %v714_v43 }
 0x29f   :  { %v668_v28 = vpop.f32.mrf.mxu3  ;;  %v623_v46 = vpop.f32.mrf.mxu2 }
 0x2a0   :  { %v4236_v47 = vadd.f32 %v3071_v44, %v668_v28  ;;  %v624_v48 = vadd.f32 %v4234_v45, %v623_v46 }
 0x2a2   :  { %806 = vrot.lane.b32.xlu1 %v4236_v47, %s3564_s6  ;;  %2930 = vmatpush.xpose.msk.msra.mxu1 %vm721_vm9, %v4236_v47  ;;  %v716_v35 = vpop.f32.mrf.mxu0 }
 0x2a3   :  { %v4268_v39 = vadd.f32 %v4229_v23, %v716_v35 }
 0x2a5   :  { %2931 = vmatmul.msk.f32.vlgmr.msra.gmra.mxu1 %vm721_vm9, %v624_v48 }
 0x2a7   :  { %v671_v51 = vpop.f32.mrf.mxu3  ;;  %v626_v42 = vpop.f32.mrf.mxu2 }
 0x2a8   :  { %v4247_v52 = vadd.f32 %v3071_v44, %v671_v51 }
 0x2aa   :  { %804 = vrot.lane.b32.xlu1 %v624_v48, %s3564_s6 }
 0x2f7   :  { %v858_v50 = vpop.permute.xlu2 %857 }
 0x314   :  { %v807_v49 = vpop.permute.xlu1 %806 }
 0x315   :  { %2934 = vmatpush.xpose.msk.msrb.mxu1 %vm721_vm9, %v807_v49 }
 0x319   :  { %2936 = vmatpush.msk.msra.mxu1 %vm778_vm8, %v858_v50 }
 0x31c   :  { %v805_v53 = vpop.permute.xlu1 %804 }
 0x31d   :  { %2935 = vmatmul.msk.f32.vlgmr.msrb.gmra.mxu1 %vm721_vm9, %v805_v53 }
 0x31e   :  { %2942 = vmatpush.xpose.msk.msrb.mxu1 %vm721_vm9, %v4247_v52 }
 0x322   :  { %v745_v54 = vpop.f32.mrf.mxu1 }
 0x323   :  { %v748_v55 = vmul.f32 0.25, %v745_v54 }
 0x325   :  { %v750_v56 = vsel %vm749_vm10, %v748_v55, -inf }
 0x326   :  { %751 = vmax.xlane.f32.xlu0 %v750_v56 }
 0x399   :  { %v752_v57 = vpop.xlane.xlu0 %751 }
 0x39a   :  { %v753_v58 = vsub.f32 %v748_v55, %v752_v57  ;;  %v829_v59 = vpop.f32.mrf.mxu1 }
 0x39b   :  { %v832_v60 = vmul.f32 0.25, %v829_v59 }
 0x39c   :  { %v754_v61 = vmul.f32 1.442695, %v753_v58 }
 0x39d   :  { %v833_v62 = vsel %vm749_vm10, %v832_v60, -inf }
 0x39e   :  { %3094 = vpow2.f32 %v754_v61  ;;  %834 = vmax.xlane.f32.xlu1 %v833_v62 }
 0x3a4   :  { %v3095_v0 = vpop.eup %3094 }
 0x3a5   :  { %v756_v1 = vsel %vm749_vm10, %v3095_v0, 0.0 }
 0x3a6   :  { %757 = vadd.xlane.f32.xlu2 %v756_v1 }
 0x3b7   :  { %943 = vrot.lane.b32.xlu1 %v714_v43, %s3565_s16  ;;  %v627_v43 = vadd.f32 %v4234_v45, %v626_v42 }
 0x3be   :  { %890 = vrot.lane.b32.xlu2 %v624_v48, %s3565_s16 }
 0x3bf   :  { %1056 = vrot.lane.b32.xlu1 %v4247_v52, %s3564_s6 }
 0x411   :  { %v835_v2 = vpop.xlane.xlu1 %834 }
 0x412   :  { %v836_v3 = vsub.f32 %v832_v60, %v835_v2 }
 0x414   :  { %v837_v4 = vmul.f32 1.442695, %v836_v3 }
 0x416   :  { %3096 = vpow2.f32 %v837_v4 }
 0x419   :  { %v758_v5 = vpop.xlane.xlu2 %757 }
 0x41a   :  { %3098 = vrcp.f32 %v758_v5  ;;  %v770_v12 = vand.u32 2147483648, %v758_v5  ;;  %v768_v14 = vand.u32 2147483647, %v758_v5  ;;  %vm764_vm12 = vweird.f32 %v758_v5 }
 0x41c   :  { %v3097_v7 = vpop.eup %3096  ;;  %v771_v16 = vor.u32 1.1754944e-38, %v770_v12  ;;  %vm769_vm14 = vcmp.eq.f32.partialorder %v768_v14, 8.507059e+37 }
 0x41d   :  { %v839_v8 = vsel %vm749_vm10, %v3097_v7, 0.0 }
 0x41e   :  { %840 = vadd.xlane.f32.xlu0 %v839_v8 }
 0x420   :  { %v3099_v9 = vpop.eup %3098 }
 0x421   :  { %v760_v10 = vmul.f32 %v3099_v9, %v758_v5  ;;  %vm765_vm11 = vweird.f32 %v3099_v9  ;;  %v891_v41 = vpop.permute.xlu2 %890 }
 0x422   :  { %vm766_vm13 = vmor %vm764_vm12, %vm765_vm11 }
 0x423   :  { %v761_v11 = vsub.f32 1.0, %v760_v10 }
 0x425   :  { %v762_v13 = vmul.f32 %v3099_v9, %v761_v11 }
 0x427   :  { %v763_v15 = vadd.f32 %v3099_v9, %v762_v13 }
 0x429   :  { %v767_v17 = vsel %vm766_vm13, %v3099_v9, %v763_v15  ;;  %v944_v18 = vpop.permute.xlu1 %943 }
 0x42a   :  { %v772_v19 = vsel %vm769_vm14, %v771_v16, %v767_v17  ;;  %2940 = vmatpush.msk.msra.mxu3 %vm778_vm8, %v944_v18 }
 0x42b   :  { %v773_v21 = vmul.f32 %v3095_v0, %v772_v19 }
 0x42d   :  { %2933 = vmatmul.msk.f32.vlgmr.msra.gmra.mxu2 %vm774_vm15, %v773_v21 }
 0x431   :  { %v1057_v22 = vpop.permute.xlu1 %1056 }
 0x432   :  { %2946 = vmatpush.xpose.msk.msrb.mxu3 %vm721_vm9, %v1057_v22  ;;  %892 = vrot.lane.b32.xlu0 %v4236_v47, %s3565_s16 }
 0x491   :  { %v841_v25 = vpop.xlane.xlu0 %840 }
 0x492   :  { %3100 = vrcp.f32 %v841_v25  ;;  %v853_v30 = vand.u32 2147483648, %v841_v25  ;;  %v851_v32 = vand.u32 2147483647, %v841_v25  ;;  %vm847_vm2 = vweird.f32 %v841_v25 }
 0x494   :  { %v854_v34 = vor.u32 1.1754944e-38, %v853_v30  ;;  %vm852_vm4 = vcmp.eq.f32.partialorder %v851_v32, 8.507059e+37 }
 0x498   :  { %v3101_v26 = vpop.eup %3100 }
 0x499   :  { %v843_v27 = vmul.f32 %v3101_v26, %v841_v25  ;;  %vm848_vm1 = vweird.f32 %v3101_v26 }
 0x49a   :  { %vm849_vm3 = vmor %vm847_vm2, %vm848_vm1 }
 0x49b   :  { %v844_v29 = vsub.f32 1.0, %v843_v27 }
 0x49d   :  { %v845_v31 = vmul.f32 %v3101_v26, %v844_v29 }
 0x49f   :  { %v846_v33 = vadd.f32 %v3101_v26, %v845_v31 }
 0x4a1   :  { %v850_v36 = vsel %vm849_vm3, %v3101_v26, %v846_v33 }
 0x4a2   :  { %v855_v37 = vsel %vm852_vm4, %v854_v34, %v850_v36 }
 0x4a3   :  { %v856_v38 = vmul.f32 %v3097_v7, %v855_v37 }
 0x4a4   :  { %v893_v40 = vpop.permute.xlu0 %892 }
 0x4a5   :  { %2937 = vmatmul.msk.f32.vlgmr.msra.gmra.mxu1 %vm774_vm15, %v856_v38  ;;  %2938 = vmatpush.xpose.msk.msrb.mxu2 %vm721_vm9, %v893_v40 }
 0x4a8   :  { %2939 = vmatmul.msk.f32.vlgmr.msrb.gmra.mxu2 %vm721_vm9, %v891_v41 }
 0x4a9   :  { %2944 = vmatpush.msk.msra.mxu2 %vm778_vm8, %v4268_v39 }
 0x4ad   :  { %2943 = vmatmul.msk.f32.vlgmr.msrb.gmra.mxu1 %vm721_vm9, %v627_v43 }
 0x4b0   :  { %v799_v44 = vpop.f32.mrf.mxu2 }
 0x4b1   :  { %803 = vst.msk [vmem:[#allocation2] sm:$0x1f] %vm802_vm5, %v799_v44  ;;  %v1241_v44 = vld [vmem:[%s4940_s9 + $0x78] sm:$0xff] }
 0x4b2   :  { %1246 = vmatpush.msrb.mxu0 %v1241_v44 }
 0x522   :  { %v4278_v23 = vpop.f32.mrf.mxu1 }
 0x52a   :  { %v999_v28 = vpop.f32.mrf.mxu1 }
 0x52b   :  { %v1002_v46 = vmul.f32 0.25, %v999_v28  ;;  %v915_v47 = vpop.f32.mrf.mxu2  ;;  %v1240_v28 = vld [vmem:[%s4940_s9 + $0x70] sm:$0xff] }
 0x52c   :  { %v918_v48 = vmul.f32 0.25, %v915_v47  ;;  %1247 = vmatpush.msrb.mxu0 %v1240_v28 }
 0x52d   :  { %v1003_v49 = vsel %vm749_vm10, %v1002_v46, -inf }
 0x52e   :  { %1004 = vmax.xlane.f32.xlu0 %v1003_v49  ;;  %v919_v50 = vsel %vm749_vm10, %v918_v48, -inf }
 0x52f   :  { %920 = vmax.xlane.f32.xlu2 %v919_v50 }
 0x542   :  { %1141 = vrot.lane.b32.xlu0 %v4247_v52, %s3565_s16 }
 0x547   :  { %1139 = vrot.lane.b32.xlu2 %v627_v43, %s3565_s16 }
 0x5a1   :  { %v1005_v45 = vpop.xlane.xlu0 %1004 }
 0x5a2   :  { %v921_v51 = vpop.xlane.xlu2 %920  ;;  %v1006_v54 = vsub.f32 %v1002_v46, %v1005_v45  ;;  %v1239_v45 = vld [vmem:[%s4940_s9 + $0x68] sm:$0xff] }
 0x5a3   :  { %v922_v53 = vsub.f32 %v918_v48, %v921_v51  ;;  %1248 = vmatpush.msrb.mxu0 %v1239_v45  ;;  %v1238_v51 = vld [vmem:[%s4940_s9 + $0x60] sm:$0xff]  ;;  %v1354_v45 = vld [vmem:[#allocation14 + $0xd8] sm:$0xff] }
 0x5a4   :  { %v1007_v56 = vmul.f32 1.442695, %v1006_v54  ;;  %v1234_v54 = vld [vmem:[%s4940_s9 + $0x40] sm:$0xff] }
 0x5a5   :  { %v923_v55 = vmul.f32 1.442695, %v922_v53  ;;  %1249 = vmatpush.msrb.mxu0 %v1238_v51  ;;  %v1237_v53 = vld [vmem:[%s4940_s9 + $0x58] sm:$0xff]  ;;  %v1351_v51 = vld [vmem:[#allocation14 + $0xc0] sm:$0xff] }
 0x5a7   :  { %3102 = vpow2.f32 %v923_v55  ;;  %1250 = vmatpush.msrb.mxu0 %v1237_v53  ;;  %v1233_v55 = vld [vmem:[%s4940_s9 + $0x38] sm:$0xff] }
 0x5a8   :  { %3104 = vpow2.f32 %v1007_v56  ;;  %v1232_v56 = vld [vmem:[%s4940_s9 + $0x30] sm:$0xff]  ;;  %v1352_v53 = vld [vmem:[#allocation14 + $0xc8] sm:$0xff] }
 0x5aa   :  { %v1140_v27 = vpop.permute.xlu2 %1139 }
 0x5ad   :  { %v3103_v57 = vpop.eup %3102 }
 0x5ae   :  { %v925_v58 = vsel %vm749_vm10, %v3103_v57, 0.0  ;;  %v3105_v59 = vpop.eup %3104 }
 0x5af   :  { %926 = vadd.xlane.f32.xlu1 %v925_v58  ;;  %v1009_v52 = vsel %vm749_vm10, %v3105_v59, 0.0  ;;  %v1230_v58 = vld [vmem:[%s4940_s9 + $0x20] sm:$0xff] }
 0x5b4   :  { %v1142_v60 = vpop.permute.xlu0 %1141 }
 0x5b5   :  { %2950 = vmatpush.xpose.msk.msrb.mxu2 %vm721_vm9, %v1142_v60  ;;  %v1228_v60 = vld [vmem:[%s4940_s9 + $0x10] sm:$0xff] }
 0x5b7   :  { %1010 = vadd.xlane.f32.xlu1 %v1009_v52  ;;  %v1227_v52 = vld [vmem:[%s4940_s9 + $0x8] sm:$0xff] }
 0x5d0   :  { %1054 = vrot.lane.b32.xlu1 %v627_v43, %s3564_s6 }
 0x622   :  { %v927_v61 = vpop.xlane.xlu1 %926 }
 0x623   :  { %3106 = vrcp.f32 %v927_v61  ;;  %v939_v3 = vand.u32 2147483648, %v927_v61  ;;  %v937_v5 = vand.u32 2147483647, %v927_v61  ;;  %vm933_vm7 = vweird.f32 %v927_v61 }
 0x625   :  { %v940_v9 = vor.u32 1.1754944e-38, %v939_v3  ;;  %vm938_vm12 = vcmp.eq.f32.partialorder %v937_v5, 8.507059e+37 }
 0x629   :  { %v3107_v62 = vpop.eup %3106 }
 0x62a   :  { %v929_v0 = vmul.f32 %v3107_v62, %v927_v61  ;;  %v1011_v1 = vpop.xlane.xlu1 %1010  ;;  %vm934_vm6 = vweird.f32 %v3107_v62  ;;  %v1226_v61 = vld [vmem:[%s4940_s9] sm:$0xff] }
 0x62b   :  { %3108 = vrcp.f32 %v1011_v1  ;;  %vm935_vm11 = vmor %vm933_vm7, %vm934_vm6  ;;  %v1023_v15 = vand.u32 2147483648, %v1011_v1  ;;  %v1021_v17 = vand.u32 2147483647, %v1011_v1  ;;  %vm1017_vm14 = vweird.f32 %v1011_v1 }
 0x62c   :  { %v930_v2 = vsub.f32 1.0, %v929_v0 }
 0x62d   :  { %v1024_v19 = vor.u32 1.1754944e-38, %v1023_v15  ;;  %vm1022_vm2 = vcmp.eq.f32.partialorder %v1021_v17, 8.507059e+37 }
 0x62e   :  { %v931_v4 = vmul.f32 %v3107_v62, %v930_v2 }
 0x630   :  { %v932_v7 = vadd.f32 %v3107_v62, %v931_v4 }
 0x631   :  { %v3109_v8 = vpop.eup %3108 }
 0x632   :  { %v936_v10 = vsel %vm935_vm11, %v3107_v62, %v932_v7  ;;  %v1013_v11 = vmul.f32 %v3109_v8, %v1011_v1  ;;  %vm1018_vm13 = vweird.f32 %v3109_v8 }
 0x633   :  { %v941_v12 = vsel %vm938_vm12, %v940_v9, %v936_v10  ;;  %vm1019_vm1 = vmor %vm1017_vm14, %vm1018_vm13  ;;  %vm888_vm13 = vcmask 258176  }
 0x634   :  { %v1014_v13 = vsub.f32 1.0, %v1013_v11  ;;  %v942_v14 = vmul.f32 %v3103_v57, %v941_v12  ;;  %v1231_v57 = vld [vmem:[%s4940_s9 + $0x28] sm:$0xff] }
 0x636   :  { %v1015_v16 = vmul.f32 %v3109_v8, %v1014_v13  ;;  %2941 = vmatmul.msk.f32.vlgmr.msra.gmra.mxu3 %vm774_vm15, %v942_v14 }
 0x638   :  { %v1016_v18 = vadd.f32 %v3109_v8, %v1015_v16 }
 0x63a   :  { %v1020_v21 = vsel %vm1019_vm1, %v3109_v8, %v1016_v18  ;;  %vm974_vm1 = vcmask 389376  }
 0x63b   :  { %v1025_v22 = vsel %vm1022_vm2, %v1024_v19, %v1020_v21 }
 0x63c   :  { %v1026_v25 = vmul.f32 %v3105_v59, %v1025_v22  ;;  %v1229_v59 = vld [vmem:[%s4940_s9 + $0x18] sm:$0xff] }
 0x63e   :  { %2945 = vmatmul.msk.f32.vlgmr.msra.gmra.mxu2 %vm774_vm15, %v1026_v25 }
 0x642   :  { %v1055_v26 = vpop.permute.xlu1 %1054 }
 0x643   :  { %2947 = vmatmul.msk.f32.vlgmr.msrb.gmra.mxu3 %vm721_vm9, %v1055_v26 }
 0x646   :  { %2951 = vmatmul.msk.f32.vlgmr.msrb.gmra.mxu2 %vm721_vm9, %v1140_v27 }
 0x6b9   :  { %v967_v29 = vpop.f32.mrf.mxu3 }
 0x6c1   :  { %v1050_v30 = vpop.f32.mrf.mxu2 }
 0x6c2   :  { %1053 = vst.msk [vmem:[#allocation2 + $0x8] sm:$0x1f] %vm802_vm5, %v1050_v30 }
 0x6c6   :  { %v1079_v31 = vpop.f32.mrf.mxu3 }
 0x6c7   :  { %v1082_v32 = vmul.f32 0.25, %v1079_v31 }
 0x6c9   :  { %v1164_v33 = vpop.f32.mrf.mxu2  ;;  %v1083_v34 = vsel %vm749_vm10, %v1082_v32, -inf }
 0x6ca   :  { %v1167_v35 = vmul.f32 0.25, %v1164_v33  ;;  %1084 = vmax.xlane.f32.xlu1 %v1083_v34  ;;  %v4369_v33 = vld [vmem:[#allocation13] ss:$0 sm:$0xff] }
 0x6cc   :  { %v1168_v36 = vsel %vm749_vm10, %v1167_v35, -inf }
 0x6cd   :  { %1169 = vmax.xlane.f32.xlu0 %v1168_v36 }
 0x6e3   :  { %1192 = vrot.lane.b32.xlu1 %v4268_v39, %s3565_s16 }
 0x6eb   :  { %971 = vrot.lane.b32.xlu1 %v967_v29, %s3558_s23 }
 0x73d   :  { %v1085_v37 = vpop.xlane.xlu1 %1084 }
 0x73e   :  { %v1086_v38 = vsub.f32 %v1082_v32, %v1085_v37 }
 0x740   :  { %v1087_v40 = vmul.f32 1.442695, %v1086_v38  ;;  %v1170_v41 = vpop.xlane.xlu0 %1169 }
 0x741   :  { %v1171_v42 = vsub.f32 %v1167_v35, %v1170_v41 }
 0x742   :  { %3110 = vpow2.f32 %v1087_v40 }
 0x743   :  { %v1172_v43 = vmul.f32 1.442695, %v1171_v42 }
 0x745   :  { %3112 = vpow2.f32 %v1172_v43 }
 0x748   :  { %v4305_v46 = vpop.eup %3110 }
 0x749   :  { %v1089_v47 = vsel %vm749_vm10, %v4305_v46, 0.0 }
 0x74a   :  { %1090 = vadd.xlane.f32.xlu0 %v1089_v47  ;;  %v1357_v47 = vld [vmem:[#allocation14 + $0xf0] sm:$0xff] }
 0x74b   :  { %v4309_v48 = vpop.eup %3112 }
 0x74c   :  { %v1174_v49 = vsel %vm749_vm10, %v4309_v48, 0.0 }
 0x74d   :  { %1175 = vadd.xlane.f32.xlu2 %v1174_v49  ;;  %v1355_v49 = vld [vmem:[#allocation14 + $0xe0] sm:$0xff] }
 0x755   :  { %v1193_v50 = vpop.permute.xlu1 %1192 }
 0x756   :  { %2952 = vmatpush.msk.msra.mxu3 %vm778_vm8, %v1193_v50  ;;  %v1356_v50 = vld [vmem:[#allocation14 + $0xe8] sm:$0xff] }
 0x75d   :  { %v972_v27 = vpop.permute.xlu1 %971 }
 0x75e   :  { %885 = vrot.lane.b32.xlu0 %v4278_v23, %s3543_s25  ;;  %v1236_v23 = vld [vmem:[%s4940_s9 + $0x50] sm:$0xff] }
 0x75f   :  { %1251 = vmatpush.msrb.mxu0 %v1236_v23  ;;  %v1349_v23 = vld [vmem:[#allocation14 + $0xb0] sm:$0xff] }
 0x765   :  { %1107 = vrot.lane.b32.xlu2 %v4268_v39, %s3564_s6  ;;  %v1235_v39 = vld [vmem:[%s4940_s9 + $0x48] sm:$0xff] }
 0x766   :  { %1252 = vmatpush.msrb.mxu0 %v1235_v39  ;;  %v1350_v39 = vld [vmem:[#allocation14 + $0xb8] sm:$0xff] }
 0x768   :  { %1253 = vmatpush.msrb.mxu0 %v1234_v54  ;;  %v1347_v54 = vld [vmem:[#allocation14 + $0xa0] sm:$0xff] }
 0x76a   :  { %1254 = vmatpush.msrb.mxu0 %v1233_v55  ;;  %v1348_v55 = vld [vmem:[#allocation14 + $0xa8] sm:$0xff] }
 0x76c   :  { %1255 = vmatpush.msrb.mxu0 %v1232_v56  ;;  %v1345_v56 = vld [vmem:[#allocation14 + $0x90] sm:$0xff] }
 0x76e   :  { %1256 = vmatpush.msrb.mxu0 %v1231_v57  ;;  %v1346_v57 = vld [vmem:[#allocation14 + $0x98] sm:$0xff] }
 0x770   :  { %1257 = vmatpush.msrb.mxu0 %v1230_v58  ;;  %v1343_v58 = vld [vmem:[#allocation14 + $0x80] sm:$0xff] }
 0x772   :  { %1258 = vmatpush.msrb.mxu0 %v1229_v59  ;;  %v1344_v59 = vld [vmem:[#allocation14 + $0x88] sm:$0xff] }
 0x774   :  { %1259 = vmatpush.msrb.mxu0 %v1228_v60  ;;  %v1341_v60 = vld [vmem:[#allocation14 + $0x70] sm:$0xff] }
 0x776   :  { %1260 = vmatpush.msrb.mxu0 %v1227_v52  ;;  %v1342_v52 = vld [vmem:[#allocation14 + $0x78] sm:$0xff] }
 0x778   :  { %1261 = vmatpush.msrb.mxu0 %v1226_v61  ;;  %v1339_v61 = vld [vmem:[#allocation14 + $0x60] sm:$0xff] }
 0x7bd   :  { %v1091_v62 = vpop.xlane.xlu0 %1090 }
 0x7be   :  { %3114 = vrcp.f32 %v1091_v62  ;;  %v1103_v5 = vand.u32 2147483648, %v1091_v62  ;;  %v1101_v10 = vand.u32 2147483647, %v1091_v62  ;;  %vm1097_vm4 = vweird.f32 %v1091_v62 }
 0x7c0   :  { %v1176_v0 = vpop.xlane.xlu2 %1175  ;;  %v1104_v14 = vor.u32 1.1754944e-38, %v1103_v5  ;;  %vm1102_vm11 = vcmp.eq.f32.partialorder %v1101_v10, 8.507059e+37  ;;  %v1334_v5 = vld [vmem:[#allocation14 + $0x38] sm:$0xff] }
 0x7c1   :  { %3116 = vrcp.f32 %v1176_v0  ;;  %v1188_v13 = vand.u32 2147483648, %v1176_v0  ;;  %v1186_v16 = vand.u32 2147483647, %v1176_v0  ;;  %vm1182_vm12 = vweird.f32 %v1176_v0  ;;  %v1330_v10 = vld [vmem:[#allocation14 + $0x18] sm:$0xff] }
 0x7c3   :  { %v1189_v21 = vor.u32 1.1754944e-38, %v1188_v13  ;;  %vm1187_vm2 = vcmp.eq.f32.partialorder %v1186_v16, 8.507059e+37 }
 0x7c4   :  { %v3115_v1 = vpop.eup %3114 }
 0x7c5   :  { %v1093_v2 = vmul.f32 %v3115_v1, %v1091_v62  ;;  %vm1098_vm3 = vweird.f32 %v3115_v1  ;;  %v1340_v62 = vld [vmem:[#allocation14 + $0x68] sm:$0xff] }
 0x7c6   :  { %vm1099_vm6 = vmor %vm1097_vm4, %vm1098_vm3 }
 0x7c7   :  { %v3117_v3 = vpop.eup %3116  ;;  %v1094_v4 = vsub.f32 1.0, %v1093_v2  ;;  %v1335_v2 = vld [vmem:[#allocation14 + $0x40] sm:$0xff] }
 0x7c8   :  { %v1178_v7 = vmul.f32 %v3117_v3, %v1176_v0  ;;  %v1108_v8 = vpop.permute.xlu2 %1107  ;;  %vm1183_vm7 = vweird.f32 %v3117_v3  ;;  %v1337_v0 = vld [vmem:[#allocation14 + $0x50] sm:$0xff] }
 0x7c9   :  { %v1095_v9 = vmul.f32 %v3115_v1, %v1094_v4  ;;  %2948 = vmatpush.msk.msra.mxu1 %vm778_vm8, %v1108_v8  ;;  %vm1184_vm14 = vmor %vm1182_vm12, %vm1183_vm7  ;;  %v1333_v4 = vld [vmem:[#allocation14 + $0x30] sm:$0xff]  ;;  %v1332_v8 = vld [vmem:[#allocation14 + $0x28] sm:$0xff] }
 0x7ca   :  { %v1179_v11 = vsub.f32 1.0, %v1178_v7  ;;  %v1331_v7 = vld [vmem:[#allocation14 + $0x20] sm:$0xff] }
 0x7cb   :  { %v1096_v12 = vadd.f32 %v3115_v1, %v1095_v9  ;;  %1365 = vmatpush.msrb.mxu1 %v1357_v47  ;;  %v1329_v9 = vld [vmem:[#allocation14 + $0x10] sm:$0xff] }
 0x7cc   :  { %v1180_v15 = vmul.f32 %v3117_v3, %v1179_v11  ;;  %v1327_v11 = vld [vmem:[#allocation14] sm:$0xff] }
 0x7cd   :  { %v1100_v17 = vsel %vm1099_vm6, %v3115_v1, %v1096_v12  ;;  %1366 = vmatpush.msrb.mxu1 %v1355_v49  ;;  %v1338_v1 = vld [vmem:[#allocation14 + $0x58] sm:$0xff]  ;;  %v1328_v12 = vld [vmem:[#allocation14 + $0x8] sm:$0xff] }
 0x7ce   :  { %v1105_v18 = vsel %vm1102_vm11, %v1104_v14, %v1100_v17  ;;  %v1181_v19 = vadd.f32 %v3117_v3, %v1180_v15  ;;  %v1602_v49 = vld [vmem:[#allocation17 + $0xf8] sm:$0xff] }
 0x7cf   :  { %v1106_v22 = vmul.f32 %v4305_v46, %v1105_v18  ;;  %1630 = vmatpush.msra.mxu0 %v1602_v49  ;;  %v1588_v49 = vld [vmem:[#allocation17 + $0x88] sm:$0xff] }
 0x7d0   :  { %v1185_v25 = vsel %vm1184_vm14, %v3117_v3, %v1181_v19  ;;  %v886_v26 = vpop.permute.xlu0 %885  ;;  %v1336_v3 = vld [vmem:[#allocation14 + $0x48] sm:$0xff] }
 0x7d1   :  { %v1190_v29 = vsel %vm1187_vm2, %v1189_v21, %v1185_v25  ;;  %889 = vst.msk [vmem:[#allocation2] sm:$0x1f] %vm888_vm13, %v886_v26  ;;  %2949 = vmatmul.msk.f32.vlgmr.msra.gmra.mxu1 %vm774_vm15, %v1106_v22 }
 0x7d2   :  { %975 = vst.msk [vmem:[#allocation2] sm:$0x1f] %vm974_vm1, %v972_v27  ;;  %v1191_v30 = vmul.f32 %v4309_v48, %v1190_v29  ;;  %v1358_v48 = vld [vmem:[#allocation14 + $0xf8] sm:$0xff] }
 0x7d3   :  { %1388 = vmatpush.msra.mxu2 %v1358_v48  ;;  %v1583_v48 = vld [vmem:[#allocation17 + $0x60] sm:$0xff] }
 0x7d4   :  { %2953 = vmatmul.msk.f32.vlgmr.msra.gmra.mxu3 %vm774_vm15, %v1191_v30 }
 0x7d5   :  { %1389 = vmatpush.msra.mxu2 %v1356_v50 }
 0x7d7   :  { %1390 = vmatpush.msra.mxu2 %v1354_v45  ;;  %v1582_v45 = vld [vmem:[#allocation17 + $0x58] sm:$0xff] }
 0x7d9   :  { %v1224_v31 = vld [vmem:[#allocation2] sm:$0xff]  ;;  %1391 = vmatpush.msra.mxu2 %v1352_v53 }
 0x7da   :  { %1262 = vmatmul.f32.vlgmr.msrb.gmra.mxu0 %v1224_v31  ;;  %1848 = vst [vmem:[#allocation2] sm:$0xff] %v3566_v24 }
 0x7db   :  { %1392 = vmatpush.msra.mxu2 %v1350_v39  ;;  %v1600_v39 = vld [vmem:[#allocation17 + $0xe8] sm:$0xff] }
 0x7dd   :  { %1393 = vmatpush.msra.mxu2 %v1348_v55 }
 0x7df   :  { %1394 = vmatpush.msra.mxu2 %v1346_v57  ;;  %v1580_v57 = vld [vmem:[#allocation17 + $0x48] sm:$0xff] }
 0x7e1   :  { %1395 = vmatpush.msra.mxu2 %v1344_v59 }
 0x7e3   :  { %1396 = vmatpush.msra.mxu2 %v1342_v52  ;;  %v1579_v52 = vld [vmem:[#allocation17 + $0x40] sm:$0xff] }
 0x7e5   :  { %1397 = vmatpush.msra.mxu2 %v1340_v62  ;;  %v1578_v62 = vld [vmem:[#allocation17 + $0x38] sm:$0xff] }
 0x7e7   :  { %1398 = vmatpush.msra.mxu2 %v1338_v1 }
 0x7e9   :  { %1399 = vmatpush.msra.mxu2 %v1336_v3  ;;  %v1596_v3 = vld [vmem:[#allocation17 + $0xc8] sm:$0xff] }
 0x7eb   :  { %1400 = vmatpush.msra.mxu2 %v1334_v5  ;;  %v1576_v5 = vld [vmem:[#allocation17 + $0x28] sm:$0xff] }
 0x7ed   :  { %1401 = vmatpush.msra.mxu2 %v1332_v8 }
 0x7ef   :  { %1402 = vmatpush.msra.mxu2 %v1330_v10  ;;  %v1575_v10 = vld [vmem:[#allocation17 + $0x20] sm:$0xff] }
 0x7f1   :  { %1403 = vmatpush.msra.mxu2 %v1328_v12 }
 0x84e   :  { %v1131_v32 = vpop.f32.mrf.mxu1 }
 0x84f   :  { %1135 = vrot.lane.b32.xlu0 %v1131_v32, %s3543_s25  ;;  %v4398_v32 = vld [vmem:[#allocation10] ss:$0 sm:$0xff] }
 0x857   :  { %v1216_v34 = vpop.f32.mrf.mxu3  ;;  %v1263_v35 = vpop.f32.mrf.mxu0 }
 0x858   :  { %v1264_v36 = vadd.f32 %v4369_v33, %v1263_v35  ;;  %1220 = vrot.lane.b32.xlu2 %v1216_v34, %s3558_s23 }
 0x85a   :  { %v4374_v37 = vadd.f32 %v1264_v36, %v4057_v63 }
 0x85c   :  { %v1273_v38 = vsel %vm524_vm0, %v4374_v37, 0.0 }
 0x85d   :  { %1274 = vadd.xlane.f32.xlu1 %v1273_v38 }
 0x8b2   :  { %v1221_v41 = vpop.permute.xlu2 %1220 }
 0x8c1   :  { %v1136_v40 = vpop.permute.xlu0 %1135 }
 0x8c2   :  { %1138 = vst.msk [vmem:[#allocation2 + $0x8] sm:$0x1f] %vm888_vm13, %v1136_v40 }
 0x8c3   :  { %1223 = vst.msk [vmem:[#allocation2 + $0x8] sm:$0x1f] %vm974_vm1, %v1221_v41 }
 0x8ca   :  { %v1225_v42 = vld [vmem:[#allocation2 + $0x8] sm:$0xff] }
 0x8cb   :  { %1265 = vmatmul.f32.gmra.mxu0 %v1225_v42  ;;  %1849 = vst [vmem:[#allocation2 + $0x8] sm:$0xff] %v3566_v24  ;;  %v1353_v24 = vld [vmem:[#allocation14 + $0xd0] sm:$0xff]  ;;  %v4409_v42 = vld [vmem:[#allocation16] sm:$0x3] }
 0x8cc   :  { %1367 = vmatpush.msrb.mxu1 %v1353_v24  ;;  %v1362_v24 = vperm.slane %v4409_v42, 1 }
 0x8ce   :  { %1368 = vmatpush.msrb.mxu1 %v1351_v51  ;;  %v1601_v51 = vld [vmem:[#allocation17 + $0xf0] sm:$0xff] }
 0x8cf   :  { %1631 = vmatpush.msra.mxu0 %v1601_v51  ;;  %v1587_v51 = vld [vmem:[#allocation17 + $0x80] sm:$0xff] }
 0x8d0   :  { %v1275_v43 = vpop.xlane.xlu1 %1274  ;;  %1369 = vmatpush.msrb.mxu1 %v1349_v23  ;;  %v1581_v23 = vld [vmem:[#allocation17 + $0x50] sm:$0xff] }
 0x8d1   :  { %v1279_v44 = vmul.f32 %v1275_v43, %v4083_v20  ;;  %v1586_v43 = vld [vmem:[#allocation17 + $0x78] sm:$0xff]  ;;  %1632 = vmatpush.msra.mxu0 %v1600_v39 }
 0x8d2   :  { %1370 = vmatpush.msrb.mxu1 %v1347_v54  ;;  %1607 = vmatpush.msrb.mxu3 %v1586_v43  ;;  %v1589_v43 = vld [vmem:[#allocation17 + $0x90] sm:$0xff] }
 0x8d3   :  { %v4383_v63 = vsub.f32 %v4374_v37, %v1279_v44  ;;  %v1361_v44 = vperm.slane %v4409_v42, 0 }
 0x8d4   :  { %1371 = vmatpush.msrb.mxu1 %v1345_v56 }
 0x8d5   :  { %v1283_v28 = vmul.f32 %v4383_v63, %v4383_v63 }
 0x8d6   :  { %1372 = vmatpush.msrb.mxu1 %v1343_v58  ;;  %v1599_v58 = vld [vmem:[#allocation17 + $0xe0] sm:$0xff] }
 0x8d7   :  { %v1285_v46 = vsel %vm524_vm0, %v1283_v28, 0.0  ;;  %v1584_v28 = vld [vmem:[#allocation17 + $0x68] sm:$0xff]  ;;  %1633 = vmatpush.msra.mxu0 %v1599_v58 }
 0x8d8   :  { %1286 = vadd.xlane.f32.xlu2 %v1285_v46  ;;  %1373 = vmatpush.msrb.mxu1 %v1341_v60 }
 0x8da   :  { %1374 = vmatpush.msrb.mxu1 %v1339_v61  ;;  %v1598_v61 = vld [vmem:[#allocation17 + $0xd8] sm:$0xff] }
 0x8db   :  { %1634 = vmatpush.msra.mxu0 %v1598_v61 }
 0x8dc   :  { %1375 = vmatpush.msrb.mxu1 %v1337_v0  ;;  %v1597_v0 = vld [vmem:[#allocation17 + $0xd0] sm:$0xff] }
 0x8dd   :  { %1635 = vmatpush.msra.mxu0 %v1597_v0 }
 0x8de   :  { %1376 = vmatpush.msrb.mxu1 %v1335_v2  ;;  %v1577_v2 = vld [vmem:[#allocation17 + $0x30] sm:$0xff] }
 0x8df   :  { %1636 = vmatpush.msra.mxu0 %v1596_v3 }
 0x8e0   :  { %1377 = vmatpush.msrb.mxu1 %v1333_v4 }
 0x8e2   :  { %1378 = vmatpush.msrb.mxu1 %v1331_v7  ;;  %v1595_v7 = vld [vmem:[#allocation17 + $0xc0] sm:$0xff] }
 0x8e3   :  { %1637 = vmatpush.msra.mxu0 %v1595_v7 }
 0x8e4   :  { %1379 = vmatpush.msrb.mxu1 %v1329_v9 }
 0x8e6   :  { %1380 = vmatpush.msrb.mxu1 %v1327_v11  ;;  %v1594_v11 = vld [vmem:[#allocation17 + $0xb8] sm:$0xff] }
 0x8e7   :  { %1638 = vmatpush.msra.mxu0 %v1594_v11 }
 0x948   :  { %v1266_v13 = vpop.f32.mrf.mxu0 }
 0x949   :  { %v1267_v14 = vadd.f32 %v4369_v33, %v1266_v13  ;;  %v1574_v13 = vld [vmem:[#allocation17 + $0x18] sm:$0xff] }
 0x94b   :  { %v4390_v15 = vadd.f32 %v1267_v14, %v4061_v6  ;;  %v1287_v16 = vpop.xlane.xlu2 %1286  ;;  %v4395_v6 = vld [vmem:[#allocation8] ss:$0 sm:$0xff] }
 0x94c   :  { %v1291_v17 = vmul.f32 %v1287_v16, %v4083_v20  ;;  %v1593_v16 = vld [vmem:[#allocation17 + $0xb0] sm:$0xff] }
 0x94d   :  { %v1276_v18 = vsel %vm524_vm0, %v4390_v15, 0.0  ;;  %1639 = vmatpush.msra.mxu0 %v1593_v16 }
 0x94e   :  { %v1293_v19 = vadd.f32 1e-06, %v1291_v17  ;;  %1277 = vadd.xlane.f32.xlu0 %v1276_v18  ;;  %v1573_v18 = vld [vmem:[#allocation17 + $0x10] sm:$0xff] }
 0x950   :  { %3118 = vrsqrt.f32 %v1293_v19  ;;  %vm1301_vm4 = vweird.f32 %v1293_v19 }
 0x956   :  { %v3119_v21 = vpop.eup %3118 }
 0x957   :  { %v1296_v22 = vmul.f32 %v3119_v21, %v1293_v19  ;;  %vm1302_vm3 = vweird.f32 %v3119_v21  ;;  %v1592_v19 = vld [vmem:[#allocation17 + $0xa8] sm:$0xff] }
 0x958   :  { %vm1303_vm6 = vmor %vm1301_vm4, %vm1302_vm3  ;;  %1640 = vmatpush.msra.mxu0 %v1592_v19 }
 0x959   :  { %v1297_v25 = vmul.f32 %v3119_v21, %v1296_v22 }
 0x95b   :  { %v1298_v26 = vmul.f32 0.5, %v1297_v25  ;;  %v1572_v25 = vld [vmem:[#allocation17 + $0x8] sm:$0xff] }
 0x95d   :  { %v1299_v27 = vsub.f32 1.5, %v1298_v26  ;;  %v1591_v26 = vld [vmem:[#allocation17 + $0xa0] sm:$0xff] }
 0x95e   :  { %1641 = vmatpush.msra.mxu0 %v1591_v26 }
 0x95f   :  { %v1300_v29 = vmul.f32 %v3119_v21, %v1299_v27 }
 0x961   :  { %v1304_v30 = vsel %vm1303_vm6, %v3119_v21, %v1300_v29 }
 0x962   :  { %v1315_v31 = vmul.f32 %v1304_v30, %v4383_v63  ;;  %v1585_v63 = vld [vmem:[#allocation17 + $0x70] sm:$0xff] }
 0x963   :  { %1608 = vmatpush.msrb.mxu3 %v1585_v63 }
 0x964   :  { %v1320_v33 = vmul.f32 %v4395_v6, %v1315_v31 }
 0x965   :  { %1609 = vmatpush.msrb.mxu3 %v1584_v28 }
 0x966   :  { %v1325_v34 = vadd.f32 %v4398_v32, %v1320_v33  ;;  %v1571_v33 = vld [vmem:[#allocation17] sm:$0xff] }
 0x967   :  { %1610 = vmatpush.msrb.mxu3 %v1583_v48 }
 0x968   :  { %1381 = vmatmul.f32.vlgmr.msrb.gmra.mxu1 %v1325_v34  ;;  %1404 = vmatmul.f32.vlgmr.msra.gmra.mxu2 %v1325_v34  ;;  %v1590_v34 = vld [vmem:[#allocation17 + $0x98] sm:$0xff] }
 0x969   :  { %1611 = vmatpush.msrb.mxu3 %v1582_v45  ;;  %1642 = vmatpush.msra.mxu0 %v1590_v34 }
 0x96b   :  { %1612 = vmatpush.msrb.mxu3 %v1581_v23  ;;  %1643 = vmatpush.msra.mxu0 %v1589_v43 }
 0x96d   :  { %1613 = vmatpush.msrb.mxu3 %v1580_v57  ;;  %1644 = vmatpush.msra.mxu0 %v1588_v49 }
 0x96f   :  { %1614 = vmatpush.msrb.mxu3 %v1579_v52  ;;  %1645 = vmatpush.msra.mxu0 %v1587_v51  ;;  %v4447_v51 = vld [vmem:[#allocation19] ss:$0 sm:$0xff] }
 0x971   :  { %1615 = vmatpush.msrb.mxu3 %v1578_v62 }
 0x973   :  { %1616 = vmatpush.msrb.mxu3 %v1577_v2 }
 0x975   :  { %1617 = vmatpush.msrb.mxu3 %v1576_v5 }
 0x977   :  { %1618 = vmatpush.msrb.mxu3 %v1575_v10 }
 0x979   :  { %1619 = vmatpush.msrb.mxu3 %v1574_v13 }
 0x97b   :  { %1620 = vmatpush.msrb.mxu3 %v1573_v18 }
 0x97d   :  { %1621 = vmatpush.msrb.mxu3 %v1572_v25 }
 0x97f   :  { %1622 = vmatpush.msrb.mxu3 %v1571_v33 }
 0x9c1   :  { %v1278_v35 = vpop.xlane.xlu0 %1277 }
 0x9c2   :  { %v1280_v36 = vmul.f32 %v1278_v35, %v4083_v20 }
 0x9c4   :  { %v4404_v38 = vsub.f32 %v4390_v15, %v1280_v36 }
 0x9c6   :  { %v1284_v40 = vmul.f32 %v4404_v38, %v4404_v38 }
 0x9c8   :  { %v1288_v41 = vsel %vm524_vm0, %v1284_v40, 0.0 }
 0x9c9   :  { %1289 = vadd.xlane.f32.xlu1 %v1288_v41 }
 0x9e5   :  { %v1382_v46 = vpop.f32.mrf.mxu1 }
 0x9e6   :  { %v4414_v47 = vadd.f32 %v1382_v46, %v1361_v44 }
 0x9e8   :  { %v4417_v50 = vmul.f32 0.70710677, %v4414_v47  ;;  %v1411_v25 = vmul.f32 0.5, %v4414_v47 }
 0x9ea   :  { %v4421_v53 = vand.u32 2147483647, %v4417_v50 }
 0x9eb   :  { %v1405_v54 = vpop.f32.mrf.mxu2 }
 0x9ec   :  { %v1423_v55 = vmul.f32 0.3275911, %v4421_v53  ;;  %v4426_v56 = vadd.f32 %v1405_v54, %v1362_v24  ;;  %v1527_v40 = vsub.f32 0.0, %v4421_v53 }
 0x9ee   :  { %v1427_v59 = vadd.f32 1.0, %v1423_v55  ;;  %v4429_v60 = vmul.f32 0.70710677, %v4426_v56  ;;  %v1531_v23 = vmul.f32 %v1527_v40, %v4421_v53  ;;  %v1412_v34 = vmul.f32 0.5, %v4426_v56 }
 0x9f0   :  { %3120 = vrcp.f32 %v1427_v59  ;;  %v4432_v1 = vand.u32 2147483647, %v4429_v60  ;;  %v1442_v17 = vand.u32 2147483648, %v1427_v59  ;;  %v1440_v22 = vand.u32 2147483647, %v1427_v59 }
 0x9f1   :  { %vm1436_vm11 = vweird.f32 %v1427_v59  ;;  %v1535_v61 = vmul.f32 1.442695, %v1531_v23 }
 0x9f2   :  { %v1424_v4 = vmul.f32 0.3275911, %v4432_v1  ;;  %v1443_v30 = vor.u32 1.1754944e-38, %v1442_v17  ;;  %vm1441_vm14 = vcmp.eq.f32.partialorder %v1440_v22, 8.507059e+37  ;;  %v1528_v52 = vsub.f32 0.0, %v4432_v1 }
 0x9f4   :  { %v1428_v8 = vadd.f32 1.0, %v1424_v4  ;;  %v1532_v53 = vmul.f32 %v1528_v52, %v4432_v1 }
 0x9f6   :  { %v3121_v9 = vpop.eup %3120  ;;  %3122 = vrcp.f32 %v1428_v8  ;;  %v1457_v28 = vand.u32 2147483648, %v1428_v8  ;;  %v1455_v48 = vand.u32 2147483647, %v1428_v8  ;;  %vm1451_vm3 = vweird.f32 %v1428_v8 }
 0x9f7   :  { %v1432_v12 = vmul.f32 %v3121_v9, %v1427_v59  ;;  %vm1437_vm7 = vweird.f32 %v3121_v9  ;;  %3124 = vpow2.f32 %v1535_v61 }
 0x9f8   :  { %vm1438_vm12 = vmor %vm1436_vm11, %vm1437_vm7  ;;  %v1458_v55 = vor.u32 1.1754944e-38, %v1457_v28  ;;  %vm1456_vm6 = vcmp.eq.f32.partialorder %v1455_v48, 8.507059e+37  ;;  %vm1551_vm7 = vcmp.lt.f32.partialorder %v4417_v50, 0.0  ;;  %vm1552_vm11 = vcmp.lt.f32.partialorder %v4429_v60, 0.0 }
 0x9f9   :  { %v1433_v14 = vsub.f32 1.0, %v1432_v12 }
 0x9fb   :  { %v1434_v21 = vmul.f32 %v3121_v9, %v1433_v14 }
 0x9fc   :  { %v3123_v27 = vpop.eup %3122 }
 0x9fd   :  { %v1435_v29 = vadd.f32 %v3121_v9, %v1434_v21  ;;  %v1447_v31 = vmul.f32 %v3123_v27, %v1428_v8  ;;  %vm1452_vm2 = vweird.f32 %v3123_v27  ;;  %v3125_v12 = vpop.eup %3124 }
 0x9fe   :  { %vm1453_vm4 = vmor %vm1451_vm3, %vm1452_vm2 }
 0x9ff   :  { %v1439_v35 = vsel %vm1438_vm12, %v3121_v9, %v1435_v29  ;;  %v1448_v41 = vsub.f32 1.0, %v1447_v31  ;;  %v1537_v9 = vmul.f32 1.442695, %v1532_v53 }
 0xa00   :  { %v1444_v36 = vsel %vm1441_vm14, %v1443_v30, %v1439_v35 }
 0xa01   :  { %v1491_v63 = vmul.f32 1.0614054, %v1444_v36  ;;  %v1449_v46 = vmul.f32 %v3123_v27, %v1448_v41  ;;  %3126 = vpow2.f32 %v1537_v9 }
 0xa03   :  { %v1495_v45 = vadd.f32 -1.4531521, %v1491_v63  ;;  %v1450_v39 = vadd.f32 %v3123_v27, %v1449_v46 }
 0xa05   :  { %v1499_v54 = vmul.f32 %v1495_v45, %v1444_v36  ;;  %v1454_v57 = vsel %vm1453_vm4, %v3123_v27, %v1450_v39 }
 0xa06   :  { %v1459_v59 = vsel %vm1456_vm6, %v1458_v55, %v1454_v57 }
 0xa07   :  { %v1503_v58 = vadd.f32 1.4214138, %v1499_v54  ;;  %v1492_v62 = vmul.f32 1.0614054, %v1459_v59  ;;  %v3127_v1 = vpop.eup %3126 }
 0xa09   :  { %v1507_v0 = vmul.f32 %v1503_v58, %v1444_v36  ;;  %v1496_v2 = vadd.f32 -1.4531521, %v1492_v62 }
 0xa0b   :  { %v1511_v3 = vadd.f32 -0.28449672, %v1507_v0  ;;  %v1500_v4 = vmul.f32 %v1496_v2, %v1459_v59 }
 0xa0d   :  { %v1515_v5 = vmul.f32 %v1511_v3, %v1444_v36  ;;  %v1504_v7 = vadd.f32 1.4214138, %v1500_v4 }
 0xa0f   :  { %v1519_v8 = vadd.f32 0.2548296, %v1515_v5  ;;  %v1508_v10 = vmul.f32 %v1504_v7, %v1459_v59 }
 0xa11   :  { %v1523_v11 = vmul.f32 %v1519_v8, %v1444_v36  ;;  %v1512_v13 = vadd.f32 -0.28449672, %v1508_v10 }
 0xa13   :  { %v1543_v14 = vmul.f32 %v3125_v12, %v1523_v11  ;;  %v1516_v16 = vmul.f32 %v1512_v13, %v1459_v59 }
 0xa15   :  { %v1547_v17 = vsub.f32 1.0, %v1543_v14  ;;  %v1520_v18 = vadd.f32 0.2548296, %v1516_v16 }
 0xa17   :  { %v1555_v19 = vsub.f32 0.0, %v1547_v17  ;;  %v1524_v21 = vmul.f32 %v1520_v18, %v1459_v59 }
 0xa19   :  { %v1559_v22 = vsel %vm1551_vm7, %v1555_v19, %v1547_v17  ;;  %v1544_v27 = vmul.f32 %v3127_v1, %v1524_v21 }
 0xa1a   :  { %v1563_v26 = vadd.f32 1.0, %v1559_v22 }
 0xa1b   :  { %v1548_v30 = vsub.f32 1.0, %v1544_v27 }
 0xa1c   :  { %v1567_v29 = vmul.f32 %v1563_v26, %v1411_v25 }
 0xa1d   :  { %v1556_v31 = vsub.f32 0.0, %v1548_v30 }
 0xa1e   :  { %1623 = vmatmul.f32.vlgmr.msrb.gmra.mxu3 %v1567_v29 }
 0xa1f   :  { %v1560_v33 = vsel %vm1552_vm11, %v1556_v31, %v1548_v30 }
 0xa20   :  { %v1564_v35 = vadd.f32 1.0, %v1560_v33 }
 0xa22   :  { %v1568_v36 = vmul.f32 %v1564_v35, %v1412_v34 }
 0xa24   :  { %1646 = vmatmul.f32.vlgmr.msra.gmra.mxu0 %v1568_v36 }
 0xa3c   :  { %v1290_v50 = vpop.xlane.xlu1 %1289 }
 0xa3d   :  { %v1292_v40 = vmul.f32 %v1290_v50, %v4083_v20 }
 0xa3f   :  { %v1294_v41 = vadd.f32 1e-06, %v1292_v40 }
 0xa41   :  { %3128 = vrsqrt.f32 %v1294_v41  ;;  %vm1311_vm14 = vweird.f32 %v1294_v41 }
 0xa47   :  { %v3129_v47 = vpop.eup %3128 }
 0xa48   :  { %v1306_v43 = vmul.f32 %v3129_v47, %v1294_v41  ;;  %vm1312_vm12 = vweird.f32 %v3129_v47 }
 0xa49   :  { %vm1313_vm2 = vmor %vm1311_vm14, %vm1312_vm12 }
 0xa4a   :  { %v1307_v63 = vmul.f32 %v3129_v47, %v1306_v43 }
 0xa4c   :  { %v1308_v28 = vmul.f32 0.5, %v1307_v63 }
 0xa4e   :  { %v1309_v46 = vsub.f32 1.5, %v1308_v28 }
 0xa50   :  { %v1310_v48 = vmul.f32 %v3129_v47, %v1309_v46 }
 0xa52   :  { %v1314_v60 = vsel %vm1313_vm2, %v3129_v47, %v1310_v48 }
 0xa53   :  { %v1316_v56 = vmul.f32 %v1314_v60, %v4404_v38 }
 0xa55   :  { %v1321_v49 = vmul.f32 %v4395_v6, %v1316_v56 }
 0xa57   :  { %v1326_v45 = vadd.f32 %v4398_v32, %v1321_v49 }
 0xa59   :  { %1384 = vmatmul.f32.gmra.mxu1 %v1326_v45  ;;  %1407 = vmatmul.f32.gmra.mxu2 %v1326_v45 }
 0xaa1   :  { %v1624_v23 = vpop.f32.mrf.mxu3  ;;  %v1647_v54 = vpop.f32.mrf.mxu0 }
 0xaa2   :  { %v1625_v39 = vadd.f32 %v4447_v51, %v1624_v23 }
 0xaa4   :  { %v1648_v55 = vadd.f32 %v1647_v54, %v1625_v39 }
 0xaa6   :  { %v4451_v57 = vadd.f32 %v1648_v55, %v4374_v37 }
 0xaa8   :  { %v1659_v58 = vsel %vm524_vm0, %v4451_v57, 0.0 }
 0xaa9   :  { %1660 = vadd.xlane.f32.xlu0 %v1659_v58 }
 0xad6   :  { %v1385_v38 = vpop.f32.mrf.mxu1 }
 0xad7   :  { %v4457_v6 = vadd.f32 %v1385_v38, %v1361_v44 }
 0xad9   :  { %v4460_v32 = vmul.f32 0.70710677, %v4457_v6 }
 0xadb   :  { %v1421_v59 = vand.u32 2147483647, %v4460_v32 }
 0xadc   :  { %v1408_v52 = vpop.f32.mrf.mxu2 }
 0xadd   :  { %v1425_v61 = vmul.f32 0.3275911, %v1421_v59  ;;  %v4465_v37 = vadd.f32 %v1408_v52, %v1362_v24  ;;  %v1529_v14 = vsub.f32 0.0, %v1421_v59 }
 0xadf   :  { %v1429_v62 = vadd.f32 1.0, %v1425_v61  ;;  %v4468_v0 = vmul.f32 0.70710677, %v4465_v37  ;;  %v1533_v25 = vmul.f32 %v1529_v14, %v1421_v59  ;;  %v1413_v61 = vmul.f32 0.5, %v4457_v6  ;;  %v2983_v14 = vld [vmem:[%s4938_s7 + $0x268] sm:$0xff] }
 0xae1   :  { %3130 = vrcp.f32 %v1429_v62  ;;  %v1422_v2 = vand.u32 2147483647, %v4468_v0  ;;  %v1472_v7 = vand.u32 2147483648, %v1429_v62  ;;  %v1470_v9 = vand.u32 2147483647, %v1429_v62 }
 0xae2   :  { %vm1466_vm4 = vweird.f32 %v1429_v62  ;;  %v1539_v35 = vmul.f32 1.442695, %v1533_v25  ;;  %v2964_v25 = vld [vmem:[%s4938_s7 + $0x1d0] sm:$0xff] }
 0xae3   :  { %v1426_v44 = vmul.f32 0.3275911, %v1422_v2  ;;  %v1473_v11 = vor.u32 1.1754944e-38, %v1472_v7  ;;  %vm1471_vm7 = vcmp.eq.f32.partialorder %v1470_v9, 8.507059e+37  ;;  %v1530_v30 = vsub.f32 0.0, %v1422_v2 }
 0xae5   :  { %v1430_v3 = vadd.f32 1.0, %v1426_v44  ;;  %v1534_v40 = vmul.f32 %v1530_v30, %v1422_v2  ;;  %v2979_v30 = vld [vmem:[%s4938_s7 + $0x248] sm:$0xff] }
 0xae7   :  { %v3131_v53 = vpop.eup %3130  ;;  %3132 = vrcp.f32 %v1430_v3  ;;  %v1487_v17 = vand.u32 2147483648, %v1430_v3  ;;  %v1485_v21 = vand.u32 2147483647, %v1430_v3  ;;  %vm1481_vm12 = vweird.f32 %v1430_v3 }
 0xae8   :  { %v1462_v4 = vmul.f32 %v3131_v53, %v1429_v62  ;;  %vm1467_vm3 = vweird.f32 %v3131_v53  ;;  %3134 = vpow2.f32 %v1539_v35  ;;  %v1541_v28 = vmul.f32 1.442695, %v1534_v40  ;;  %v2994_v35 = vld [vmem:[%s4938_s7 + $0x2c0] sm:$0xff]  ;;  %v2993_v40 = vld [vmem:[%s4938_s7 + $0x2b8] sm:$0xff] }
 0xae9   :  { %vm1468_vm6 = vmor %vm1466_vm4, %vm1467_vm3  ;;  %v1488_v26 = vor.u32 1.1754944e-38, %v1487_v17  ;;  %vm1486_vm2 = vcmp.eq.f32.partialorder %v1485_v21, 8.507059e+37  ;;  %vm1553_vm3 = vcmp.lt.f32.partialorder %v4460_v32, 0.0  ;;  %vm1554_vm4 = vcmp.lt.f32.partialorder %v4468_v0, 0.0  ;;  %v2969_v0 = vld [vmem:[%s4938_s7 + $0x1f8] sm:$0xff]  ;;  %v2966_v17 = vld [vmem:[%s4938_s7 + $0x1e0] sm:$0xff] }
 0xaea   :  { %v1463_v5 = vsub.f32 1.0, %v1462_v4  ;;  %3136 = vpow2.f32 %v1541_v28  ;;  %v1414_v4 = vmul.f32 0.5, %v4465_v37  ;;  %v2985_v37 = vld [vmem:[%s4938_s7 + $0x278] sm:$0xff]  ;;  %1735 = vmatpush.msra.mxu1 %v2969_v0  ;;  %v2975_v28 = vld [vmem:[%s4938_s7 + $0x228] sm:$0xff] }
 0xaeb   :  { %1780 = vmatpush.msrb.mxu2 %v2985_v37  ;;  %v2965_v21 = vld [vmem:[%s4938_s7 + $0x1d8] sm:$0xff] }
 0xaec   :  { %v1464_v8 = vmul.f32 %v3131_v53, %v1463_v5 }
 0xaed   :  { %v3133_v42 = vpop.eup %3132 }
 0xaee   :  { %v1477_v24 = vmul.f32 %v3133_v42, %v1430_v3  ;;  %v1465_v10 = vadd.f32 %v3131_v53, %v1464_v8  ;;  %vm1482_vm11 = vweird.f32 %v3133_v42  ;;  %v3135_v49 = vpop.eup %3134 }
 0xaef   :  { %vm1483_vm14 = vmor %vm1481_vm12, %vm1482_vm11 }
 0xaf0   :  { %v1478_v12 = vsub.f32 1.0, %v1477_v24  ;;  %v1469_v13 = vsel %vm1468_vm6, %v3131_v53, %v1465_v10  ;;  %v3137_v38 = vpop.eup %3136  ;;  %v3001_v24 = vld [vmem:[%s4938_s7 + $0x2f8] sm:$0xff]  ;;  %v2968_v10 = vld [vmem:[%s4938_s7 + $0x1f0] sm:$0xff] }
 0xaf1   :  { %v1474_v16 = vsel %vm1471_vm7, %v1473_v11, %v1469_v13  ;;  %v2984_v11 = vld [vmem:[%s4938_s7 + $0x270] sm:$0xff]  ;;  %1825 = vmatpush.msra.mxu3 %v3001_v24  ;;  %1736 = vmatpush.msra.mxu1 %v2968_v10  ;;  %v2967_v13 = vld [vmem:[%s4938_s7 + $0x1e8] sm:$0xff] }
 0xaf2   :  { %v1479_v18 = vmul.f32 %v3133_v42, %v1478_v12  ;;  %v1493_v19 = vmul.f32 1.0614054, %v1474_v16  ;;  %v3000_v12 = vld [vmem:[%s4938_s7 + $0x2f0] sm:$0xff]  ;;  %1781 = vmatpush.msrb.mxu2 %v2984_v11 }
 0xaf3   :  { %1826 = vmatpush.msra.mxu3 %v3000_v12  ;;  %1737 = vmatpush.msra.mxu1 %v2967_v13  ;;  %v3077_v12 = vld [vmem:[#allocation7 + $0x1] ss:$0 sm:$0xff] }
 0xaf4   :  { %v1497_v1 = vadd.f32 -1.4531521, %v1493_v19  ;;  %v1480_v22 = vadd.f32 %v3133_v42, %v1479_v18  ;;  %1782 = vmatpush.msrb.mxu2 %v2983_v14  ;;  %v2982_v18 = vld [vmem:[%s4938_s7 + $0x260] sm:$0xff] }
 0xaf5   :  { %v2998_v19 = vld [vmem:[%s4938_s7 + $0x2e0] sm:$0xff]  ;;  %1738 = vmatpush.msra.mxu1 %v2966_v17 }
 0xaf6   :  { %v1501_v27 = vmul.f32 %v1497_v1, %v1474_v16  ;;  %v1484_v29 = vsel %vm1483_vm14, %v3133_v42, %v1480_v22  ;;  %1783 = vmatpush.msrb.mxu2 %v2982_v18  ;;  %v2981_v1 = vld [vmem:[%s4938_s7 + $0x258] sm:$0xff] }
 0xaf7   :  { %v1489_v31 = vsel %vm1486_vm2, %v1488_v26, %v1484_v29  ;;  %v2997_v22 = vld [vmem:[%s4938_s7 + $0x2d8] sm:$0xff]  ;;  %1739 = vmatpush.msra.mxu1 %v2965_v21  ;;  %v2980_v26 = vld [vmem:[%s4938_s7 + $0x250] sm:$0xff]  ;;  %v2963_v29 = vld [vmem:[%s4938_s7 + $0x1c8] sm:$0xff] }
 0xaf8   :  { %v1505_v33 = vadd.f32 1.4214138, %v1501_v27  ;;  %v1494_v34 = vmul.f32 1.0614054, %v1489_v31  ;;  %1784 = vmatpush.msrb.mxu2 %v2981_v1  ;;  %v2996_v27 = vld [vmem:[%s4938_s7 + $0x2d0] sm:$0xff] }
 0xaf9   :  { %1740 = vmatpush.msra.mxu1 %v2964_v25  ;;  %v3078_v1 = vld [vmem:[#allocation11 + $0x3] ss:$0 sm:$0xff] }
 0xafa   :  { %v1509_v36 = vmul.f32 %v1505_v33, %v1474_v16  ;;  %v1498_v50 = vadd.f32 -1.4531521, %v1494_v34  ;;  %1785 = vmatpush.msrb.mxu2 %v2980_v26  ;;  %v2962_v33 = vld [vmem:[%s4938_s7 + $0x1c0] sm:$0xff]  ;;  %v4638_v26 = vld [vmem:[#allocation11 + $0x5] ss:$0 sm:$0xff] }
 0xafb   :  { %1741 = vmatpush.msra.mxu1 %v2963_v29  ;;  %v2978_v34 = vld [vmem:[%s4938_s7 + $0x240] sm:$0xff] }
 0xafc   :  { %v1513_v41 = vadd.f32 -0.28449672, %v1509_v36  ;;  %v1502_v47 = vmul.f32 %v1498_v50, %v1489_v31  ;;  %1786 = vmatpush.msrb.mxu2 %v2979_v30  ;;  %v2961_v36 = vld [vmem:[%s4938_s7 + $0x1b8] sm:$0xff] }
 0xafd   :  { %1742 = vmatpush.msra.mxu1 %v2962_v33  ;;  %v2977_v50 = vld [vmem:[%s4938_s7 + $0x238] sm:$0xff] }
 0xafe   :  { %v1517_v43 = vmul.f32 %v1513_v41, %v1474_v16  ;;  %v1506_v63 = vadd.f32 1.4214138, %v1502_v47  ;;  %1787 = vmatpush.msrb.mxu2 %v2978_v34  ;;  %v2960_v41 = vld [vmem:[%s4938_s7 + $0x1b0] sm:$0xff] }
 0xaff   :  { %1743 = vmatpush.msra.mxu1 %v2961_v36  ;;  %v2976_v47 = vld [vmem:[%s4938_s7 + $0x230] sm:$0xff] }
 0xb00   :  { %v1521_v46 = vadd.f32 0.2548296, %v1517_v43  ;;  %v1510_v48 = vmul.f32 %v1506_v63, %v1489_v31  ;;  %1788 = vmatpush.msrb.mxu2 %v2977_v50  ;;  %v2992_v43 = vld [vmem:[%s4938_s7 + $0x2b0] sm:$0xff]  ;;  %v2959_v63 = vld [vmem:[%s4938_s7 + $0x1a8] sm:$0xff] }
 0xb01   :  { %1744 = vmatpush.msra.mxu1 %v2960_v41 }
 0xb02   :  { %v1525_v60 = vmul.f32 %v1521_v46, %v1474_v16  ;;  %v1514_v56 = vadd.f32 -0.28449672, %v1510_v48  ;;  %v2999_v16 = vld [vmem:[%s4938_s7 + $0x2e8] sm:$0xff]  ;;  %1789 = vmatpush.msrb.mxu2 %v2976_v47  ;;  %v2958_v48 = vld [vmem:[%s4938_s7 + $0x1a0] sm:$0xff] }
 0xb03   :  { %1827 = vmatpush.msra.mxu3 %v2999_v16  ;;  %v2991_v46 = vld [vmem:[%s4938_s7 + $0x2a8] sm:$0xff]  ;;  %1745 = vmatpush.msra.mxu1 %v2959_v63 }
 0xb04   :  { %v1545_v45 = vmul.f32 %v3135_v49, %v1525_v60  ;;  %v1518_v23 = vmul.f32 %v1514_v56, %v1489_v31  ;;  %1790 = vmatpush.msrb.mxu2 %v2975_v28  ;;  %v2974_v60 = vld [vmem:[%s4938_s7 + $0x220] sm:$0xff]  ;;  %v2957_v49 = vld [vmem:[%s4938_s7 + $0x198] sm:$0xff] }
 0xb05   :  { %1828 = vmatpush.msra.mxu3 %v2998_v19  ;;  %v2990_v56 = vld [vmem:[%s4938_s7 + $0x2a0] sm:$0xff]  ;;  %1746 = vmatpush.msra.mxu1 %v2958_v48 }
 0xb06   :  { %v1549_v39 = vsub.f32 1.0, %v1545_v45  ;;  %v1522_v54 = vadd.f32 0.2548296, %v1518_v23  ;;  %1791 = vmatpush.msrb.mxu2 %v2974_v60  ;;  %v2973_v45 = vld [vmem:[%s4938_s7 + $0x218] sm:$0xff] }
 0xb07   :  { %1829 = vmatpush.msra.mxu3 %v2997_v22  ;;  %v2989_v23 = vld [vmem:[%s4938_s7 + $0x298] sm:$0xff]  ;;  %1747 = vmatpush.msra.mxu1 %v2957_v49 }
 0xb08   :  { %v1557_v55 = vsub.f32 0.0, %v1549_v39  ;;  %v1526_v58 = vmul.f32 %v1522_v54, %v1489_v31  ;;  %v2995_v31 = vld [vmem:[%s4938_s7 + $0x2c8] sm:$0xff]  ;;  %1792 = vmatpush.msrb.mxu2 %v2973_v45  ;;  %v2972_v54 = vld [vmem:[%s4938_s7 + $0x210] sm:$0xff] }
 0xb09   :  { %1830 = vmatpush.msra.mxu3 %v2996_v27 }
 0xb0a   :  { %v1561_v59 = vsel %vm1553_vm3, %v1557_v55, %v1549_v39  ;;  %v1546_v52 = vmul.f32 %v3137_v38, %v1526_v58  ;;  %v2956_v39 = vld [vmem:[%s4938_s7 + $0x190] sm:$0xff]  ;;  %v2955_v58 = vld [vmem:[%s4938_s7 + $0x188] sm:$0xff]  ;;  %1793 = vmatpush.msrb.mxu2 %v2972_v54 }
 0xb0b   :  { %v1565_v62 = vadd.f32 1.0, %v1561_v59  ;;  %1831 = vmatpush.msra.mxu3 %v2995_v31  ;;  %v2988_v55 = vld [vmem:[%s4938_s7 + $0x290] sm:$0xff]  ;;  %v2971_v38 = vld [vmem:[%s4938_s7 + $0x208] sm:$0xff]  ;;  %1748 = vmatpush.msra.mxu1 %v2956_v39 }
 0xb0c   :  { %v1550_v2 = vsub.f32 1.0, %v1546_v52  ;;  %v2987_v59 = vld [vmem:[%s4938_s7 + $0x288] sm:$0xff]  ;;  %1794 = vmatpush.msrb.mxu2 %v2971_v38 }
 0xb0d   :  { %v1569_v44 = vmul.f32 %v1565_v62, %v1413_v61  ;;  %1832 = vmatpush.msra.mxu3 %v2994_v35  ;;  %v2954_v61 = vld [vmem:[%s4938_s7 + $0x180] sm:$0xff]  ;;  %1749 = vmatpush.msra.mxu1 %v2955_v58 }
 0xb0e   :  { %v1558_v3 = vsub.f32 0.0, %v1550_v2  ;;  %v2970_v62 = vld [vmem:[%s4938_s7 + $0x200] sm:$0xff] }
 0xb0f   :  { %1626 = vmatmul.f32.gmra.mxu3 %v1569_v44  ;;  %v2986_v44 = vld [vmem:[%s4938_s7 + $0x280] sm:$0xff]  ;;  %1750 = vmatpush.msra.mxu1 %v2954_v61 }
 0xb10   :  { %v1562_v53 = vsel %vm1554_vm4, %v1558_v3, %v1550_v2  ;;  %1833 = vmatpush.msra.mxu3 %v2993_v40  ;;  %1795 = vmatpush.msrb.mxu2 %v2970_v62 }
 0xb11   :  { %v1566_v5 = vadd.f32 1.0, %v1562_v53 }
 0xb12   :  { %1834 = vmatpush.msra.mxu3 %v2992_v43 }
 0xb13   :  { %v1570_v7 = vmul.f32 %v1566_v5, %v1414_v4 }
 0xb14   :  { %1835 = vmatpush.msra.mxu3 %v2991_v46 }
 0xb15   :  { %1649 = vmatmul.f32.gmra.mxu0 %v1570_v7 }
 0xb16   :  { %1836 = vmatpush.msra.mxu3 %v2990_v56 }
 0xb18   :  { %1837 = vmatpush.msra.mxu3 %v2989_v23 }
 0xb1a   :  { %1838 = vmatpush.msra.mxu3 %v2988_v55 }
 0xb1c   :  { %v1661_v8 = vpop.xlane.xlu0 %1660  ;;  %1839 = vmatpush.msra.mxu3 %v2987_v59 }
 0xb1d   :  { %v1665_v32 = vmul.f32 %v1661_v8, %v4083_v20 }
 0xb1e   :  { %1840 = vmatpush.msra.mxu3 %v2986_v44 }
 0xb1f   :  { %v4477_v9 = vsub.f32 %v4451_v57, %v1665_v32 }
 0xb21   :  { %v1669_v6 = vmul.f32 %v4477_v9, %v4477_v9 }
 0xb23   :  { %v1671_v42 = vsel %vm524_vm0, %v1669_v6, 0.0 }
 0xb24   :  { %1672 = vadd.xlane.f32.xlu1 %v1671_v42 }
 0xb92   :  { %v1627_v52 = vpop.f32.mrf.mxu3  ;;  %v1650_v3 = vpop.f32.mrf.mxu0 }
 0xb93   :  { %v1628_v2 = vadd.f32 %v4447_v51, %v1627_v52 }
 0xb95   :  { %v1651_v53 = vadd.f32 %v1650_v3, %v1628_v2 }
 0xb97   :  { %v4628_v4 = vadd.f32 %v1651_v53, %v4390_v15  ;;  %v1673_v5 = vpop.xlane.xlu1 %1672  ;;  %v3076_v15 = vld [vmem:[#allocation5 + $0x1] ss:$0 sm:$0xff] }
 0xb98   :  { %v1677_v7 = vmul.f32 %v1673_v5, %v4083_v20 }
 0xb99   :  { %v1662_v51 = vsel %vm524_vm0, %v4628_v4, 0.0 }
 0xb9a   :  { %v1679_v8 = vadd.f32 1e-06, %v1677_v7  ;;  %1663 = vadd.xlane.f32.xlu2 %v1662_v51 }
 0xb9c   :  { %3138 = vrsqrt.f32 %v1679_v8  ;;  %vm1687_vm7 = vweird.f32 %v1679_v8 }
 0xba2   :  { %v3139_v32 = vpop.eup %3138 }
 0xba3   :  { %v1682_v6 = vmul.f32 %v3139_v32, %v1679_v8  ;;  %vm1688_vm6 = vweird.f32 %v3139_v32 }
 0xba4   :  { %vm1689_vm11 = vmor %vm1687_vm7, %vm1688_vm6 }
 0xba5   :  { %v1683_v42 = vmul.f32 %v3139_v32, %v1682_v6 }
 0xba7   :  { %v1684_v0 = vmul.f32 0.5, %v1683_v42 }
 0xba9   :  { %v1685_v37 = vsub.f32 1.5, %v1684_v0 }
 0xbab   :  { %v1686_v24 = vmul.f32 %v3139_v32, %v1685_v37 }
 0xbad   :  { %v1690_v10 = vsel %vm1689_vm11, %v3139_v32, %v1686_v24 }
 0xbae   :  { %v1701_v11 = vmul.f32 %v1690_v10, %v4477_v9  ;;  %v3079_v9 = vld [vmem:[#allocation11 + $0x4] ss:$0 sm:$0xff] }
 0xbb0   :  { %v1706_v13 = vmul.f32 %v3076_v15, %v1701_v11 }
 0xbb2   :  { %v1711_v14 = vadd.f32 %v3077_v12, %v1706_v13 }
 0xbb4   :  { %1751 = vmatmul.f32.vlgmr.msra.gmra.mxu1 %v1711_v14  ;;  %1796 = vmatmul.f32.vlgmr.msrb.gmra.mxu2 %v1711_v14 }
 0xbb5   :  { %1841 = vmatmul.f32.vlgmr.msra.gmra.mxu3 %v1711_v14 }
 0xc0d   :  { %v1664_v16 = vpop.xlane.xlu2 %1663 }
 0xc0e   :  { %v1666_v17 = vmul.f32 %v1664_v16, %v4083_v20 }
 0xc10   :  { %v1668_v18 = vsub.f32 %v4628_v4, %v1666_v17 }
 0xc12   :  { %v1670_v19 = vmul.f32 %v1668_v18, %v1668_v18 }
 0xc14   :  { %v1674_v21 = vsel %vm524_vm0, %v1670_v19, 0.0 }
 0xc15   :  { %1675 = vadd.xlane.f32.xlu0 %v1674_v21 }
 0xc31   :  { %v1752_v22 = vpop.f32.mrf.mxu1 }
 0xc32   :  { %v1753_v25 = vadd.f32 %v3078_v1, %v1752_v22 }
 0xc34   :  { %1928 = vrot.lane.b32.xlu1 %v1753_v25, %s3564_s6 }
 0xc37   :  { %v1797_v27 = vpop.f32.mrf.mxu2 }
 0xc38   :  { %v1798_v29 = vadd.f32 %v3079_v9, %v1797_v27  ;;  %v1842_v30 = vpop.f32.mrf.mxu3 }
 0xc39   :  { %v4641_v31 = vadd.f32 %v4638_v26, %v1842_v30 }
 0xc3a   :  { %2015 = vrot.lane.b32.xlu0 %v1798_v29, %s3565_s16  ;;  %1930 = vrot.lane.b32.xlu2 %v1798_v29, %s3564_s6 }
 0xc3b   :  { %3004 = vmatpush.msk.msra.mxu2 %vm778_vm8, %v4641_v31  ;;  %3002 = vmatpush.xpose.msk.msrb.mxu1 %vm721_vm9, %v1798_v29 }
 0xc42   :  { %2013 = vrot.lane.b32.xlu2 %v1753_v25, %s3565_s16 }
 0xc88   :  { %v1676_v33 = vpop.xlane.xlu0 %1675 }
 0xc89   :  { %v1678_v34 = vmul.f32 %v1676_v33, %v4083_v20 }
 0xc8b   :  { %v1680_v35 = vadd.f32 1e-06, %v1678_v34 }
 0xc8d   :  { %3140 = vrsqrt.f32 %v1680_v35  ;;  %vm1697_vm14 = vweird.f32 %v1680_v35 }
 0xc93   :  { %v3141_v36 = vpop.eup %3140 }
 0xc94   :  { %v1692_v50 = vmul.f32 %v3141_v36, %v1680_v35  ;;  %v1931_v40 = vpop.permute.xlu2 %1930  ;;  %vm1698_vm12 = vweird.f32 %v3141_v36 }
 0xc95   :  { %3006 = vmatpush.xpose.msk.msra.mxu1 %vm721_vm9, %v1931_v40  ;;  %vm1699_vm2 = vmor %vm1697_vm14, %vm1698_vm12 }
 0xc96   :  { %v1693_v41 = vmul.f32 %v3141_v36, %v1692_v50 }
 0xc98   :  { %v1694_v47 = vmul.f32 0.5, %v1693_v41 }
 0xc9a   :  { %v1695_v43 = vsub.f32 1.5, %v1694_v47 }
 0xc9c   :  { %v1696_v63 = vmul.f32 %v3141_v36, %v1695_v43  ;;  %v2014_v49 = vpop.permute.xlu2 %2013 }
 0xc9e   :  { %v1700_v28 = vsel %vm1699_vm2, %v3141_v36, %v1696_v63 }
 0xc9f   :  { %v1702_v46 = vmul.f32 %v1700_v28, %v1668_v18 }
 0xca1   :  { %v1707_v48 = vmul.f32 %v3076_v15, %v1702_v46 }
 0xca3   :  { %v1712_v60 = vadd.f32 %v3077_v12, %v1707_v48 }
 0xca5   :  { %1754 = vmatmul.f32.gmra.mxu1 %v1712_v60  ;;  %1799 = vmatmul.f32.gmra.mxu2 %v1712_v60 }
 0xca6   :  { %1844 = vmatmul.f32.gmra.mxu3 %v1712_v60  ;;  %v1929_v45 = vpop.permute.xlu1 %1928 }
 0xcac   :  { %v2016_v56 = vpop.permute.xlu0 %2015 }
 0xcad   :  { %3003 = vmatmul.msk.f32.vlgmr.msrb.gmra.mxu1 %vm721_vm9, %v1753_v25  ;;  %3010 = vmatpush.xpose.msk.msrb.mxu3 %vm721_vm9, %v2016_v56 }
 0xcb0   :  { %3011 = vmatmul.msk.f32.vlgmr.msrb.gmra.mxu3 %vm721_vm9, %v2014_v49 }
 0xcb5   :  { %3007 = vmatmul.msk.f32.vlgmr.msra.gmra.mxu1 %vm721_vm9, %v1929_v45 }
 0xd22   :  { %v1755_v23 = vpop.f32.mrf.mxu1 }
 0xd23   :  { %v1756_v39 = vadd.f32 %v3078_v1, %v1755_v23 }
 0xd25   :  { %2176 = vrot.lane.b32.xlu2 %v1756_v39, %s3564_s6 }
 0xd28   :  { %v1800_v54 = vpop.f32.mrf.mxu2 }
 0xd29   :  { %v1801_v55 = vadd.f32 %v3079_v9, %v1800_v54  ;;  %v4661_v52 = vpop.f32.mrf.mxu3 }
 0xd2a   :  { %v1873_v58 = vpop.f32.mrf.mxu1  ;;  %v1846_v23 = vadd.f32 %v4638_v26, %v4661_v52 }
 0xd2b   :  { %2263 = vrot.lane.b32.xlu1 %v1801_v55, %s3565_s16  ;;  %2178 = vrot.lane.b32.xlu0 %v1801_v55, %s3564_s6  ;;  %v1876_v62 = vmul.f32 0.25, %v1873_v58 }
 0xd2c   :  { %3014 = vmatpush.xpose.msk.msrb.mxu1 %vm721_vm9, %v1801_v55 }
 0xd2d   :  { %v1877_v2 = vsel %vm749_vm10, %v1876_v62, -inf }
 0xd2f   :  { %3015 = vmatmul.msk.f32.vlgmr.msrb.gmra.mxu1 %vm721_vm9, %v1756_v39 }
 0xd32   :  { %v1953_v38 = vpop.f32.mrf.mxu1 }
 0xd33   :  { %2261 = vrot.lane.b32.xlu0 %v1756_v39, %s3565_s16  ;;  %v1956_v59 = vmul.f32 0.25, %v1953_v38  ;;  %v2038_v44 = vpop.f32.mrf.mxu3 }
 0xd34   :  { %v2041_v3 = vmul.f32 0.25, %v2038_v44 }
 0xd35   :  { %v1957_v61 = vsel %vm749_vm10, %v1956_v59, -inf }
 0xd36   :  { %v2042_v53 = vsel %vm749_vm10, %v2041_v3, -inf }
 0xd4e   :  { %1958 = vmax.xlane.f32.xlu2 %v1957_v61 }
 0xd55   :  { %1878 = vmax.xlane.f32.xlu1 %v1877_v2 }
 0xd5d   :  { %2043 = vmax.xlane.f32.xlu1 %v2042_v53 }
 0xd7f   :  { %v2177_v51 = vpop.permute.xlu2 %2176 }
 0xd9d   :  { %v2264_v5 = vpop.permute.xlu1 %2263  ;;  %v2179_v7 = vpop.permute.xlu0 %2178 }
 0xd9e   :  { %3018 = vmatpush.xpose.msk.msra.mxu3 %vm721_vm9, %v2179_v7  ;;  %3022 = vmatpush.xpose.msk.msra.mxu1 %vm721_vm9, %v2264_v5 }
 0xda1   :  { %3019 = vmatmul.msk.f32.vlgmr.msra.gmra.mxu3 %vm721_vm9, %v2177_v51 }
 0xda5   :  { %v2262_v8 = vpop.permute.xlu0 %2261 }
 0xda6   :  { %3023 = vmatmul.msk.f32.vlgmr.msra.gmra.mxu1 %vm721_vm9, %v2262_v8 }
 0xdac   :  { %v2121_v32 = vpop.f32.mrf.mxu1 }
 0xdad   :  { %v2124_v6 = vmul.f32 0.25, %v2121_v32 }
 0xdaf   :  { %v2125_v42 = vsel %vm749_vm10, %v2124_v6, -inf }
 0xdb0   :  { %2126 = vmax.xlane.f32.xlu0 %v2125_v42 }
 0xdc1   :  { %v1959_v17 = vpop.xlane.xlu2 %1958 }
 0xdc2   :  { %v1960_v18 = vsub.f32 %v1956_v59, %v1959_v17 }
 0xdc4   :  { %v1961_v19 = vmul.f32 1.442695, %v1960_v18 }
 0xdc8   :  { %v1879_v0 = vpop.xlane.xlu1 %1878 }
 0xdc9   :  { %v1880_v37 = vsub.f32 %v1876_v62, %v1879_v0 }
 0xdcb   :  { %v1881_v24 = vmul.f32 1.442695, %v1880_v37 }
 0xdcd   :  { %3142 = vpow2.f32 %v1881_v24 }
 0xdd0   :  { %v2044_v15 = vpop.xlane.xlu1 %2043 }
 0xdd1   :  { %v2045_v10 = vsub.f32 %v2041_v3, %v2044_v15 }
 0xdd3   :  { %v3143_v11 = vpop.eup %3142  ;;  %v2046_v12 = vmul.f32 1.442695, %v2045_v10 }
 0xdd4   :  { %v1883_v13 = vsel %vm749_vm10, %v3143_v11, 0.0 }
 0xdd5   :  { %3144 = vpow2.f32 %v2046_v12  ;;  %1884 = vadd.xlane.f32.xlu1 %v1883_v13 }
 0xdd6   :  { %3146 = vpow2.f32 %v1961_v19 }
 0xddb   :  { %v4672_v14 = vpop.eup %3144 }
 0xddc   :  { %v2048_v16 = vsel %vm749_vm10, %v4672_v14, 0.0  ;;  %v4678_v29 = vpop.eup %3146 }
 0xddd   :  { %2049 = vadd.xlane.f32.xlu1 %v2048_v16  ;;  %v1963_v30 = vsel %vm749_vm10, %v4678_v29, 0.0 }
 0xe23   :  { %v2286_v21 = vpop.f32.mrf.mxu1  ;;  %v2127_v36 = vpop.xlane.xlu0 %2126 }
 0xe24   :  { %v2289_v1 = vmul.f32 0.25, %v2286_v21  ;;  %v2201_v22 = vpop.f32.mrf.mxu3  ;;  %v2128_v41 = vsub.f32 %v2124_v6, %v2127_v36 }
 0xe25   :  { %v2204_v25 = vmul.f32 0.25, %v2201_v22 }
 0xe26   :  { %v2290_v9 = vsel %vm749_vm10, %v2289_v1, -inf  ;;  %v2129_v46 = vmul.f32 1.442695, %v2128_v41 }
 0xe27   :  { %2291 = vmax.xlane.f32.xlu2 %v2290_v9  ;;  %v2205_v27 = vsel %vm749_vm10, %v2204_v25, -inf }
 0xe28   :  { %2206 = vmax.xlane.f32.xlu0 %v2205_v27 }
 0xe2f   :  { %1964 = vadd.xlane.f32.xlu2 %v1963_v30 }
 0xe3c   :  { %1981 = vrot.lane.b32.xlu0 %v4641_v31, %s3564_s6 }
 0xe48   :  { %v1885_v33 = vpop.xlane.xlu1 %1884 }
 0xe49   :  { %3148 = vrcp.f32 %v1885_v33  ;;  %v1897_v40 = vand.u32 2147483648, %v1885_v33  ;;  %v1895_v43 = vand.u32 2147483647, %v1885_v33  ;;  %vm1891_vm3 = vweird.f32 %v1885_v33 }
 0xe4a   :  { %3150 = vpow2.f32 %v2129_v46 }
 0xe4b   :  { %v1898_v28 = vor.u32 1.1754944e-38, %v1897_v40  ;;  %vm1896_vm6 = vcmp.eq.f32.partialorder %v1895_v43, 8.507059e+37 }
 0xe4f   :  { %v3149_v34 = vpop.eup %3148 }
 0xe50   :  { %v1887_v35 = vmul.f32 %v3149_v34, %v1885_v33  ;;  %vm1892_vm9 = vweird.f32 %v3149_v34  ;;  %v3151_v49 = vpop.eup %3150  ;;  %v2050_v22 = vpop.xlane.xlu1 %2049 }
 0xe51   :  { %vm1893_vm4 = vmor %vm1891_vm3, %vm1892_vm9  ;;  %v2131_v45 = vsel %vm749_vm10, %v3151_v49, 0.0  ;;  %v2062_v33 = vand.u32 2147483648, %v2050_v22 }
 0xe52   :  { %v1888_v50 = vsub.f32 1.0, %v1887_v35 }
 0xe53   :  { %v2063_v40 = vor.u32 1.1754944e-38, %v2062_v33 }
 0xe54   :  { %v1889_v47 = vmul.f32 %v3149_v34, %v1888_v50 }
 0xe56   :  { %v1890_v63 = vadd.f32 %v3149_v34, %v1889_v47 }
 0xe58   :  { %v1894_v48 = vsel %vm1893_vm4, %v3149_v34, %v1890_v63  ;;  %v2060_v34 = vand.u32 2147483647, %v2050_v22 }
 0xe59   :  { %v1899_v60 = vsel %vm1896_vm6, %v1898_v28, %v1894_v48  ;;  %vm2056_vm6 = vweird.f32 %v2050_v22 }
 0xe5a   :  { %v1900_v56 = vmul.f32 %v3143_v11, %v1899_v60 }
 0xe5c   :  { %3005 = vmatmul.msk.f32.vlgmr.msra.gmra.mxu2 %vm774_vm15, %v1900_v56 }
 0xe66   :  { %2132 = vadd.xlane.f32.xlu0 %v2131_v45 }
 0xe7a   :  { %2229 = vrot.lane.b32.xlu0 %v1846_v23, %s3564_s6 }
 0xe9a   :  { %v2292_v39 = vpop.xlane.xlu2 %2291 }
 0xe9b   :  { %v2293_v54 = vsub.f32 %v2289_v1, %v2292_v39  ;;  %v2207_v55 = vpop.xlane.xlu0 %2206 }
 0xe9c   :  { %v2208_v58 = vsub.f32 %v2204_v25, %v2207_v55 }
 0xe9d   :  { %v2294_v38 = vmul.f32 1.442695, %v2293_v54 }
 0xe9e   :  { %v2209_v59 = vmul.f32 1.442695, %v2208_v58 }
 0xe9f   :  { %3152 = vpow2.f32 %v2294_v38 }
 0xea0   :  { %3154 = vpow2.f32 %v2209_v59 }
 0xea2   :  { %v1965_v61 = vpop.xlane.xlu2 %1964 }
 0xea3   :  { %3156 = vrcp.f32 %v1965_v61  ;;  %v1977_v5 = vand.u32 2147483648, %v1965_v61  ;;  %v1975_v51 = vand.u32 2147483647, %v1965_v61  ;;  %vm1971_vm11 = vweird.f32 %v1965_v61 }
 0xea5   :  { %v4689_v62 = vpop.eup %3152  ;;  %v1978_v6 = vor.u32 1.1754944e-38, %v1977_v5  ;;  %vm1976_vm14 = vcmp.eq.f32.partialorder %v1975_v51, 8.507059e+37 }
 0xea6   :  { %v4691_v2 = vpop.eup %3154  ;;  %v2296_v44 = vsel %vm749_vm10, %v4689_v62, 0.0 }
 0xea7   :  { %2297 = vadd.xlane.f32.xlu2 %v2296_v44  ;;  %v2211_v26 = vsel %vm749_vm10, %v4691_v2, 0.0 }
 0xea8   :  { %2212 = vadd.xlane.f32.xlu1 %v2211_v26 }
 0xea9   :  { %v3157_v52 = vpop.eup %3156 }
 0xeaa   :  { %v1967_v3 = vmul.f32 %v3157_v52, %v1965_v61  ;;  %vm1972_vm7 = vweird.f32 %v3157_v52 }
 0xeab   :  { %vm1973_vm12 = vmor %vm1971_vm11, %vm1972_vm7  ;;  %vm2061_vm11 = vcmp.eq.f32.partialorder %v2060_v34, 8.507059e+37 }
 0xeac   :  { %v1968_v53 = vsub.f32 1.0, %v1967_v3 }
 0xeae   :  { %v1969_v7 = vmul.f32 %v3157_v52, %v1968_v53  ;;  %v1982_v8 = vpop.permute.xlu0 %1981 }
 0xeaf   :  { %3008 = vmatpush.msk.msrb.mxu2 %vm778_vm8, %v1982_v8 }
 0xeb0   :  { %v1970_v32 = vadd.f32 %v3157_v52, %v1969_v7 }
 0xeb1   :  { %3016 = vmatpush.msk.msra.mxu2 %vm778_vm8, %v1846_v23 }
 0xeb2   :  { %v1974_v42 = vsel %vm1973_vm12, %v3157_v52, %v1970_v32  ;;  %v3040_v32 = vld [vmem:[%s4940_s9 + $0xf0] sm:$0xff] }
 0xeb3   :  { %v1979_v0 = vsel %vm1976_vm14, %v1978_v6, %v1974_v42  ;;  %v3038_v6 = vld [vmem:[%s4940_s9 + $0xe0] sm:$0xff]  ;;  %v3037_v42 = vld [vmem:[%s4940_s9 + $0xd8] sm:$0xff] }
 0xeb4   :  { %v1980_v37 = vmul.f32 %v4678_v29, %v1979_v0 }
 0xeb6   :  { %3009 = vmatmul.msk.f32.vlgmr.msrb.gmra.mxu2 %vm774_vm15, %v1980_v37  ;;  %v3036_v37 = vld [vmem:[%s4940_s9 + $0xd0] sm:$0xff] }
 0xebf   :  { %2066 = vrot.lane.b32.xlu2 %v4641_v31, %s3565_s16 }
 0xec1   :  { %2314 = vrot.lane.b32.xlu1 %v1846_v23, %s3565_s16 }
 0xed9   :  { %v2133_v24 = vpop.xlane.xlu0 %2132 }
 0xeda   :  { %3158 = vrcp.f32 %v2133_v24  ;;  %v2145_v13 = vand.u32 2147483648, %v2133_v24  ;;  %v2143_v17 = vand.u32 2147483647, %v2133_v24  ;;  %vm2139_vm2 = vweird.f32 %v2133_v24 }
 0xedb   :  { %3160 = vrcp.f32 %v2050_v22 }
 0xedc   :  { %v2146_v19 = vor.u32 1.1754944e-38, %v2145_v13  ;;  %vm2144_vm3 = vcmp.eq.f32.partialorder %v2143_v17, 8.507059e+37  ;;  %v3030_v17 = vld [vmem:[%s4940_s9 + $0xa0] sm:$0xff] }
 0xedf   :  { %v1924_v15 = vpop.f32.mrf.mxu2 }
 0xee0   :  { %v3159_v10 = vpop.eup %3158  ;;  %1927 = vst.msk [vmem:[#allocation2] sm:$0x1f] %vm802_vm5, %v1924_v15  ;;  %v3034_v15 = vld [vmem:[%s4940_s9 + $0xc0] sm:$0xff] }
 0xee1   :  { %v2135_v11 = vmul.f32 %v3159_v10, %v2133_v24  ;;  %vm2140_vm10 = vweird.f32 %v3159_v10  ;;  %v3161_v25 = vpop.eup %3160  ;;  %v3035_v24 = vld [vmem:[%s4940_s9 + $0xc8] sm:$0xff] }
 0xee2   :  { %vm2141_vm9 = vmor %vm2139_vm2, %vm2140_vm10  ;;  %v2052_v9 = vmul.f32 %v3161_v25, %v2050_v22  ;;  %vm2057_vm4 = vweird.f32 %v3161_v25 }
 0xee3   :  { %v2136_v12 = vsub.f32 1.0, %v2135_v11  ;;  %vm2058_vm7 = vmor %vm2056_vm6, %vm2057_vm4  ;;  %v3032_v11 = vld [vmem:[%s4940_s9 + $0xb0] sm:$0xff] }
 0xee4   :  { %v2053_v27 = vsub.f32 1.0, %v2052_v9 }
 0xee5   :  { %v2137_v16 = vmul.f32 %v3159_v10, %v2136_v12  ;;  %v3031_v12 = vld [vmem:[%s4940_s9 + $0xa8] sm:$0xff] }
 0xee6   :  { %v2054_v29 = vmul.f32 %v3161_v25, %v2053_v27 }
 0xee7   :  { %v2138_v18 = vadd.f32 %v3159_v10, %v2137_v16 }
 0xee8   :  { %v2055_v30 = vadd.f32 %v3161_v25, %v2054_v29 }
 0xee9   :  { %v2142_v21 = vsel %vm2141_vm9, %v3159_v10, %v2138_v18  ;;  %v3033_v10 = vld [vmem:[%s4940_s9 + $0xb8] sm:$0xff] }
 0xeea   :  { %v2147_v31 = vsel %vm2144_vm3, %v2146_v19, %v2142_v21  ;;  %v2059_v50 = vsel %vm2058_vm7, %v3161_v25, %v2055_v30  ;;  %v3029_v19 = vld [vmem:[%s4940_s9 + $0x98] sm:$0xff]  ;;  %v3028_v21 = vld [vmem:[%s4940_s9 + $0x90] sm:$0xff]  ;;  %v3081_v30 = vld [vmem:[#allocation13 + $0x1] ss:$0 sm:$0xff] }
 0xeeb   :  { %v2148_v1 = vmul.f32 %v3151_v49, %v2147_v31  ;;  %v2064_v41 = vsel %vm2061_vm11, %v2063_v40, %v2059_v50  ;;  %v3027_v31 = vld [vmem:[%s4940_s9 + $0x88] sm:$0xff] }
 0xeec   :  { %v2065_v46 = vmul.f32 %v4672_v14, %v2064_v41  ;;  %v2230_v60 = vpop.permute.xlu0 %2229 }
 0xeed   :  { %3017 = vmatmul.msk.f32.vlgmr.msra.gmra.mxu2 %vm774_vm15, %v2148_v1  ;;  %v3026_v1 = vld [vmem:[%s4940_s9 + $0x80] sm:$0xff] }
 0xf1a   :  { %v2298_v35 = vpop.xlane.xlu2 %2297 }
 0xf1b   :  { %3162 = vrcp.f32 %v2298_v35  ;;  %v2213_v36 = vpop.xlane.xlu1 %2212  ;;  %v2310_v14 = vand.u32 2147483648, %v2298_v35  ;;  %vm2304_vm9 = vweird.f32 %v2298_v35  ;;  %v2308_v59 = vand.u32 2147483647, %v2298_v35 }
 0xf1c   :  { %3164 = vrcp.f32 %v2213_v36  ;;  %v2225_v23 = vand.u32 2147483648, %v2213_v36  ;;  %v2223_v54 = vand.u32 2147483647, %v2213_v36  ;;  %vm2219_vm10 = vweird.f32 %v2213_v36 }
 0xf1d   :  { %v2311_v3 = vor.u32 1.1754944e-38, %v2310_v14  ;;  %vm2309_vm6 = vcmp.eq.f32.partialorder %v2308_v59, 8.507059e+37  ;;  %v2478_v14 = vld [vmem:[#allocation14 + $0x1c0] sm:$0xff]  ;;  %v2476_v59 = vld [vmem:[#allocation14 + $0x1b0] sm:$0xff] }
 0xf1e   :  { %v2226_v38 = vor.u32 1.1754944e-38, %v2225_v23  ;;  %vm2224_vm3 = vcmp.eq.f32.partialorder %v2223_v54, 8.507059e+37 }
 0xf21   :  { %v3163_v47 = vpop.eup %3162 }
 0xf22   :  { %v3165_v43 = vpop.eup %3164  ;;  %v2300_v63 = vmul.f32 %v3163_v47, %v2298_v35  ;;  %v2067_v28 = vpop.permute.xlu2 %2066  ;;  %vm2305_vm14 = vweird.f32 %v3163_v47 }
 0xf23   :  { %v2215_v48 = vmul.f32 %v3165_v43, %v2213_v36  ;;  %3012 = vmatpush.msk.msrb.mxu0 %vm778_vm8, %v2067_v28  ;;  %vm2220_vm12 = vweird.f32 %v3165_v43  ;;  %vm2306_vm4 = vmor %vm2304_vm9, %vm2305_vm14 }
 0xf24   :  { %v2301_v56 = vsub.f32 1.0, %v2300_v63  ;;  %3013 = vmatmul.msk.f32.vlgmr.msrb.gmra.mxu0 %vm774_vm15, %v2065_v46  ;;  %vm2221_vm2 = vmor %vm2219_vm10, %vm2220_vm12 }
 0xf25   :  { %v2216_v49 = vsub.f32 1.0, %v2215_v48  ;;  %3020 = vmatpush.msk.msra.mxu0 %vm778_vm8, %v2230_v60  ;;  %v2484_v48 = vld [vmem:[#allocation14 + $0x1f0] sm:$0xff]  ;;  %v2485_v60 = vld [vmem:[#allocation14 + $0x1f8] sm:$0xff] }
 0xf26   :  { %v2302_v45 = vmul.f32 %v3163_v47, %v2301_v56  ;;  %2516 = vmatpush.msrb.mxu1 %v2485_v60  ;;  %v2483_v56 = vld [vmem:[#allocation14 + $0x1e8] sm:$0xff] }
 0xf27   :  { %v2217_v39 = vmul.f32 %v3165_v43, %v2216_v49  ;;  %2493 = vmatpush.msrb.mxu0 %v2484_v48 }
 0xf28   :  { %v2303_v55 = vadd.f32 %v3163_v47, %v2302_v45  ;;  %2517 = vmatpush.msrb.mxu1 %v2483_v56 }
 0xf29   :  { %v2218_v58 = vadd.f32 %v3165_v43, %v2217_v39 }
 0xf2a   :  { %v2307_v26 = vsel %vm2306_vm4, %v3163_v47, %v2303_v55  ;;  %v2480_v55 = vld [vmem:[#allocation14 + $0x1d0] sm:$0xff] }
 0xf2b   :  { %v2222_v61 = vsel %vm2221_vm2, %v3165_v43, %v2218_v58  ;;  %v2312_v53 = vsel %vm2309_vm6, %v2311_v3, %v2307_v26  ;;  %v2481_v58 = vld [vmem:[#allocation14 + $0x1d8] sm:$0xff]  ;;  %v2475_v26 = vld [vmem:[#allocation14 + $0x1a8] sm:$0xff] }
 0xf2c   :  { %v2227_v44 = vsel %vm2224_vm3, %v2226_v38, %v2222_v61  ;;  %v2313_v7 = vmul.f32 %v4689_v62, %v2312_v53  ;;  %v3039_v62 = vld [vmem:[%s4940_s9 + $0xe8] sm:$0xff]  ;;  %2518 = vmatpush.msrb.mxu1 %v2481_v58  ;;  %v2479_v38 = vld [vmem:[#allocation14 + $0x1c8] sm:$0xff]  ;;  %v2470_v53 = vld [vmem:[#allocation14 + $0x180] sm:$0xff] }
 0xf2d   :  { %v2228_v52 = vmul.f32 %v4691_v2, %v2227_v44  ;;  %v3041_v2 = vld [vmem:[%s4940_s9 + $0xf8] sm:$0xff]  ;;  %v2477_v61 = vld [vmem:[#allocation14 + $0x1b8] sm:$0xff]  ;;  %v2474_v44 = vld [vmem:[#allocation14 + $0x1a0] sm:$0xff] }
 0xf2e   :  { %2370 = vmatpush.msrb.mxu3 %v3041_v2  ;;  %2519 = vmatpush.msrb.mxu1 %v2479_v38  ;;  %v2473_v3 = vld [vmem:[#allocation14 + $0x198] sm:$0xff]  ;;  %v2467_v2 = vld [vmem:[#allocation14 + $0x168] sm:$0xff] }
 0xf2f   :  { %3021 = vmatmul.msk.f32.vlgmr.msra.gmra.mxu0 %vm774_vm15, %v2228_v52  ;;  %v2472_v52 = vld [vmem:[#allocation14 + $0x190] sm:$0xff] }
 0xf30   :  { %2371 = vmatpush.msrb.mxu3 %v3040_v32  ;;  %2520 = vmatpush.msrb.mxu1 %v2477_v61  ;;  %v2464_v32 = vld [vmem:[#allocation14 + $0x150] sm:$0xff] }
 0xf31   :  { %v2714_v58 = vld [vmem:[#allocation17 + $0x170] sm:$0xff]  ;;  %v2713_v38 = vld [vmem:[#allocation17 + $0x168] sm:$0xff] }
 0xf32   :  { %2372 = vmatpush.msrb.mxu3 %v3039_v62  ;;  %2521 = vmatpush.msrb.mxu1 %v2475_v26  ;;  %v2465_v62 = vld [vmem:[#allocation14 + $0x158] sm:$0xff] }
 0xf33   :  { %v2315_v5 = vpop.permute.xlu1 %2314 }
 0xf34   :  { %3024 = vmatpush.msk.msrb.mxu2 %vm778_vm8, %v2315_v5  ;;  %2373 = vmatpush.msrb.mxu3 %v3038_v6  ;;  %v2471_v5 = vld [vmem:[#allocation14 + $0x188] sm:$0xff]  ;;  %v2462_v6 = vld [vmem:[#allocation14 + $0x140] sm:$0xff] }
 0xf35   :  { %3025 = vmatmul.msk.f32.vlgmr.msrb.gmra.mxu2 %vm774_vm15, %v2313_v7  ;;  %2522 = vmatpush.msrb.mxu1 %v2473_v3  ;;  %v2468_v7 = vld [vmem:[#allocation14 + $0x170] sm:$0xff]  ;;  %v2728_v3 = vld [vmem:[#allocation17 + $0x1e0] sm:$0xff] }
 0xf36   :  { %2374 = vmatpush.msrb.mxu3 %v3037_v42  ;;  %v2463_v42 = vld [vmem:[#allocation14 + $0x148] sm:$0xff] }
 0xf37   :  { %2523 = vmatpush.msrb.mxu1 %v2471_v5 }
 0xf38   :  { %2375 = vmatpush.msrb.mxu3 %v3036_v37  ;;  %v2461_v37 = vld [vmem:[#allocation14 + $0x138] sm:$0xff] }
 0xf39   :  { %v2005_v51 = vpop.f32.mrf.mxu2 }
 0xf3a   :  { %2009 = vrot.lane.b32.xlu0 %v2005_v51, %s3543_s25  ;;  %2376 = vmatpush.msrb.mxu3 %v3035_v24  ;;  %v2469_v51 = vld [vmem:[#allocation14 + $0x178] sm:$0xff]  ;;  %v2458_v24 = vld [vmem:[#allocation14 + $0x120] sm:$0xff] }
 0xf3b   :  { %2524 = vmatpush.msrb.mxu1 %v2469_v51  ;;  %v2727_v51 = vld [vmem:[#allocation17 + $0x1d8] sm:$0xff] }
 0xf3c   :  { %2377 = vmatpush.msrb.mxu3 %v3034_v15  ;;  %v2459_v15 = vld [vmem:[#allocation14 + $0x128] sm:$0xff] }
 0xf3d   :  { %2525 = vmatpush.msrb.mxu1 %v2467_v2 }
 0xf3e   :  { %2378 = vmatpush.msrb.mxu3 %v3033_v10  ;;  %v2456_v10 = vld [vmem:[#allocation14 + $0x110] sm:$0xff] }
 0xf3f   :  { %2526 = vmatpush.msrb.mxu1 %v2465_v62  ;;  %v2726_v62 = vld [vmem:[#allocation17 + $0x1d0] sm:$0xff] }
 0xf40   :  { %2379 = vmatpush.msrb.mxu3 %v3032_v11  ;;  %v2457_v11 = vld [vmem:[#allocation14 + $0x118] sm:$0xff] }
 0xf41   :  { %2527 = vmatpush.msrb.mxu1 %v2463_v42 }
 0xf42   :  { %2380 = vmatpush.msrb.mxu3 %v3031_v12  ;;  %v2454_v12 = vld [vmem:[#allocation14 + $0x100] sm:$0xff] }
 0xf43   :  { %2528 = vmatpush.msrb.mxu1 %v2461_v37  ;;  %v2725_v37 = vld [vmem:[#allocation17 + $0x1c8] sm:$0xff] }
 0xf44   :  { %2381 = vmatpush.msrb.mxu3 %v3030_v17 }
 0xf45   :  { %2529 = vmatpush.msrb.mxu1 %v2459_v15 }
 0xf46   :  { %2382 = vmatpush.msrb.mxu3 %v3029_v19 }
 0xf47   :  { %2530 = vmatpush.msrb.mxu1 %v2457_v11  ;;  %v2724_v11 = vld [vmem:[#allocation17 + $0x1c0] sm:$0xff] }
 0xf48   :  { %2383 = vmatpush.msrb.mxu3 %v3028_v21 }
 0xf4a   :  { %2384 = vmatpush.msrb.mxu3 %v3027_v31 }
 0xf4c   :  { %2385 = vmatpush.msrb.mxu3 %v3026_v1 }
 0xf70   :  { %v2172_v8 = vpop.f32.mrf.mxu2 }
 0xf71   :  { %2175 = vst.msk [vmem:[#allocation2 + $0x8] sm:$0x1f] %vm802_vm5, %v2172_v8  ;;  %v2466_v8 = vld [vmem:[#allocation14 + $0x160] sm:$0xff] }
 0xfa1   :  { %v2090_v0 = vpop.f32.mrf.mxu0 }
 0xfa2   :  { %2094 = vrot.lane.b32.xlu2 %v2090_v0, %s3558_s23  ;;  %v2460_v0 = vld [vmem:[#allocation14 + $0x130] sm:$0xff] }
 0xfac   :  { %v2253_v13 = vpop.f32.mrf.mxu0  ;;  %v2010_v16 = vpop.permute.xlu0 %2009 }
 0xfad   :  { %2012 = vst.msk [vmem:[#allocation2] sm:$0x1f] %vm888_vm13, %v2010_v16  ;;  %2257 = vrot.lane.b32.xlu0 %v2253_v13, %s3543_s25  ;;  %v2455_v13 = vld [vmem:[#allocation14 + $0x108] sm:$0xff] }
 0xfae   :  { %2531 = vmatpush.msrb.mxu1 %v2455_v13  ;;  %v2723_v13 = vld [vmem:[#allocation17 + $0x1b8] sm:$0xff] }
 0xfb8   :  { %v2338_v18 = vpop.f32.mrf.mxu2 }
 0xfb9   :  { %2342 = vrot.lane.b32.xlu1 %v2338_v18, %s3558_s23 }
 0xffc   :  { %v2095_v22 = vpop.permute.xlu2 %2094 }
 0xffd   :  { %2097 = vst.msk [vmem:[#allocation2] sm:$0x1f] %vm974_vm1, %v2095_v22 }
0x1004   :  { %v2346_v25 = vld [vmem:[#allocation2] sm:$0xff] }
0x1005   :  { %2386 = vmatmul.f32.vlgmr.msrb.gmra.mxu3 %v2346_v25 }
0x101f   :  { %v2258_v9 = vpop.permute.xlu0 %2257 }
0x1020   :  { %2260 = vst.msk [vmem:[#allocation2 + $0x8] sm:$0x1f] %vm888_vm13, %v2258_v9  ;;  %v3082_v9 = vld [vmem:[#allocation8 + $0x1] ss:$0 sm:$0xff] }
0x102b   :  { %v2343_v27 = vpop.permute.xlu1 %2342 }
0x102c   :  { %2345 = vst.msk [vmem:[#allocation2 + $0x8] sm:$0x1f] %vm974_vm1, %v2343_v27 }
0x1033   :  { %v2347_v29 = vld [vmem:[#allocation2 + $0x8] sm:$0xff] }
0x1034   :  { %2389 = vmatmul.f32.gmra.mxu3 %v2347_v29 }
0x1088   :  { %v2387_v33 = vpop.f32.mrf.mxu3 }
0x1089   :  { %v2388_v34 = vadd.f32 %v3081_v30, %v2387_v33 }
0x108b   :  { %v4773_v35 = vadd.f32 %v2388_v34, %v4451_v57 }
0x108d   :  { %v2399_v36 = vsel %vm524_vm0, %v4773_v35, 0.0 }
0x108e   :  { %2400 = vadd.xlane.f32.xlu2 %v2399_v36 }
0x10b7   :  { %v2390_v50 = vpop.f32.mrf.mxu3 }
0x10b8   :  { %v2391_v40 = vadd.f32 %v3081_v30, %v2390_v50  ;;  %v3083_v30 = vld [vmem:[#allocation10 + $0x1] ss:$0 sm:$0xff] }
0x10ba   :  { %v4778_v41 = vadd.f32 %v2391_v40, %v4628_v4  ;;  %v2482_v4 = vld [vmem:[#allocation14 + $0x1e0] sm:$0xff] }
0x10bb   :  { %2494 = vmatpush.msrb.mxu0 %v2482_v4 }
0x10bc   :  { %v2402_v47 = vsel %vm524_vm0, %v4778_v41, 0.0 }
0x10bd   :  { %2403 = vadd.xlane.f32.xlu0 %v2402_v47  ;;  %2495 = vmatpush.msrb.mxu0 %v2480_v55 }
0x10bf   :  { %2496 = vmatpush.msrb.mxu0 %v2478_v14  ;;  %v2730_v14 = vld [vmem:[#allocation17 + $0x1f0] sm:$0xff] }
0x10c1   :  { %2497 = vmatpush.msrb.mxu0 %v2476_v59 }
0x10c3   :  { %2498 = vmatpush.msrb.mxu0 %v2474_v44 }
0x10c5   :  { %2499 = vmatpush.msrb.mxu0 %v2472_v52  ;;  %v2712_v52 = vld [vmem:[#allocation17 + $0x160] sm:$0xff] }
0x10c7   :  { %2500 = vmatpush.msrb.mxu0 %v2470_v53 }
0x10c9   :  { %2501 = vmatpush.msrb.mxu0 %v2468_v7  ;;  %v2711_v7 = vld [vmem:[#allocation17 + $0x158] sm:$0xff] }
0x10cb   :  { %2502 = vmatpush.msrb.mxu0 %v2466_v8 }
0x10cd   :  { %2503 = vmatpush.msrb.mxu0 %v2464_v32  ;;  %v2710_v32 = vld [vmem:[#allocation17 + $0x150] sm:$0xff] }
0x10cf   :  { %2504 = vmatpush.msrb.mxu0 %v2462_v6 }
0x10d1   :  { %2505 = vmatpush.msrb.mxu0 %v2460_v0  ;;  %v2709_v0 = vld [vmem:[#allocation17 + $0x148] sm:$0xff] }
0x10d3   :  { %2506 = vmatpush.msrb.mxu0 %v2458_v24 }
0x10d5   :  { %2507 = vmatpush.msrb.mxu0 %v2456_v10  ;;  %v2708_v10 = vld [vmem:[#allocation17 + $0x140] sm:$0xff] }
0x10d7   :  { %2508 = vmatpush.msrb.mxu0 %v2454_v12  ;;  %v2707_v12 = vld [vmem:[#allocation17 + $0x138] sm:$0xff] }
0x1101   :  { %v2401_v43 = vpop.xlane.xlu2 %2400 }
0x1102   :  { %v2405_v63 = vmul.f32 %v2401_v43, %v4083_v20 }
0x1104   :  { %v4784_v28 = vsub.f32 %v4773_v35, %v2405_v63 }
0x1106   :  { %v2409_v57 = vmul.f32 %v4784_v28, %v4784_v28 }
0x1108   :  { %v2411_v46 = vsel %vm524_vm0, %v2409_v57, 0.0 }
0x1109   :  { %2412 = vadd.xlane.f32.xlu1 %v2411_v46 }
0x1130   :  { %v2404_v49 = vpop.xlane.xlu0 %2403 }
0x1131   :  { %v2406_v45 = vmul.f32 %v2404_v49, %v4083_v20  ;;  %v4800_v49 = vld [vmem:[#allocation16 + $0x2] sm:$0x3] }
0x1132   :  { %v2490_v55 = vperm.slane %v4800_v49, 1 }
0x1133   :  { %v4791_v23 = vsub.f32 %v4778_v41, %v2406_v45  ;;  %v2715_v45 = vld [vmem:[#allocation17 + $0x178] sm:$0xff] }
0x1134   :  { %2737 = vmatpush.msra.mxu2 %v2715_v45  ;;  %v2716_v45 = vld [vmem:[#allocation17 + $0x180] sm:$0xff] }
0x1135   :  { %v2410_v39 = vmul.f32 %v4791_v23, %v4791_v23 }
0x1136   :  { %2738 = vmatpush.msra.mxu2 %v2714_v58 }
0x1137   :  { %v2414_v54 = vsel %vm524_vm0, %v2410_v39, 0.0  ;;  %v2731_v39 = vld [vmem:[#allocation17 + $0x1f8] sm:$0xff] }
0x1138   :  { %2415 = vadd.xlane.f32.xlu2 %v2414_v54  ;;  %2760 = vmatpush.msra.mxu3 %v2731_v39  ;;  %v2489_v54 = vperm.slane %v4800_v49, 0 }
0x1139   :  { %2739 = vmatpush.msra.mxu2 %v2713_v38 }
0x113a   :  { %2761 = vmatpush.msra.mxu3 %v2730_v14 }
0x113b   :  { %2740 = vmatpush.msra.mxu2 %v2712_v52 }
0x113d   :  { %2741 = vmatpush.msra.mxu2 %v2711_v7 }
0x113f   :  { %2742 = vmatpush.msra.mxu2 %v2710_v32 }
0x1141   :  { %2743 = vmatpush.msra.mxu2 %v2709_v0 }
0x1143   :  { %2744 = vmatpush.msra.mxu2 %v2708_v10 }
0x1145   :  { %2745 = vmatpush.msra.mxu2 %v2707_v12 }
0x117c   :  { %v2413_v16 = vpop.xlane.xlu1 %2412 }
0x117d   :  { %v2417_v17 = vmul.f32 %v2413_v16, %v4083_v20  ;;  %v2706_v16 = vld [vmem:[#allocation17 + $0x130] sm:$0xff] }
0x117e   :  { %2746 = vmatpush.msra.mxu2 %v2706_v16 }
0x117f   :  { %v2419_v18 = vadd.f32 1e-06, %v2417_v17  ;;  %v2722_v17 = vld [vmem:[#allocation17 + $0x1b0] sm:$0xff] }
0x1181   :  { %3166 = vrsqrt.f32 %v2419_v18  ;;  %vm2427_vm15 = vweird.f32 %v2419_v18 }
0x1187   :  { %v3167_v19 = vpop.eup %3166 }
0x1188   :  { %v2422_v21 = vmul.f32 %v3167_v19, %v2419_v18  ;;  %vm2428_vm8 = vweird.f32 %v3167_v19  ;;  %v2705_v18 = vld [vmem:[#allocation17 + $0x128] sm:$0xff] }
0x1189   :  { %vm2429_vm5 = vmor %vm2427_vm15, %vm2428_vm8  ;;  %2747 = vmatpush.msra.mxu2 %v2705_v18 }
0x118a   :  { %v2423_v31 = vmul.f32 %v3167_v19, %v2422_v21 }
0x118c   :  { %v2424_v1 = vmul.f32 0.5, %v2423_v31  ;;  %v2704_v31 = vld [vmem:[#allocation17 + $0x120] sm:$0xff] }
0x118d   :  { %2748 = vmatpush.msra.mxu2 %v2704_v31 }
0x118e   :  { %v2425_v22 = vsub.f32 1.5, %v2424_v1  ;;  %v2720_v1 = vld [vmem:[#allocation17 + $0x1a0] sm:$0xff] }
0x1190   :  { %v2426_v25 = vmul.f32 %v3167_v19, %v2425_v22 }
0x1192   :  { %v2430_v27 = vsel %vm2429_vm5, %v3167_v19, %v2426_v25  ;;  %v2721_v19 = vld [vmem:[#allocation17 + $0x1a8] sm:$0xff] }
0x1193   :  { %v2441_v29 = vmul.f32 %v2430_v27, %v4784_v28  ;;  %v2703_v27 = vld [vmem:[#allocation17 + $0x118] sm:$0xff] }
0x1194   :  { %2749 = vmatpush.msra.mxu2 %v2703_v27 }
0x1195   :  { %v2446_v33 = vmul.f32 %v3082_v9, %v2441_v29  ;;  %v2719_v29 = vld [vmem:[#allocation17 + $0x198] sm:$0xff] }
0x1197   :  { %v2451_v34 = vadd.f32 %v3083_v30, %v2446_v33 }
0x1199   :  { %2509 = vmatmul.f32.vlgmr.msrb.gmra.mxu0 %v2451_v34  ;;  %2532 = vmatmul.f32.vlgmr.msrb.gmra.mxu1 %v2451_v34 }
0x11ab   :  { %v2416_v36 = vpop.xlane.xlu2 %2415 }
0x11ac   :  { %v2418_v50 = vmul.f32 %v2416_v36, %v4083_v20  ;;  %v2702_v36 = vld [vmem:[#allocation17 + $0x110] sm:$0xff] }
0x11ad   :  { %2750 = vmatpush.msra.mxu2 %v2702_v36 }
0x11ae   :  { %v2420_v40 = vadd.f32 1e-06, %v2418_v50  ;;  %v2718_v50 = vld [vmem:[#allocation17 + $0x190] sm:$0xff] }
0x11b0   :  { %3168 = vrsqrt.f32 %v2420_v40  ;;  %vm2437_vm1 = vweird.f32 %v2420_v40 }
0x11b6   :  { %v3169_v47 = vpop.eup %3168 }
0x11b7   :  { %v2432_v43 = vmul.f32 %v3169_v47, %v2420_v40  ;;  %vm2438_vm13 = vweird.f32 %v3169_v47 }
0x11b8   :  { %vm2439_vm7 = vmor %vm2437_vm1, %vm2438_vm13 }
0x11b9   :  { %v2433_v63 = vmul.f32 %v3169_v47, %v2432_v43 }
0x11bb   :  { %v2434_v57 = vmul.f32 0.5, %v2433_v63 }
0x11bd   :  { %v2435_v46 = vsub.f32 1.5, %v2434_v57 }
0x11bf   :  { %v2436_v48 = vmul.f32 %v3169_v47, %v2435_v46  ;;  %v2701_v46 = vld [vmem:[#allocation17 + $0x108] sm:$0xff] }
0x11c0   :  { %2751 = vmatpush.msra.mxu2 %v2701_v46 }
0x11c1   :  { %v2440_v28 = vsel %vm2439_vm7, %v3169_v47, %v2436_v48  ;;  %v2717_v48 = vld [vmem:[#allocation17 + $0x188] sm:$0xff] }
0x11c2   :  { %v2442_v60 = vmul.f32 %v2440_v28, %v4791_v23  ;;  %v2729_v23 = vld [vmem:[#allocation17 + $0x1e8] sm:$0xff] }
0x11c3   :  { %2762 = vmatpush.msra.mxu3 %v2729_v23 }
0x11c4   :  { %v2447_v4 = vmul.f32 %v3082_v9, %v2442_v60 }
0x11c5   :  { %2763 = vmatpush.msra.mxu3 %v2728_v3 }
0x11c6   :  { %v2452_v56 = vadd.f32 %v3083_v30, %v2447_v4 }
0x11c7   :  { %2764 = vmatpush.msra.mxu3 %v2727_v51 }
0x11c8   :  { %2512 = vmatmul.f32.gmra.mxu0 %v2452_v56  ;;  %2535 = vmatmul.f32.gmra.mxu1 %v2452_v56  ;;  %v2700_v56 = vld [vmem:[#allocation17 + $0x100] sm:$0xff] }
0x11c9   :  { %2765 = vmatpush.msra.mxu3 %v2726_v62  ;;  %2752 = vmatpush.msra.mxu2 %v2700_v56 }
0x11cb   :  { %2766 = vmatpush.msra.mxu3 %v2725_v37 }
0x11cd   :  { %2767 = vmatpush.msra.mxu3 %v2724_v11 }
0x11cf   :  { %2768 = vmatpush.msra.mxu3 %v2723_v13 }
0x11d1   :  { %2769 = vmatpush.msra.mxu3 %v2722_v17 }
0x11d3   :  { %2770 = vmatpush.msra.mxu3 %v2721_v19 }
0x11d5   :  { %2771 = vmatpush.msra.mxu3 %v2720_v1 }
0x11d7   :  { %2772 = vmatpush.msra.mxu3 %v2719_v29 }
0x11d9   :  { %2773 = vmatpush.msra.mxu3 %v2718_v50 }
0x11db   :  { %2774 = vmatpush.msra.mxu3 %v2717_v48 }
0x11dd   :  { %2775 = vmatpush.msra.mxu3 %v2716_v45 }
0x1216   :  { %v2510_v59 = vpop.f32.mrf.mxu0  ;;  %v2533_v61 = vpop.f32.mrf.mxu1 }
0x1217   :  { %v4806_v44 = vadd.f32 %v2510_v59, %v2489_v54  ;;  %v4810_v26 = vadd.f32 %v2533_v61, %v2490_v55 }
0x1219   :  { %v4813_v53 = vmul.f32 0.70710677, %v4806_v44  ;;  %v4816_v5 = vmul.f32 0.70710677, %v4810_v26  ;;  %v2539_v49 = vmul.f32 0.5, %v4806_v44 }
0x121b   :  { %v4819_v8 = vand.u32 2147483647, %v4813_v53  ;;  %v4822_v2 = vand.u32 2147483647, %v4816_v5  ;;  %vm2679_vm6 = vcmp.lt.f32.partialorder %v4813_v53, 0.0  ;;  %vm2680_vm8 = vcmp.lt.f32.partialorder %v4816_v5, 0.0 }
0x121d   :  { %v2551_v6 = vmul.f32 0.3275911, %v4819_v8  ;;  %v2552_v42 = vmul.f32 0.3275911, %v4822_v2  ;;  %v2655_v38 = vsub.f32 0.0, %v4819_v8  ;;  %v2656_v52 = vsub.f32 0.0, %v4822_v2 }
0x121f   :  { %v2555_v24 = vadd.f32 1.0, %v2551_v6  ;;  %v4826_v15 = vadd.f32 1.0, %v2552_v42  ;;  %v2659_v51 = vmul.f32 %v2655_v38, %v4819_v8  ;;  %v2660_v6 = vmul.f32 %v2656_v52, %v4822_v2 }
0x1221   :  { %3170 = vrcp.f32 %v2555_v24  ;;  %v2570_v33 = vand.u32 2147483648, %v2555_v24  ;;  %v2568_v47 = vand.u32 2147483647, %v2555_v24  ;;  %v2585_v43 = vand.u32 2147483648, %v4826_v15 }
0x1222   :  { %3172 = vrcp.f32 %v4826_v15  ;;  %v2583_v57 = vand.u32 2147483647, %v4826_v15  ;;  %vm2564_vm14 = vweird.f32 %v2555_v24  ;;  %vm2579_vm2 = vweird.f32 %v4826_v15 }
0x1223   :  { %v2571_v60 = vor.u32 1.1754944e-38, %v2570_v33  ;;  %vm2569_vm9 = vcmp.eq.f32.partialorder %v2568_v47, 8.507059e+37  ;;  %v2586_v58 = vor.u32 1.1754944e-38, %v2585_v43  ;;  %v2663_v37 = vmul.f32 1.442695, %v2659_v51 }
0x1224   :  { %vm2584_vm4 = vcmp.eq.f32.partialorder %v2583_v57, 8.507059e+37  ;;  %v2665_v10 = vmul.f32 1.442695, %v2660_v6  ;;  %v2540_v57 = vmul.f32 0.5, %v4810_v26 }
0x1225   :  { %3174 = vpow2.f32 %v2663_v37 }
0x1226   :  { %3176 = vpow2.f32 %v2665_v10 }
0x1227   :  { %v3171_v21 = vpop.eup %3170 }
0x1228   :  { %v3173_v22 = vpop.eup %3172  ;;  %v2560_v25 = vmul.f32 %v3171_v21, %v2555_v24  ;;  %vm2565_vm11 = vweird.f32 %v3171_v21 }
0x1229   :  { %v2575_v9 = vmul.f32 %v3173_v22, %v4826_v15  ;;  %vm2580_vm12 = vweird.f32 %v3173_v22  ;;  %vm2566_vm10 = vmor %vm2564_vm14, %vm2565_vm11 }
0x122a   :  { %v2561_v30 = vsub.f32 1.0, %v2560_v25  ;;  %vm2581_vm3 = vmor %vm2579_vm2, %vm2580_vm12 }
0x122b   :  { %v2576_v34 = vsub.f32 1.0, %v2575_v9 }
0x122c   :  { %v2562_v40 = vmul.f32 %v3171_v21, %v2561_v30 }
0x122d   :  { %v2577_v63 = vmul.f32 %v3173_v22, %v2576_v34 }
0x122e   :  { %v2563_v28 = vadd.f32 %v3171_v21, %v2562_v40 }
0x122f   :  { %v2578_v4 = vadd.f32 %v3173_v22, %v2577_v63 }
0x1230   :  { %v2567_v39 = vsel %vm2566_vm10, %v3171_v21, %v2563_v28  ;;  %v3175_v21 = vpop.eup %3174 }
0x1231   :  { %v2572_v14 = vsel %vm2569_vm9, %v2571_v60, %v2567_v39  ;;  %v2582_v23 = vsel %vm2581_vm3, %v3173_v22, %v2578_v4  ;;  %v3177_v1 = vpop.eup %3176 }
0x1232   :  { %v2619_v59 = vmul.f32 1.0614054, %v2572_v14  ;;  %v2587_v61 = vsel %vm2584_vm4, %v2586_v58, %v2582_v23 }
0x1233   :  { %v2620_v3 = vmul.f32 1.0614054, %v2587_v61 }
0x1234   :  { %v2623_v7 = vadd.f32 -1.4531521, %v2619_v59 }
0x1235   :  { %v2624_v32 = vadd.f32 -1.4531521, %v2620_v3 }
0x1236   :  { %v2627_v62 = vmul.f32 %v2623_v7, %v2572_v14 }
0x1237   :  { %v2628_v42 = vmul.f32 %v2624_v32, %v2587_v61 }
0x1238   :  { %v2631_v0 = vadd.f32 1.4214138, %v2627_v62 }
0x1239   :  { %v2632_v24 = vadd.f32 1.4214138, %v2628_v42 }
0x123a   :  { %v2635_v15 = vmul.f32 %v2631_v0, %v2572_v14 }
0x123b   :  { %v2636_v11 = vmul.f32 %v2632_v24, %v2587_v61 }
0x123c   :  { %v2639_v12 = vadd.f32 -0.28449672, %v2635_v15 }
0x123d   :  { %v2640_v13 = vadd.f32 -0.28449672, %v2636_v11 }
0x123e   :  { %v2643_v16 = vmul.f32 %v2639_v12, %v2572_v14 }
0x123f   :  { %v2644_v17 = vmul.f32 %v2640_v13, %v2587_v61 }
0x1240   :  { %v2647_v18 = vadd.f32 0.2548296, %v2643_v16 }
0x1241   :  { %v2648_v19 = vadd.f32 0.2548296, %v2644_v17 }
0x1242   :  { %v2651_v8 = vmul.f32 %v2647_v18, %v2572_v14 }
0x1243   :  { %v2652_v31 = vmul.f32 %v2648_v19, %v2587_v61 }
0x1244   :  { %v2671_v2 = vmul.f32 %v3175_v21, %v2651_v8 }
0x1245   :  { %v2672_v22 = vmul.f32 %v3177_v1, %v2652_v31  ;;  %v2513_v25 = vpop.f32.mrf.mxu0  ;;  %v2536_v9 = vpop.f32.mrf.mxu1 }
0x1246   :  { %v2675_v27 = vsub.f32 1.0, %v2671_v2  ;;  %v4840_v29 = vadd.f32 %v2513_v25, %v2489_v54  ;;  %v4844_v30 = vadd.f32 %v2536_v9, %v2490_v55 }
0x1247   :  { %v2676_v33 = vsub.f32 1.0, %v2672_v22 }
0x1248   :  { %v2683_v34 = vsub.f32 0.0, %v2675_v27  ;;  %v4847_v36 = vmul.f32 0.70710677, %v4840_v29  ;;  %v4851_v40 = vmul.f32 0.70710677, %v4844_v30 }
0x1249   :  { %v2684_v50 = vsub.f32 0.0, %v2676_v33 }
0x124a   :  { %v2687_v47 = vsel %vm2679_vm6, %v2683_v34, %v2675_v27  ;;  %v2549_v54 = vand.u32 2147483647, %v4847_v36  ;;  %v2550_v63 = vand.u32 2147483647, %v4851_v40  ;;  %vm2681_vm10 = vcmp.lt.f32.partialorder %v4847_v36, 0.0 }
0x124b   :  { %v2691_v55 = vadd.f32 1.0, %v2687_v47  ;;  %v2688_v43 = vsel %vm2680_vm8, %v2684_v50, %v2676_v33  ;;  %vm2682_vm2 = vcmp.lt.f32.partialorder %v4851_v40, 0.0 }
0x124c   :  { %v2692_v46 = vadd.f32 1.0, %v2688_v43  ;;  %v2553_v48 = vmul.f32 0.3275911, %v2549_v54  ;;  %v2554_v28 = vmul.f32 0.3275911, %v2550_v63  ;;  %v2657_v6 = vsub.f32 0.0, %v2549_v54 }
0x124d   :  { %v2695_v53 = vmul.f32 %v2691_v55, %v2539_v49  ;;  %v2658_v37 = vsub.f32 0.0, %v2550_v63 }
0x124e   :  { %v2696_v60 = vmul.f32 %v2692_v46, %v2540_v57  ;;  %v2557_v4 = vadd.f32 1.0, %v2553_v48  ;;  %v2558_v56 = vadd.f32 1.0, %v2554_v28  ;;  %v2661_v12 = vmul.f32 %v2657_v6, %v2549_v54  ;;  %v2855_v6 = vld [vmem:[%s4948_s17 + $0x70] sm:$0xff] }
0x124f   :  { %2753 = vmatmul.f32.vlgmr.msra.gmra.mxu2 %v2695_v53  ;;  %v2662_v16 = vmul.f32 %v2658_v37, %v2550_v63  ;;  %v2541_v28 = vmul.f32 0.5, %v4840_v29 }
0x1250   :  { %3178 = vrcp.f32 %v2557_v4  ;;  %2776 = vmatmul.f32.vlgmr.msra.gmra.mxu3 %v2696_v60  ;;  %v2600_v38 = vand.u32 2147483648, %v2557_v4  ;;  %v2598_v26 = vand.u32 2147483647, %v2557_v4  ;;  %v2615_v59 = vand.u32 2147483648, %v2558_v56 }
0x1251   :  { %3180 = vrcp.f32 %v2558_v56  ;;  %v2613_v52 = vand.u32 2147483647, %v2558_v56  ;;  %vm2594_vm13 = vweird.f32 %v2557_v4  ;;  %vm2609_vm1 = vweird.f32 %v2558_v56 }
0x1252   :  { %v2601_v7 = vor.u32 1.1754944e-38, %v2600_v38  ;;  %vm2599_vm11 = vcmp.eq.f32.partialorder %v2598_v26, 8.507059e+37  ;;  %v2616_v62 = vor.u32 1.1754944e-38, %v2615_v59  ;;  %v2667_v8 = vmul.f32 1.442695, %v2661_v12  ;;  %v2851_v12 = vld [vmem:[%s4948_s17 + $0x50] sm:$0xff] }
0x1253   :  { %vm2614_vm14 = vcmp.eq.f32.partialorder %v2613_v52, 8.507059e+37  ;;  %v2669_v31 = vmul.f32 1.442695, %v2662_v16  ;;  %v2849_v16 = vld [vmem:[%s4948_s17 + $0x40] sm:$0xff] }
0x1254   :  { %3182 = vpow2.f32 %v2667_v8  ;;  %v2845_v8 = vld [vmem:[%s4948_s17 + $0x20] sm:$0xff] }
0x1255   :  { %3184 = vpow2.f32 %v2669_v31  ;;  %v2843_v31 = vld [vmem:[%s4948_s17 + $0x10] sm:$0xff] }
0x1256   :  { %v3179_v5 = vpop.eup %3178 }
0x1257   :  { %v3181_v45 = vpop.eup %3180  ;;  %v2590_v44 = vmul.f32 %v3179_v5, %v2557_v4  ;;  %vm2595_vm15 = vweird.f32 %v3179_v5 }
0x1258   :  { %v2605_v39 = vmul.f32 %v3181_v45, %v2558_v56  ;;  %vm2610_vm5 = vweird.f32 %v3181_v45  ;;  %vm2596_vm7 = vmor %vm2594_vm13, %vm2595_vm15  ;;  %v2542_v56 = vmul.f32 0.5, %v4844_v30 }
0x1259   :  { %v2591_v58 = vsub.f32 1.0, %v2590_v44  ;;  %vm2611_vm12 = vmor %vm2609_vm1, %vm2610_vm5 }
0x125a   :  { %v2606_v14 = vsub.f32 1.0, %v2605_v39  ;;  %v3183_v47 = vpop.eup %3182  ;;  %v3084_v39 = vld [vmem:[#allocation19 + $0x1] ss:$0 sm:$0xff] }
0x125b   :  { %v2592_v23 = vmul.f32 %v3179_v5, %v2591_v58  ;;  %v3185_v49 = vpop.eup %3184 }
0x125c   :  { %v2607_v61 = vmul.f32 %v3181_v45, %v2606_v14 }
0x125d   :  { %v2593_v3 = vadd.f32 %v3179_v5, %v2592_v23 }
0x125e   :  { %v2608_v51 = vadd.f32 %v3181_v45, %v2607_v61 }
0x125f   :  { %v2597_v32 = vsel %vm2596_vm7, %v3179_v5, %v2593_v3 }
0x1260   :  { %v2602_v42 = vsel %vm2599_vm11, %v2601_v7, %v2597_v32  ;;  %v2612_v0 = vsel %vm2611_vm12, %v3181_v45, %v2608_v51 }
0x1261   :  { %v2621_v24 = vmul.f32 1.0614054, %v2602_v42  ;;  %v2617_v15 = vsel %vm2614_vm14, %v2616_v62, %v2612_v0 }
0x1262   :  { %v2622_v10 = vmul.f32 1.0614054, %v2617_v15 }
0x1263   :  { %v2625_v11 = vadd.f32 -1.4531521, %v2621_v24 }
0x1264   :  { %v2626_v13 = vadd.f32 -1.4531521, %v2622_v10  ;;  %v2853_v10 = vld [vmem:[%s4948_s17 + $0x60] sm:$0xff] }
0x1265   :  { %v2629_v17 = vmul.f32 %v2625_v11, %v2602_v42  ;;  %v2852_v11 = vld [vmem:[%s4948_s17 + $0x58] sm:$0xff] }
0x1266   :  { %v2630_v18 = vmul.f32 %v2626_v13, %v2617_v15  ;;  %v2850_v13 = vld [vmem:[%s4948_s17 + $0x48] sm:$0xff] }
0x1267   :  { %v2633_v19 = vadd.f32 1.4214138, %v2629_v17  ;;  %v2848_v17 = vld [vmem:[%s4948_s17 + $0x38] sm:$0xff] }
0x1268   :  { %v2634_v21 = vadd.f32 1.4214138, %v2630_v18  ;;  %v2847_v18 = vld [vmem:[%s4948_s17 + $0x30] sm:$0xff] }
0x1269   :  { %v2637_v1 = vmul.f32 %v2633_v19, %v2602_v42  ;;  %v2846_v19 = vld [vmem:[%s4948_s17 + $0x28] sm:$0xff] }
0x126a   :  { %v2638_v2 = vmul.f32 %v2634_v21, %v2617_v15  ;;  %v2844_v21 = vld [vmem:[%s4948_s17 + $0x18] sm:$0xff] }
0x126b   :  { %v2641_v22 = vadd.f32 -0.28449672, %v2637_v1  ;;  %v2842_v1 = vld [vmem:[%s4948_s17 + $0x8] sm:$0xff] }
0x126c   :  { %v2642_v25 = vadd.f32 -0.28449672, %v2638_v2  ;;  %v2841_v2 = vld [vmem:[%s4948_s17] sm:$0xff] }
0x126d   :  { %v2645_v9 = vmul.f32 %v2641_v22, %v2602_v42 }
0x126e   :  { %v2646_v27 = vmul.f32 %v2642_v25, %v2617_v15 }
0x126f   :  { %v2649_v33 = vadd.f32 0.2548296, %v2645_v9 }
0x1270   :  { %v2650_v34 = vadd.f32 0.2548296, %v2646_v27 }
0x1271   :  { %v2653_v50 = vmul.f32 %v2649_v33, %v2602_v42 }
0x1272   :  { %v2654_v54 = vmul.f32 %v2650_v34, %v2617_v15  ;;  %v2854_v15 = vld [vmem:[%s4948_s17 + $0x68] sm:$0xff] }
0x1273   :  { %v2673_v55 = vmul.f32 %v3183_v47, %v2653_v50 }
0x1274   :  { %v2674_v43 = vmul.f32 %v3185_v49, %v2654_v54  ;;  %v3085_v49 = vld [vmem:[#allocation20] ss:$0 sm:$0xff] }
0x1275   :  { %v2677_v63 = vsub.f32 1.0, %v2673_v55 }
0x1276   :  { %v2678_v57 = vsub.f32 1.0, %v2674_v43 }
0x1277   :  { %v2685_v46 = vsub.f32 0.0, %v2677_v63 }
0x1278   :  { %v2686_v48 = vsub.f32 0.0, %v2678_v57 }
0x1279   :  { %v2689_v53 = vsel %vm2681_vm10, %v2685_v46, %v2677_v63  ;;  %v3086_v63 = vld [vmem:[#allocation22] ss:$0 sm:$0xff] }
0x127a   :  { %v2693_v60 = vadd.f32 1.0, %v2689_v53  ;;  %v2690_v4 = vsel %vm2682_vm2, %v2686_v48, %v2678_v57 }
0x127b   :  { %v2694_v5 = vadd.f32 1.0, %v2690_v4 }
0x127c   :  { %v2697_v45 = vmul.f32 %v2693_v60, %v2541_v28 }
0x127d   :  { %v2698_v44 = vmul.f32 %v2694_v5, %v2542_v56 }
0x127e   :  { %2756 = vmatmul.f32.gmra.mxu2 %v2697_v45 }
0x127f   :  { %2779 = vmatmul.f32.gmra.mxu3 %v2698_v44 }
0x12d2   :  { %v2754_v58 = vpop.f32.mrf.mxu2 }
0x12d3   :  { %v2755_v14 = vadd.f32 %v3084_v39, %v2754_v58  ;;  %v2777_v38 = vpop.f32.mrf.mxu3 }
0x12d5   :  { %v2778_v36 = vadd.f32 %v2777_v38, %v2755_v14 }
0x12d7   :  { %v2783_v23 = vadd.f32 %v2778_v36, %v4773_v35  ;;  %v2856_v35 = vld [vmem:[%s4948_s17 + $0x78] sm:$0xff] }
0x12d8   :  { %2861 = vmatpush.msra.mxu0 %v2856_v35  ;;  %v3087_v36 = vld [vmem:[#allocation23] ss:$0 sm:$0xff] }
0x12d9   :  { %v2787_v40 = vsel %vm524_vm0, %v2783_v23, 0.0 }
0x12da   :  { %2788 = vadd.xlane.f32.xlu2 %v2787_v40  ;;  %2862 = vmatpush.msra.mxu0 %v2855_v6 }
0x12dc   :  { %2863 = vmatpush.msra.mxu0 %v2854_v15 }
0x12de   :  { %2864 = vmatpush.msra.mxu0 %v2853_v10 }
0x12e0   :  { %2865 = vmatpush.msra.mxu0 %v2852_v11 }
0x12e2   :  { %2866 = vmatpush.msra.mxu0 %v2851_v12 }
0x12e4   :  { %2867 = vmatpush.msra.mxu0 %v2850_v13 }
0x12e6   :  { %2868 = vmatpush.msra.mxu0 %v2849_v16 }
0x12e8   :  { %2869 = vmatpush.msra.mxu0 %v2848_v17 }
0x12ea   :  { %2870 = vmatpush.msra.mxu0 %v2847_v18 }
0x12ec   :  { %2871 = vmatpush.msra.mxu0 %v2846_v19 }
0x12ee   :  { %2872 = vmatpush.msra.mxu0 %v2845_v8 }
0x12f0   :  { %2873 = vmatpush.msra.mxu0 %v2844_v21 }
0x12f2   :  { %2874 = vmatpush.msra.mxu0 %v2843_v31 }
0x12f4   :  { %2875 = vmatpush.msra.mxu0 %v2842_v1 }
0x12f6   :  { %2876 = vmatpush.msra.mxu0 %v2841_v2 }
0x1301   :  { %v2757_v29 = vpop.f32.mrf.mxu2 }
0x1302   :  { %v2758_v26 = vadd.f32 %v3084_v39, %v2757_v29  ;;  %v2780_v59 = vpop.f32.mrf.mxu3 }
0x1304   :  { %v2781_v61 = vadd.f32 %v2780_v59, %v2758_v26 }
0x1306   :  { %v2784_v30 = vadd.f32 %v2781_v61, %v4778_v41 }
0x1308   :  { %v2790_v52 = vsel %vm524_vm0, %v2784_v30, 0.0 }
0x1309   :  { %2791 = vadd.xlane.f32.xlu0 %v2790_v52 }
0x134d   :  { %v2789_v3 = vpop.xlane.xlu2 %2788 }
0x134e   :  { %v2793_v7 = vmul.f32 %v2789_v3, %v4083_v20 }
0x1350   :  { %v2795_v51 = vsub.f32 %v2783_v23, %v2793_v7 }
0x1352   :  { %v2797_v32 = vmul.f32 %v2795_v51, %v2795_v51 }
0x1354   :  { %v2799_v62 = vsel %vm524_vm0, %v2797_v32, 0.0 }
0x1355   :  { %2800 = vadd.xlane.f32.xlu1 %v2799_v62 }
0x137c   :  { %v2792_v41 = vpop.xlane.xlu0 %2791 }
0x137d   :  { %v2794_v42 = vmul.f32 %v2792_v41, %v4083_v20 }
0x137f   :  { %v4875_v0 = vsub.f32 %v2784_v30, %v2794_v42 }
0x1381   :  { %v2798_v37 = vmul.f32 %v4875_v0, %v4875_v0 }
0x1383   :  { %v2802_v24 = vsel %vm524_vm0, %v2798_v37, 0.0 }
0x1384   :  { %2803 = vadd.xlane.f32.xlu2 %v2802_v24 }
0x13c8   :  { %v2801_v22 = vpop.xlane.xlu1 %2800 }
0x13c9   :  { %v2805_v25 = vmul.f32 %v2801_v22, %v4083_v20 }
0x13cb   :  { %v2807_v9 = vadd.f32 1e-06, %v2805_v25 }
0x13cd   :  { %3186 = vrsqrt.f32 %v2807_v9  ;;  %vm2815_vm9 = vweird.f32 %v2807_v9 }
0x13d3   :  { %v3187_v27 = vpop.eup %3186 }
0x13d4   :  { %v2810_v33 = vmul.f32 %v3187_v27, %v2807_v9  ;;  %vm2816_vm0 = vweird.f32 %v3187_v27 }
0x13d5   :  { %vm2817_vm3 = vmor %vm2815_vm9, %vm2816_vm0 }
0x13d6   :  { %v2811_v34 = vmul.f32 %v3187_v27, %v2810_v33 }
0x13d8   :  { %v2812_v50 = vmul.f32 0.5, %v2811_v34 }
0x13da   :  { %v2813_v47 = vsub.f32 1.5, %v2812_v50 }
0x13dc   :  { %v2814_v54 = vmul.f32 %v3187_v27, %v2813_v47 }
0x13de   :  { %v2818_v55 = vsel %vm2817_vm3, %v3187_v27, %v2814_v54 }
0x13df   :  { %v2829_v43 = vmul.f32 %v2818_v55, %v2795_v51 }
0x13e1   :  { %v2834_v57 = vmul.f32 %v3085_v49, %v2829_v43 }
0x13e3   :  { %v2839_v46 = vadd.f32 %v3086_v63, %v2834_v57 }
0x13e5   :  { %2877 = vmatmul.f32.vlgmr.msra.gmra.mxu0 %v2839_v46 }
0x13f7   :  { %v2804_v48 = vpop.xlane.xlu2 %2803 }
0x13f8   :  { %v2806_v53 = vmul.f32 %v2804_v48, %v4083_v20 }
0x13fa   :  { %v2808_v28 = vadd.f32 1e-06, %v2806_v53 }
0x13fc   :  { %3188 = vrsqrt.f32 %v2808_v28  ;;  %vm2825_vm6 = vweird.f32 %v2808_v28 }
0x1402   :  { %v3189_v60 = vpop.eup %3188 }
0x1403   :  { %v2820_v4 = vmul.f32 %v3189_v60, %v2808_v28  ;;  %vm2826_vm4 = vweird.f32 %v3189_v60 }
0x1404   :  { %vm2827_vm8 = vmor %vm2825_vm6, %vm2826_vm4 }
0x1405   :  { %v2821_v56 = vmul.f32 %v3189_v60, %v2820_v4 }
0x1407   :  { %v2822_v5 = vmul.f32 0.5, %v2821_v56 }
0x1409   :  { %v2823_v45 = vsub.f32 1.5, %v2822_v5 }
0x140b   :  { %v2824_v44 = vmul.f32 %v3189_v60, %v2823_v45 }
0x140d   :  { %v2828_v39 = vsel %vm2827_vm8, %v3189_v60, %v2824_v44 }
0x140e   :  { %v2830_v58 = vmul.f32 %v2828_v39, %v4875_v0 }
0x1410   :  { %v2835_v14 = vmul.f32 %v3085_v49, %v2830_v58 }
0x1412   :  { %v2840_v38 = vadd.f32 %v3086_v63, %v2835_v14 }
0x1414   :  { %2880 = vmatmul.f32.gmra.mxu0 %v2840_v38 }
0x1462   :  { %v2878_v23 = vpop.f32.mrf.mxu0 }
0x1463   :  { %v2879_v20 = vadd.f32 %v3087_v36, %v2878_v23 }
0x1465   :  { %2884 = vst [vmem:[%s4950_s19] sm:$0xff] %v2879_v20 }
0x1491   :  { %v2881_v40 = vpop.f32.mrf.mxu0 }
0x1492   :  { %v2882_v29 = vadd.f32 %v3087_v36, %v2881_v40 }
0x1494   :  { %2885 = vst [vmem:[%s4950_s19 + $0x8] sm:$0xff] %v2882_v29 }
0x1495   :  { %2890 = vsyncpa [#allocation4], 1 }
0x1496   :  { %2891 = vsyncpa [#allocation6], 1 }
0x1497   :  { %2892 = vsyncpa [#allocation9], 1 }
0x1498   :  { %2893 = vsyncpa [#allocation12], 1 }
0x1499   :  { %2894 = vsyncpa [#allocation15], 1 }
0x149a   :  { %2895 = vsyncpa [#allocation18], 1 }
0x149b   :  { %2896 = vsyncpa [#allocation21], 1 }
0x149c   :  { %2897 = vsyncpa [#allocation24], 1 }

</bundles_post_ra>
